<compile_context>
chip_gen: v7x
topology: tpu7x:2x2x1
jax: 0.10.0
libtpu: 0.0.40
codegen_flags: <defaults>
</compile_context>

<pallas_src>
import jax
import jax.numpy as jnp
from jax.experimental import pallas as pl
from jax.experimental.pallas import tpu as pltpu

# ---- small synthetic Llama config (all lane-aligned) ----
BATCH = 2
SEQ = 128
HIDDEN = 128
N_HEADS = 2
HEAD_DIM = HIDDEN // N_HEADS          # 64
INTER = 384
EPS = 1e-6
ROPE_THETA = 10000.0
NEG_INF = float(jnp.finfo(jnp.float32).min)


def _rmsnorm(x, w, eps):
    # LlamaRMSNorm: x * rsqrt(mean(x^2) + eps) * weight   (f32)
    var = jnp.mean(x * x, axis=-1, keepdims=True)
    return (x * jax.lax.rsqrt(var + eps)) * w


# -------------------- fused decoder-layer kernel --------------------
def decoder_layer_kernel(x_ref, ln1_ref, ln2_ref, wqkv_ref, wo_ref,
                         wgu_ref, wd_ref, cos_ref, sin_ref, o_ref,
                         qh_s, kh_s, vh_s):
    f32 = jnp.float32
    bf16 = jnp.bfloat16
    x = x_ref[0]                                       # (S, H) f32, one sequence

    # ---------------- attention half ----------------
    xn = _rmsnorm(x, ln1_ref[...], EPS)                # input_layernorm
    qkv = jnp.dot(xn.astype(bf16), wqkv_ref[...],
                  preferred_element_type=f32)          # (S, 5H) fused QKV
    qk = qkv[:, :2 * HIDDEN]                           # [q | k]
    qk_rot = qkv[:, 2 * HIDDEN:4 * HIDDEN]             # [rot_half(q)|rot_half(k)]
    v = qkv[:, 4 * HIDDEN:]                            # (S, H)

    # RoPE on a lane-dense (S, 2H) slab; 1/sqrt(head_dim) pre-folded into the
    # q half of cos/sin in the wrapper.
    qk_roped = (qk * cos_ref[...] + qk_rot * sin_ref[...]).astype(bf16)
    q = qk_roped[:, :HIDDEN]                           # (S, H) bf16
    k = qk_roped[:, HIDDEN:]
    v_b = v.astype(bf16)

    # pack head-major (NH, S, HD) into VMEM scratch (one-time slice/copy,
    # replaces the old per-head accumulation loop of tiny-K dots)
    for h in range(N_HEADS):
        sl = slice(h * HEAD_DIM, (h + 1) * HEAD_DIM)
        qh_s[h] = q[:, sl]
        kh_s[h] = k[:, sl]
        vh_s[h] = v_b[:, sl]

    # causal mask as additive f32 bias, built once (no HBM mask input)
    row_i = jax.lax.broadcasted_iota(jnp.int32, (SEQ, SEQ), 0)
    col_i = jax.lax.broadcasted_iota(jnp.int32, (SEQ, SEQ), 1)
    bias = jnp.where(col_i <= row_i, 0.0, NEG_INF).astype(f32)   # (S, S)

    # batched-over-heads score / PV einsums (single batch dim -> MXU batched)
    s = jnp.einsum('hqd,hkd->hqk', qh_s[...], kh_s[...],
                   preferred_element_type=f32)         # (NH, S, S)
    s = s + bias[None]
    s = s - jnp.max(s, axis=-1, keepdims=True)
    p = jnp.exp(s)
    p = p * pl.reciprocal(jnp.sum(p, axis=-1, keepdims=True), approx=True)
    o_h = jnp.einsum('hqk,hkd->hqd', p.astype(bf16), vh_s[...],
                     preferred_element_type=f32)       # (NH, S, HD)

    # concat heads on lanes -> one wide K=H Wo matmul (no per-head Wo folds)
    o_cat = jnp.concatenate([o_h[h] for h in range(N_HEADS)], axis=-1)  # (S, H)
    attn = jnp.dot(o_cat.astype(bf16), wo_ref[...],
                   preferred_element_type=f32)         # (S, H)
    h1 = x + attn                                      # residual add

    # ---------------- MLP half ----------------
    hn = _rmsnorm(h1, ln2_ref[...], EPS)               # post_attention_layernorm
    gu = jnp.dot(hn.astype(bf16), wgu_ref[...],
                 preferred_element_type=f32)           # (S, 2*INTER) fused gate/up
    g = gu[:, :INTER]
    u = gu[:, INTER:]
    # TODO(synk): dampen_neurons masking of up_output not implemented (None path)
    inter = (g * jax.nn.sigmoid(g)) * u                # SiLU(gate) * up  (f32)
    down = jnp.dot(inter.astype(bf16), wd_ref[...],
                   preferred_element_type=f32)         # (S, H)
    o_ref[0] = h1 + down                               # lane-dense (S,128) store


# -------------------- wrapper --------------------
def llama_decoder_layer(x, params, cos_sd, sin_sd):
    B, S, H = x.shape
    assert (B, S, H) == (BATCH, SEQ, HIDDEN)
    bf16 = jnp.bfloat16
    scale = 1.0 / (HEAD_DIM ** 0.5)

    def rot_cols(w):
        # columns of w permuted/signed so that x @ rot_cols(w) == rotate_half(x @ w)
        w4 = w.reshape(H, N_HEADS, HEAD_DIM)
        wr = jnp.concatenate([-w4[..., HEAD_DIM // 2:], w4[..., :HEAD_DIM // 2]],
                             axis=-1)
        return wr.reshape(H, H)

    # fused weights (bf16 MXU inputs; accumulation stays f32 in-kernel)
    w_qkv = jnp.concatenate(
        [params["wq"], params["wk"], rot_cols(params["wq"]),
         rot_cols(params["wk"]), params["wv"]], axis=1).astype(bf16)   # (H, 5H)
    w_o = params["wo"].astype(bf16)                                    # (H, H)
    w_gu = jnp.concatenate([params["wg"], params["wu"]],
                           axis=1).astype(bf16)                        # (H, 2I)
    w_d = params["wd"].astype(bf16)                                    # (I, H)

    # cos/sin tiled per-head to (S, H), doubled to cover [q | k]; the attention
    # scale is folded into the q half.
    cos_rows = jnp.tile(cos_sd, (1, N_HEADS))                          # (S, H)
    sin_rows = jnp.tile(sin_sd, (1, N_HEADS))
    cos2 = jnp.concatenate([cos_rows * scale, cos_rows], axis=1)       # (S, 2H)
    sin2 = jnp.concatenate([sin_rows * scale, sin_rows], axis=1)

    def full_spec(shape):
        # whole array resident; constant index_map -> not re-fetched per step
        return pl.BlockSpec(shape, lambda b, _n=len(shape): (0,) * _n)

    out = pl.pallas_call(
        decoder_layer_kernel,
        out_shape=jax.ShapeDtypeStruct((B, S, H), jnp.float32),
        grid=(B,),
        in_specs=[
            pl.BlockSpec((1, S, H), lambda b: (b, 0, 0)),    # x (per sequence)
            full_spec((1, H)),                               # ln1 weight
            full_spec((1, H)),                               # ln2 weight
            full_spec((H, 5 * H)),                           # fused QKV
            full_spec((H, H)),                               # Wo
            full_spec((H, 2 * INTER)),                       # fused gate/up
            full_spec((INTER, H)),                           # Wd
            full_spec((S, 2 * H)),                           # cos
            full_spec((S, 2 * H)),                           # sin
        ],
        out_specs=pl.BlockSpec((1, S, H), lambda b: (b, 0, 0)),
        scratch_shapes=[
            pltpu.VMEM((N_HEADS, S, HEAD_DIM), bf16),        # q head-major
            pltpu.VMEM((N_HEADS, S, HEAD_DIM), bf16),        # k head-major
            pltpu.VMEM((N_HEADS, S, HEAD_DIM), bf16),        # v head-major
        ],
        compiler_params=pltpu.CompilerParams(
            dimension_semantics=("parallel",)),              # 2 TCs on v7x
    )(x, params["ln1_w"], params["ln2_w"], w_qkv, w_o, w_gu, w_d, cos2, sin2)
    return out


# -------------------- pure JAX reference (same bf16 matmul casts) --------------
def _ref_layer(x, p, cos_sd, sin_sd):
    bf16 = jnp.bfloat16
    f32 = jnp.float32

    def rms(v, w):
        var = jnp.mean(v * v, axis=-1, keepdims=True)
        return v * jax.lax.rsqrt(var + EPS) * w

    def mm(a, w):
        return jnp.dot(a.astype(bf16), w.astype(bf16), preferred_element_type=f32)

    B, S, H = x.shape
    xn = rms(x, p["ln1_w"][0])
    q = mm(xn, p["wq"])
    k = mm(xn, p["wk"])
    v = mm(xn, p["wv"])

    def split_heads(t):
        return t.reshape(B, S, N_HEADS, HEAD_DIM).transpose(0, 2, 1, 3)

    q, k, v = split_heads(q), split_heads(k), split_heads(v)

    def rope(t):
        t1 = t[..., :HEAD_DIM // 2]
        t2 = t[..., HEAD_DIM // 2:]
        rot = jnp.concatenate([-t2, t1], axis=-1)
        return t * cos_sd[None, None] + rot * sin_sd[None, None]

    q, k = rope(q), rope(k)
    s = jnp.einsum("bhqd,bhkd->bhqk", q.astype(bf16), k.astype(bf16),
                   preferred_element_type=f32) / (HEAD_DIM ** 0.5)
    mask = jnp.where(jnp.arange(S)[None, :] <= jnp.arange(S)[:, None],
                     0.0, NEG_INF)
    s = s + mask
    pa = jax.nn.softmax(s, axis=-1)
    a = jnp.einsum("bhqk,bhkd->bhqd", pa.astype(bf16), v.astype(bf16),
                   preferred_element_type=f32)
    a = a.transpose(0, 2, 1, 3).reshape(B, S, H)
    h = x + mm(a, p["wo"])

    hn = rms(h, p["ln2_w"][0])
    g = mm(hn, p["wg"])
    u = mm(hn, p["wu"])
    inter = jax.nn.silu(g) * u
    return h + mm(inter, p["wd"])


if __name__ == "__main__":
    key = jax.random.PRNGKey(0)
    keys = jax.random.split(key, 10)

    params = {
        "ln1_w": 1.0 + 0.1 * jax.random.normal(keys[8], (1, HIDDEN), jnp.float32),
        "ln2_w": 1.0 + 0.1 * jax.random.normal(keys[9], (1, HIDDEN), jnp.float32),
        "wq": 0.05 * jax.random.normal(keys[0], (HIDDEN, HIDDEN), jnp.float32),
        "wk": 0.05 * jax.random.normal(keys[1], (HIDDEN, HIDDEN), jnp.float32),
        "wv": 0.05 * jax.random.normal(keys[2], (HIDDEN, HIDDEN), jnp.float32),
        "wo": 0.05 * jax.random.normal(keys[3], (HIDDEN, HIDDEN), jnp.float32),
        "wg": 0.05 * jax.random.normal(keys[4], (HIDDEN, INTER), jnp.float32),
        "wu": 0.05 * jax.random.normal(keys[5], (HIDDEN, INTER), jnp.float32),
        "wd": 0.05 * jax.random.normal(keys[6], (INTER, HIDDEN), jnp.float32),
    }

    x = jax.random.normal(keys[7], (BATCH, SEQ, HIDDEN), jnp.float32)

    # RoPE tables (default Llama rotary embedding, position_ids = arange(SEQ))
    inv_freq = 1.0 / (ROPE_THETA ** (jnp.arange(0, HEAD_DIM, 2,
                                                dtype=jnp.float32) / HEAD_DIM))
    pos = jnp.arange(SEQ, dtype=jnp.float32)
    freqs = pos[:, None] * inv_freq[None, :]
    emb = jnp.concatenate([freqs, freqs], axis=-1)        # (S, HEAD_DIM)
    cos_sd = jnp.cos(emb)
    sin_sd = jnp.sin(emb)

    out = llama_decoder_layer(x, params, cos_sd, sin_sd)
    out = jax.block_until_ready(out)

    ref = _ref_layer(x, params, cos_sd, sin_sd)
    assert out.shape == (BATCH, SEQ, HIDDEN)
    assert jnp.allclose(out, ref, atol=2e-2, rtol=2e-2), "mismatch vs reference"

    print("KERNEL_OK")
</pallas_src>

<mosaic_0001>
module attributes {stable_mosaic.version = 11 : i64} {
  func.func @decoder_layer_kernel(%arg0: i32, %arg1: memref<1x128x128xf32, #tpu.memory_space<vmem>>, %arg2: memref<1x128xf32, #tpu.memory_space<vmem>>, %arg3: memref<1x128xf32, #tpu.memory_space<vmem>>, %arg4: memref<128x640xbf16, #tpu.memory_space<vmem>>, %arg5: memref<128x128xbf16, #tpu.memory_space<vmem>>, %arg6: memref<128x768xbf16, #tpu.memory_space<vmem>>, %arg7: memref<384x128xbf16, #tpu.memory_space<vmem>>, %arg8: memref<128x256xf32, #tpu.memory_space<vmem>>, %arg9: memref<128x256xf32, #tpu.memory_space<vmem>>, %arg10: memref<1x128x128xf32, #tpu.memory_space<vmem>>, %arg11: memref<2x128x64xbf16, #tpu.memory_space<vmem>>, %arg12: memref<2x128x64xbf16, #tpu.memory_space<vmem>>, %arg13: memref<2x128x64xbf16, #tpu.memory_space<vmem>>) attributes {dimension_semantics = [#tpu.dimension_semantics<parallel>], iteration_bounds = array<i64: 2>, scalar_prefetch = 0 : i64, scratch_operands = 3 : i64, tpu.core_type = #tpu.core_type<tc>, window_params = [{transform_indices = @transform_0, window_bounds = array<i64: 1, 128, 128>}, {pipeline_mode = #tpu.pipeline_mode<synchronous>, transform_indices = @transform_1, window_bounds = array<i64: 1, 128>}, {pipeline_mode = #tpu.pipeline_mode<synchronous>, transform_indices = @transform_2, window_bounds = array<i64: 1, 128>}, {pipeline_mode = #tpu.pipeline_mode<synchronous>, transform_indices = @transform_3, window_bounds = array<i64: 128, 640>}, {pipeline_mode = #tpu.pipeline_mode<synchronous>, transform_indices = @transform_4, window_bounds = array<i64: 128, 128>}, {pipeline_mode = #tpu.pipeline_mode<synchronous>, transform_indices = @transform_5, window_bounds = array<i64: 128, 768>}, {pipeline_mode = #tpu.pipeline_mode<synchronous>, transform_indices = @transform_6, window_bounds = array<i64: 384, 128>}, {pipeline_mode = #tpu.pipeline_mode<synchronous>, transform_indices = @transform_7, window_bounds = array<i64: 128, 256>}, {pipeline_mode = #tpu.pipeline_mode<synchronous>, transform_indices = @transform_8, window_bounds = array<i64: 128, 256>}, {transform_indices = @transform_9, window_bounds = array<i64: 1, 128, 128>}]} {
    %c0 = arith.constant 0 : index
    %c0_0 = arith.constant 0 : index
    %c0_1 = arith.constant 0 : index
    %0 = vector.load %arg1[%c0, %c0_0, %c0_1] : memref<1x128x128xf32, #tpu.memory_space<vmem>>, vector<1x128x128xf32>
    %1 = vector.shape_cast %0 : vector<1x128x128xf32> to vector<128x128xf32>
    %c0_2 = arith.constant 0 : index
    %c0_3 = arith.constant 0 : index
    %2 = vector.load %arg2[%c0_2, %c0_3] : memref<1x128xf32, #tpu.memory_space<vmem>>, vector<1x128xf32>
    %3 = arith.mulf %1, %1 : vector<128x128xf32>
    %cst = arith.constant dense<0.000000e+00> : vector<128xf32>
    %4 = vector.multi_reduction <add>, %3, %cst [1] : vector<128x128xf32> to vector<128xf32>
    %5 = vector.shape_cast %4 : vector<128xf32> to vector<128x1xf32>
    %cst_4 = arith.constant 1.280000e+02 : f32
    %6 = vector.broadcast %cst_4 : f32 to vector<128x1xf32>
    %7 = arith.divf %5, %6 : vector<128x1xf32>
    %cst_5 = arith.constant 9.99999997E-7 : f32
    %8 = vector.broadcast %cst_5 : f32 to vector<128x1xf32>
    %9 = arith.addf %7, %8 : vector<128x1xf32>
    %10 = math.rsqrt %9 : vector<128x1xf32>
    %11 = vector.broadcast %10 : vector<128x1xf32> to vector<128x128xf32>
    %12 = arith.mulf %1, %11 : vector<128x128xf32>
    %13 = vector.broadcast %2 : vector<1x128xf32> to vector<128x128xf32>
    %14 = arith.mulf %12, %13 : vector<128x128xf32>
    %15 = arith.truncf %14 : vector<128x128xf32> to vector<128x128xbf16>
    %c0_6 = arith.constant 0 : index
    %c0_7 = arith.constant 0 : index
    %16 = vector.load %arg4[%c0_6, %c0_7] : memref<128x640xbf16, #tpu.memory_space<vmem>>, vector<128x640xbf16>
    %cst_8 = arith.constant dense<0.000000e+00> : vector<128x640xf32>
    %17 = tpu.matmul %15, %16, %cst_8 {dimension_numbers = #tpu.dot_dimension_numbers<[1], [0], [0], [1], [0, 0, 1, 1], [], []>} : vector<128x128xbf16>, vector<128x640xbf16>, vector<128x640xf32> -> vector<128x640xf32>
    %18 = vector.extract_strided_slice %17 {offsets = [0, 0], sizes = [128, 256], strides = [1, 1]} : vector<128x640xf32> to vector<128x256xf32>
    %19 = vector.extract_strided_slice %17 {offsets = [0, 256], sizes = [128, 256], strides = [1, 1]} : vector<128x640xf32> to vector<128x256xf32>
    %20 = vector.extract_strided_slice %17 {offsets = [0, 512], sizes = [128, 128], strides = [1, 1]} : vector<128x640xf32> to vector<128x128xf32>
    %c0_9 = arith.constant 0 : index
    %c0_10 = arith.constant 0 : index
    %21 = vector.load %arg8[%c0_9, %c0_10] : memref<128x256xf32, #tpu.memory_space<vmem>>, vector<128x256xf32>
    %22 = arith.mulf %18, %21 : vector<128x256xf32>
    %c0_11 = arith.constant 0 : index
    %c0_12 = arith.constant 0 : index
    %23 = vector.load %arg9[%c0_11, %c0_12] : memref<128x256xf32, #tpu.memory_space<vmem>>, vector<128x256xf32>
    %24 = arith.mulf %19, %23 : vector<128x256xf32>
    %25 = arith.addf %22, %24 : vector<128x256xf32>
    %26 = arith.truncf %25 : vector<128x256xf32> to vector<128x256xbf16>
    %27 = vector.extract_strided_slice %26 {offsets = [0, 0], sizes = [128, 128], strides = [1, 1]} : vector<128x256xbf16> to vector<128x128xbf16>
    %28 = vector.extract_strided_slice %26 {offsets = [0, 128], sizes = [128, 128], strides = [1, 1]} : vector<128x256xbf16> to vector<128x128xbf16>
    %29 = arith.truncf %20 : vector<128x128xf32> to vector<128x128xbf16>
    %30 = vector.extract_strided_slice %27 {offsets = [0, 0], sizes = [128, 64], strides = [1, 1]} : vector<128x128xbf16> to vector<128x64xbf16>
    %c0_13 = arith.constant 0 : index
    %c0_14 = arith.constant 0 : index
    %c0_15 = arith.constant 0 : index
    %31 = vector.load %arg11[%c0_13, %c0_14, %c0_15] : memref<2x128x64xbf16, #tpu.memory_space<vmem>>, vector<1x128x64xbf16>
    %32 = vector.shape_cast %31 : vector<1x128x64xbf16> to vector<128x64xbf16>
    %33 = vector.shape_cast %30 : vector<128x64xbf16> to vector<1x128x64xbf16>
    tpu.vector_store %arg11[%c0_13, %c0_14, %c0_15], %33 {strides = array<i32>} : memref<2x128x64xbf16, #tpu.memory_space<vmem>>, vector<1x128x64xbf16>,
    %34 = vector.extract_strided_slice %28 {offsets = [0, 0], sizes = [128, 64], strides = [1, 1]} : vector<128x128xbf16> to vector<128x64xbf16>
    %c0_16 = arith.constant 0 : index
    %c0_17 = arith.constant 0 : index
    %c0_18 = arith.constant 0 : index
    %35 = vector.load %arg12[%c0_16, %c0_17, %c0_18] : memref<2x128x64xbf16, #tpu.memory_space<vmem>>, vector<1x128x64xbf16>
    %36 = vector.shape_cast %35 : vector<1x128x64xbf16> to vector<128x64xbf16>
    %37 = vector.shape_cast %34 : vector<128x64xbf16> to vector<1x128x64xbf16>
    tpu.vector_store %arg12[%c0_16, %c0_17, %c0_18], %37 {strides = array<i32>} : memref<2x128x64xbf16, #tpu.memory_space<vmem>>, vector<1x128x64xbf16>,
    %38 = vector.extract_strided_slice %29 {offsets = [0, 0], sizes = [128, 64], strides = [1, 1]} : vector<128x128xbf16> to vector<128x64xbf16>
    %c0_19 = arith.constant 0 : index
    %c0_20 = arith.constant 0 : index
    %c0_21 = arith.constant 0 : index
    %39 = vector.load %arg13[%c0_19, %c0_20, %c0_21] : memref<2x128x64xbf16, #tpu.memory_space<vmem>>, vector<1x128x64xbf16>
    %40 = vector.shape_cast %39 : vector<1x128x64xbf16> to vector<128x64xbf16>
    %41 = vector.shape_cast %38 : vector<128x64xbf16> to vector<1x128x64xbf16>
    tpu.vector_store %arg13[%c0_19, %c0_20, %c0_21], %41 {strides = array<i32>} : memref<2x128x64xbf16, #tpu.memory_space<vmem>>, vector<1x128x64xbf16>,
    %42 = vector.extract_strided_slice %27 {offsets = [0, 64], sizes = [128, 64], strides = [1, 1]} : vector<128x128xbf16> to vector<128x64xbf16>
    %c1 = arith.constant 1 : index
    %c0_22 = arith.constant 0 : index
    %c0_23 = arith.constant 0 : index
    %43 = vector.load %arg11[%c1, %c0_22, %c0_23] : memref<2x128x64xbf16, #tpu.memory_space<vmem>>, vector<1x128x64xbf16>
    %44 = vector.shape_cast %43 : vector<1x128x64xbf16> to vector<128x64xbf16>
    %45 = vector.shape_cast %42 : vector<128x64xbf16> to vector<1x128x64xbf16>
    tpu.vector_store %arg11[%c1, %c0_22, %c0_23], %45 {strides = array<i32>} : memref<2x128x64xbf16, #tpu.memory_space<vmem>>, vector<1x128x64xbf16>,
    %46 = vector.extract_strided_slice %28 {offsets = [0, 64], sizes = [128, 64], strides = [1, 1]} : vector<128x128xbf16> to vector<128x64xbf16>
    %c1_24 = arith.constant 1 : index
    %c0_25 = arith.constant 0 : index
    %c0_26 = arith.constant 0 : index
    %47 = vector.load %arg12[%c1_24, %c0_25, %c0_26] : memref<2x128x64xbf16, #tpu.memory_space<vmem>>, vector<1x128x64xbf16>
    %48 = vector.shape_cast %47 : vector<1x128x64xbf16> to vector<128x64xbf16>
    %49 = vector.shape_cast %46 : vector<128x64xbf16> to vector<1x128x64xbf16>
    tpu.vector_store %arg12[%c1_24, %c0_25, %c0_26], %49 {strides = array<i32>} : memref<2x128x64xbf16, #tpu.memory_space<vmem>>, vector<1x128x64xbf16>,
    %50 = vector.extract_strided_slice %29 {offsets = [0, 64], sizes = [128, 64], strides = [1, 1]} : vector<128x128xbf16> to vector<128x64xbf16>
    %c1_27 = arith.constant 1 : index
    %c0_28 = arith.constant 0 : index
    %c0_29 = arith.constant 0 : index
    %51 = vector.load %arg13[%c1_27, %c0_28, %c0_29] : memref<2x128x64xbf16, #tpu.memory_space<vmem>>, vector<1x128x64xbf16>
    %52 = vector.shape_cast %51 : vector<1x128x64xbf16> to vector<128x64xbf16>
    %53 = vector.shape_cast %50 : vector<128x64xbf16> to vector<1x128x64xbf16>
    tpu.vector_store %arg13[%c1_27, %c0_28, %c0_29], %53 {strides = array<i32>} : memref<2x128x64xbf16, #tpu.memory_space<vmem>>, vector<1x128x64xbf16>,
    %54 = tpu.iota {dimensions = array<i32: 0>} : vector<128x128xi32>
    %55 = tpu.iota {dimensions = array<i32: 1>} : vector<128x128xi32>
    %56 = arith.cmpi sle, %55, %54 : vector<128x128xi32>
    %cst_30 = arith.constant 0.000000e+00 : f32
    %cst_31 = arith.constant -3.40282347E+38 : f32
    %57 = vector.broadcast %cst_30 : f32 to vector<128x128xf32>
    %58 = vector.broadcast %cst_31 : f32 to vector<128x128xf32>
    %59 = arith.select %56, %57, %58 : vector<128x128xi1>, vector<128x128xf32>
    %c0_32 = arith.constant 0 : index
    %c0_33 = arith.constant 0 : index
    %c0_34 = arith.constant 0 : index
    %60 = vector.load %arg11[%c0_32, %c0_33, %c0_34] : memref<2x128x64xbf16, #tpu.memory_space<vmem>>, vector<2x128x64xbf16>
    %c0_35 = arith.constant 0 : index
    %c0_36 = arith.constant 0 : index
    %c0_37 = arith.constant 0 : index
    %61 = vector.load %arg12[%c0_35, %c0_36, %c0_37] : memref<2x128x64xbf16, #tpu.memory_space<vmem>>, vector<2x128x64xbf16>
    "tpu.trace_start"() <{level = 10 : i32, message = "hqd,hkd->hqk"}> : () -> ()
    %cst_38 = arith.constant dense<0.000000e+00> : vector<2x128x128xf32>
    %62 = tpu.matmul %60, %61, %cst_38 {dimension_numbers = #tpu.dot_dimension_numbers<[2], [2], [1], [1], [0, 0, 0, 1, 1, 1], [0], [0]>} : vector<2x128x64xbf16>, vector<2x128x64xbf16>, vector<2x128x128xf32> -> vector<2x128x128xf32>
    "tpu.trace_stop"() : () -> ()
    %63 = vector.shape_cast %59 : vector<128x128xf32> to vector<1x128x128xf32>
    %64 = vector.broadcast %63 : vector<1x128x128xf32> to vector<2x128x128xf32>
    %65 = arith.addf %62, %64 : vector<2x128x128xf32>
    %cst_39 = arith.constant dense<0xFF800000> : vector<2x128xf32>
    %66 = vector.multi_reduction <maximumf>, %65, %cst_39 [2] : vector<2x128x128xf32> to vector<2x128xf32>
    %67 = vector.shape_cast %66 : vector<2x128xf32> to vector<2x128x1xf32>
    %68 = vector.broadcast %67 : vector<2x128x1xf32> to vector<2x128x128xf32>
    %69 = arith.subf %65, %68 : vector<2x128x128xf32>
    %70 = math.exp %69 : vector<2x128x128xf32>
    %cst_40 = arith.constant dense<0.000000e+00> : vector<2x128xf32>
    %71 = vector.multi_reduction <add>, %70, %cst_40 [2] : vector<2x128x128xf32> to vector<2x128xf32>
    %72 = vector.shape_cast %71 : vector<2x128xf32> to vector<2x128x1xf32>
    %73 = tpu.reciprocal %72 {approx = true} : vector<2x128x1xf32> -> vector<2x128x1xf32>
    %74 = vector.broadcast %73 : vector<2x128x1xf32> to vector<2x128x128xf32>
    %75 = arith.mulf %70, %74 : vector<2x128x128xf32>
    %76 = arith.truncf %75 : vector<2x128x128xf32> to vector<2x128x128xbf16>
    %c0_41 = arith.constant 0 : index
    %c0_42 = arith.constant 0 : index
    %c0_43 = arith.constant 0 : index
    %77 = vector.load %arg13[%c0_41, %c0_42, %c0_43] : memref<2x128x64xbf16, #tpu.memory_space<vmem>>, vector<2x128x64xbf16>
    "tpu.trace_start"() <{level = 10 : i32, message = "hqk,hkd->hqd"}> : () -> ()
    %cst_44 = arith.constant dense<0.000000e+00> : vector<2x128x64xf32>
    %78 = tpu.matmul %76, %77, %cst_44 {dimension_numbers = #tpu.dot_dimension_numbers<[2], [1], [1], [2], [0, 0, 0, 1, 1, 2], [0], [0]>} : vector<2x128x128xbf16>, vector<2x128x64xbf16>, vector<2x128x64xf32> -> vector<2x128x64xf32>
    "tpu.trace_stop"() : () -> ()
    %79 = vector.extract_strided_slice %78 {offsets = [0, 0, 0], sizes = [1, 128, 64], strides = [1, 1, 1]} : vector<2x128x64xf32> to vector<1x128x64xf32>
    %80 = vector.shape_cast %79 : vector<1x128x64xf32> to vector<128x64xf32>
    %81 = vector.extract_strided_slice %78 {offsets = [1, 0, 0], sizes = [1, 128, 64], strides = [1, 1, 1]} : vector<2x128x64xf32> to vector<1x128x64xf32>
    %82 = vector.shape_cast %81 : vector<1x128x64xf32> to vector<128x64xf32>
    %83 = tpu.concatenate %80, %82 in 1 : vector<128x64xf32>, vector<128x64xf32> -> vector<128x128xf32>
    %84 = arith.truncf %83 : vector<128x128xf32> to vector<128x128xbf16>
    %c0_45 = arith.constant 0 : index
    %c0_46 = arith.constant 0 : index
    %85 = vector.load %arg5[%c0_45, %c0_46] : memref<128x128xbf16, #tpu.memory_space<vmem>>, vector<128x128xbf16>
    %cst_47 = arith.constant dense<0.000000e+00> : vector<128x128xf32>
    %86 = tpu.matmul %84, %85, %cst_47 {dimension_numbers = #tpu.dot_dimension_numbers<[1], [0], [0], [1], [0, 0, 1, 1], [], []>} : vector<128x128xbf16>, vector<128x128xbf16>, vector<128x128xf32> -> vector<128x128xf32>
    %87 = arith.addf %1, %86 : vector<128x128xf32>
    %c0_48 = arith.constant 0 : index
    %c0_49 = arith.constant 0 : index
    %88 = vector.load %arg3[%c0_48, %c0_49] : memref<1x128xf32, #tpu.memory_space<vmem>>, vector<1x128xf32>
    %89 = arith.mulf %87, %87 : vector<128x128xf32>
    %cst_50 = arith.constant dense<0.000000e+00> : vector<128xf32>
    %90 = vector.multi_reduction <add>, %89, %cst_50 [1] : vector<128x128xf32> to vector<128xf32>
    %91 = vector.shape_cast %90 : vector<128xf32> to vector<128x1xf32>
    %cst_51 = arith.constant 1.280000e+02 : f32
    %92 = vector.broadcast %cst_51 : f32 to vector<128x1xf32>
    %93 = arith.divf %91, %92 : vector<128x1xf32>
    %cst_52 = arith.constant 9.99999997E-7 : f32
    %94 = vector.broadcast %cst_52 : f32 to vector<128x1xf32>
    %95 = arith.addf %93, %94 : vector<128x1xf32>
    %96 = math.rsqrt %95 : vector<128x1xf32>
    %97 = vector.broadcast %96 : vector<128x1xf32> to vector<128x128xf32>
    %98 = arith.mulf %87, %97 : vector<128x128xf32>
    %99 = vector.broadcast %88 : vector<1x128xf32> to vector<128x128xf32>
    %100 = arith.mulf %98, %99 : vector<128x128xf32>
    %101 = arith.truncf %100 : vector<128x128xf32> to vector<128x128xbf16>
    %c0_53 = arith.constant 0 : index
    %c0_54 = arith.constant 0 : index
    %102 = vector.load %arg6[%c0_53, %c0_54] : memref<128x768xbf16, #tpu.memory_space<vmem>>, vector<128x768xbf16>
    %cst_55 = arith.constant dense<0.000000e+00> : vector<128x768xf32>
    %103 = tpu.matmul %101, %102, %cst_55 {dimension_numbers = #tpu.dot_dimension_numbers<[1], [0], [0], [1], [0, 0, 1, 1], [], []>} : vector<128x128xbf16>, vector<128x768xbf16>, vector<128x768xf32> -> vector<128x768xf32>
    %104 = vector.extract_strided_slice %103 {offsets = [0, 0], sizes = [128, 384], strides = [1, 1]} : vector<128x768xf32> to vector<128x384xf32>
    %105 = vector.extract_strided_slice %103 {offsets = [0, 384], sizes = [128, 384], strides = [1, 1]} : vector<128x768xf32> to vector<128x384xf32>
    %106 = arith.negf %104 : vector<128x384xf32>
    %107 = math.exp %106 : vector<128x384xf32>
    %cst_56 = arith.constant 1.000000e+00 : f32
    %108 = vector.broadcast %cst_56 : f32 to vector<128x384xf32>
    %109 = arith.addf %108, %107 : vector<128x384xf32>
    %110 = arith.divf %108, %109 : vector<128x384xf32>
    %111 = arith.mulf %104, %110 : vector<128x384xf32>
    %112 = arith.mulf %111, %105 : vector<128x384xf32>
    %113 = arith.truncf %112 : vector<128x384xf32> to vector<128x384xbf16>
    %c0_57 = arith.constant 0 : index
    %c0_58 = arith.constant 0 : index
    %114 = vector.load %arg7[%c0_57, %c0_58] : memref<384x128xbf16, #tpu.memory_space<vmem>>, vector<384x128xbf16>
    %cst_59 = arith.constant dense<0.000000e+00> : vector<128x128xf32>
    %115 = tpu.matmul %113, %114, %cst_59 {dimension_numbers = #tpu.dot_dimension_numbers<[1], [0], [0], [1], [0, 0, 1, 1], [], []>} : vector<128x384xbf16>, vector<384x128xbf16>, vector<128x128xf32> -> vector<128x128xf32>
    %116 = arith.addf %87, %115 : vector<128x128xf32>
    %c0_60 = arith.constant 0 : index
    %c0_61 = arith.constant 0 : index
    %c0_62 = arith.constant 0 : index
    %117 = vector.load %arg10[%c0_60, %c0_61, %c0_62] : memref<1x128x128xf32, #tpu.memory_space<vmem>>, vector<1x128x128xf32>
    %118 = vector.shape_cast %117 : vector<1x128x128xf32> to vector<128x128xf32>
    %119 = vector.shape_cast %116 : vector<128x128xf32> to vector<1x128x128xf32>
    tpu.vector_store %arg10[%c0_60, %c0_61, %c0_62], %119 {strides = array<i32>} : memref<1x128x128xf32, #tpu.memory_space<vmem>>, vector<1x128x128xf32>,
    return
  }
  func.func @transform_0(%arg0: i32) -> (i32, i32, i32) {
    %c0_i32 = arith.constant 0 : i32
    %c0_i32_0 = arith.constant 0 : i32
    %c0_i32_1 = arith.constant 0 : i32
    return %arg0, %c0_i32, %c0_i32_0 : i32, i32, i32
  }
  func.func @transform_1(%arg0: i32) -> (i32, i32) {
    %c0_i32 = arith.constant 0 : i32
    %c0_i32_0 = arith.constant 0 : i32
    %c0_i32_1 = arith.constant 0 : i32
    return %c0_i32, %c0_i32_0 : i32, i32
  }
  func.func @transform_2(%arg0: i32) -> (i32, i32) {
    %c0_i32 = arith.constant 0 : i32
    %c0_i32_0 = arith.constant 0 : i32
    %c0_i32_1 = arith.constant 0 : i32
    return %c0_i32, %c0_i32_0 : i32, i32
  }
  func.func @transform_3(%arg0: i32) -> (i32, i32) {
    %c0_i32 = arith.constant 0 : i32
    %c0_i32_0 = arith.constant 0 : i32
    %c0_i32_1 = arith.constant 0 : i32
    return %c0_i32, %c0_i32_0 : i32, i32
  }
  func.func @transform_4(%arg0: i32) -> (i32, i32) {
    %c0_i32 = arith.constant 0 : i32
    %c0_i32_0 = arith.constant 0 : i32
    %c0_i32_1 = arith.constant 0 : i32
    return %c0_i32, %c0_i32_0 : i32, i32
  }
  func.func @transform_5(%arg0: i32) -> (i32, i32) {
    %c0_i32 = arith.constant 0 : i32
    %c0_i32_0 = arith.constant 0 : i32
    %c0_i32_1 = arith.constant 0 : i32
    return %c0_i32, %c0_i32_0 : i32, i32
  }
  func.func @transform_6(%arg0: i32) -> (i32, i32) {
    %c0_i32 = arith.constant 0 : i32
    %c0_i32_0 = arith.constant 0 : i32
    %c0_i32_1 = arith.constant 0 : i32
    return %c0_i32, %c0_i32_0 : i32, i32
  }
  func.func @transform_7(%arg0: i32) -> (i32, i32) {
    %c0_i32 = arith.constant 0 : i32
    %c0_i32_0 = arith.constant 0 : i32
    %c0_i32_1 = arith.constant 0 : i32
    return %c0_i32, %c0_i32_0 : i32, i32
  }
  func.func @transform_8(%arg0: i32) -> (i32, i32) {
    %c0_i32 = arith.constant 0 : i32
    %c0_i32_0 = arith.constant 0 : i32
    %c0_i32_1 = arith.constant 0 : i32
    return %c0_i32, %c0_i32_0 : i32, i32
  }
  func.func @transform_9(%arg0: i32) -> (i32, i32, i32) {
    %c0_i32 = arith.constant 0 : i32
    %c0_i32_0 = arith.constant 0 : i32
    %c0_i32_1 = arith.constant 0 : i32
    return %arg0, %c0_i32, %c0_i32_0 : i32, i32, i32
  }
}

</mosaic_0001>

<bundles_post_ra>
// kernel: tpu_custom_call.1
= control target key start
LH: loop header
LB: loop body
LE: loop exit
PB: predicated region body
PF: predicated region fallthrough
CT: control target
= control target key end

     0   :  { %s7721_s0 = inlined_call_operand.hbm [shape: f32[2,128,128], index: 0, kind: input, shape index: {}]   ;;  %s7722_s1 = inlined_call_operand.vmem [shape: f32[1,128], index: 1, kind: input, shape index: {}]   ;;  %s7723_s2 = inlined_call_operand.vmem [shape: f32[1,128], index: 2, kind: input, shape index: {}]   ;;  %s7724_s3 = inlined_call_operand.hbm [shape: bf16[128,640], index: 3, kind: input, shape index: {}]   ;;  %s7725_s4 = inlined_call_operand.hbm [shape: bf16[128,128], index: 4, kind: input, shape index: {}]   ;;  %s7726_s5 = inlined_call_operand.hbm [shape: bf16[128,768], index: 5, kind: input, shape index: {}]   ;;  %s7727_s6 = inlined_call_operand.hbm [shape: bf16[384,128], index: 6, kind: input, shape index: {}]   ;;  %s7728_s7 = inlined_call_operand.hbm [shape: f32[128,256], index: 7, kind: input, shape index: {}]   ;;  %s7729_s8 = inlined_call_operand.hbm [shape: f32[128,256], index: 8, kind: input, shape index: {}]   ;;  %s7730_s9 = inlined_call_operand.hbm [shape: f32[2,128,128], index: 9, kind: output, shape index: {}]  }
   0x1   :  { %7770 = sst [smem:[#allocation60_spill]] %s7730_s9 }
   0x2   :  { %14 = vsyncpa [#allocation6], 0 }
   0x3   :  { %16 = vsyncpa [#allocation6 + $0x1], 0 }
   0x4   :  { %17 = vsyncpa [#allocation9], 0 }
   0x5   :  { %18 = vsyncpa [#allocation12], 0 }
   0x6   :  { %19 = vsyncpa [#allocation15], 0 }
   0x7   :  { %20 = vsyncpa [#allocation7], 0 }
   0x8   :  { %22 = vsyncpa [#allocation7 + $0x1], 0  ;;  %s6105_s30 = smov 0   ;;  %s6107_s10 = smov 0  }
   0x9   :  { %s6109_s11 = smov 0   ;;  %s6111_s12 = smov 0  }
   0xa LB: > { %s6032_s13 = smov [#allocation8]   ;;  %s6126_s15 = sadd.s32 4294967295, %s6030_s12   ;;  %s6030_s12 = sphi %s6111_s12, %s7874_s12   ;;  %s6026_s11 = sphi %s6109_s11, %s7873_s11   ;;  %s6022_s10 = sphi %s6107_s10, %s7872_s10   ;;  %s6018_s30 = sphi %s6105_s30, %s7871_s30  }
   0xb   : > { %s271_s14 = sshll.u32 %s6032_s13, 4  ;;  %p4403_p0 = scmp.ge.s32.totalorder %s6030_s12, 1  ;;  %s6131_s14 = int_to_ptr.vmem [resolvable:$true] %s271_s14 }
   0xc   : > { %p7732_p1 = scmp.eq.s32.totalorder %s6126_s15, 0  ;;  %p253_p2 = scmp.lt.s32.totalorder %s6030_s12, 3 }
   0xd   : > { %s6033_s17 = smov [#allocation11]   ;;  %s6034_s20 = smov [#allocation14]  }
   0xe   : > { %p6133_p3 = pnand %p4403_p0, %p253_p2  ;;  %s297_s18 = sshll.u32 %s6033_s17, 4  ;;  %s6146_s18 = int_to_ptr.vmem [resolvable:$true] %s297_s18 }
   0xf   : > { %s6148_s21 = sshll.u32 %s6034_s20, 4  ;;  %s5754_s24 = scalar_lea.hbm %s7724_s3, 5120  ;;  %s324_s21 = int_to_ptr.vmem [resolvable:$true] %s6148_s21 }
  0x10   : > { %s7771_s16 = scalar_select %p6133_p3, 1, 0 }
  0x11   : > { %p5060_p5 = pneg %p6133_p3  ;;  %p5755_p7 = scmp.ne.s32.totalorder %s7724_s3, %s5754_s24 }
  0x12   : > { %p5761_p11 = scmp.lt.u32.totalorder %s5754_s24, %s7724_s3 }
  0x13   : > { %p6142_p6 = pnand %p5060_p5, %p7732_p1 }
  0x15   : > { %p6158_p8 = pneg %p6142_p6 }
  0x17   : > { %p5757_p9 = pnand %p6158_p8, %p5755_p7 }
  0x19   : > { %p5758_p10 = pneg %p5757_p9 }
  0x1b   : > { %p5763_p12 = pnand %p5761_p11, %p5758_p10 }
  0x1d   : > { %5766 = shalt.err (!%p5763_p12)
}
  0x1e   : > { %s5767_s13 = scalar_lea.vmem %s6131_s14, 5120  ;;  %p5775_p5 = scmp.lt.s32.totalorder %s6131_s14, %s6131_s14 }
  0x1f   : > { %p5768_p13 = scmp.ne.s32.totalorder %s6131_s14, %s5767_s13  ;;  %p5776_p4 = scmp.lt.s32.totalorder %s5767_s13, %s5767_s13 }
  0x21   : > { %p5770_p0 = pnand %p5768_p13, %p6158_p8  ;;  %p5777_p7 = por %p5776_p4, %p5775_p5 }
  0x23   : > { %p5771_p2 = pneg %p5770_p0 }
  0x25   : > { %p5778_p9 = pnand %p5777_p7, %p5771_p2 }
  0x27   : > { %5781 = shalt.err (!%p5778_p9)
}
  0x28   : > { %s6035_s17 = smov 320   ;;  %s6036_s20 = smov 20  }
  0x29   : > { %5063 = dma.hbm_to_vmem [thread:$0]  (!%p6142_p6), %s7724_s3, 5120, %s6131_s14, [#allocation9], %s6035_s17, %s6035_s17, %s6036_s20  }
  0x2a   : > { %s5782_s26 = scalar_lea.hbm %s7726_s5, 6144 }
  0x2b   : > { %p5783_p4 = scmp.ne.s32.totalorder %s7726_s5, %s5782_s26  ;;  %p5789_p12 = scmp.lt.u32.totalorder %s5782_s26, %s7726_s5 }
  0x2d   : > { %p5785_p10 = pnand %p5783_p4, %p6158_p8 }
  0x2f   : > { %p5786_p11 = pneg %p5785_p10 }
  0x31   : > { %p5791_p13 = pnand %p5789_p12, %p5786_p11 }
  0x33   : > { %5794 = shalt.err (!%p5791_p13)
}
  0x34   : > { %s5795_s14 = scalar_lea.vmem %s6146_s18, 6144  ;;  %p5803_p7 = scmp.lt.s32.totalorder %s6146_s18, %s6146_s18 }
  0x35   : > { %p5796_p0 = scmp.ne.s32.totalorder %s6146_s18, %s5795_s14  ;;  %p5804_p9 = scmp.lt.s32.totalorder %s5795_s14, %s5795_s14 }
  0x37   : > { %p5798_p2 = pnand %p5796_p0, %p6158_p8  ;;  %p5805_p4 = por %p5804_p9, %p5803_p7 }
  0x39   : > { %p5799_p5 = pneg %p5798_p2 }
  0x3b   : > { %p5806_p10 = pnand %p5805_p4, %p5799_p5 }
  0x3d   : > { %5809 = shalt.err (!%p5806_p10)
}
  0x3e   : > { %s6037_s17 = smov 384   ;;  %s6038_s9 = smov 24  }
  0x3f   : > { %5069 = dma.hbm_to_vmem [thread:$0]  (!%p6142_p6), %s7726_s5, 6144, %s6146_s18, [#allocation12], %s6037_s17, %s6037_s17, %s6038_s9  }
  0x40   : > { %s5810_s25 = scalar_lea.hbm %s7728_s7, 4096 }
  0x41   : > { %p5811_p11 = scmp.ne.s32.totalorder %s7728_s7, %s5810_s25  ;;  %p5817_p0 = scmp.lt.u32.totalorder %s5810_s25, %s7728_s7 }
  0x43   : > { %p5813_p12 = pnand %p5811_p11, %p6158_p8 }
  0x45   : > { %p5814_p13 = pneg %p5813_p12 }
  0x47   : > { %p5819_p2 = pnand %p5817_p0, %p5814_p13 }
  0x49   : > { %5822 = shalt.err (!%p5819_p2)
}
  0x4a   : > { %s5823_s14 = scalar_lea.vmem %s324_s21, 4096  ;;  %p5831_p4 = scmp.lt.s32.totalorder %s324_s21, %s324_s21 }
  0x4b   : > { %p5824_p5 = scmp.ne.s32.totalorder %s324_s21, %s5823_s14  ;;  %p5832_p10 = scmp.lt.s32.totalorder %s5823_s14, %s5823_s14 }
  0x4d   : > { %p5826_p7 = pnand %p5824_p5, %p6158_p8  ;;  %p5833_p1 = por %p5832_p10, %p5831_p4 }
  0x4f   : > { %p5827_p9 = pneg %p5826_p7 }
  0x51   : > { %p5834_p3 = pnand %p5833_p1, %p5827_p9 }
  0x53   : > { %5837 = shalt.err (!%p5834_p3)
}
  0x54   : > { %s7734_s18 = smov 256   ;;  %s7735_s17 = smov 16  }
  0x55   : > { %5075 = dma.hbm_to_vmem [thread:$0]  (!%p6142_p6), %s7728_s7, 4096, %s324_s21, [#allocation15], %s7734_s18, %s7734_s18, %s7735_s17  }
  0x56   : > { %s6041_s22 = smov [#allocation10]   ;;  %s5838_s26 = scalar_lea.hbm %s7725_s4, 1024 }
  0x57   : > { %s284_s23 = sshll.u32 %s6041_s22, 4  ;;  %p5839_p1 = scmp.ne.s32.totalorder %s7725_s4, %s5838_s26  ;;  %s285_s23 = int_to_ptr.vmem [resolvable:$true] %s284_s23 }
  0x58   : > { %p5845_p12 = scmp.lt.u32.totalorder %s5838_s26, %s7725_s4 }
  0x59   : > { %p5841_p3 = pnand %p5839_p1, %p6158_p8 }
  0x5b   : > { %p5842_p11 = pneg %p5841_p3 }
  0x5d   : > { %p5847_p13 = pnand %p5845_p12, %p5842_p11 }
  0x5f   : > { %5850 = shalt.err (!%p5847_p13)
}
  0x60   : > { %s5851_s21 = scalar_lea.vmem %s285_s23, 1024  ;;  %p5859_p7 = scmp.lt.s32.totalorder %s285_s23, %s285_s23 }
  0x61   : > { %p5852_p0 = scmp.ne.s32.totalorder %s285_s23, %s5851_s21  ;;  %p5860_p9 = scmp.lt.s32.totalorder %s5851_s21, %s5851_s21 }
  0x63   : > { %p5854_p2 = pnand %p5852_p0, %p6158_p8  ;;  %p5861_p4 = por %p5860_p9, %p5859_p7 }
  0x65   : > { %p5855_p5 = pneg %p5854_p2 }
  0x67   : > { %p5862_p10 = pnand %p5861_p4, %p5855_p5 }
  0x69   : > { %5865 = shalt.err (!%p5862_p10)
}
  0x6a   : > { %s6042_s9 = smov 64   ;;  %s6043_s20 = smov 4  }
  0x6b   : > { %5066 = dma.hbm_to_vmem [thread:$0]  (!%p6142_p6), %s7725_s4, 1024, %s285_s23, [#allocation9], %s6042_s9, %s6042_s9, %s6043_s20  }
  0x6c   : > { %s6044_s25 = smov [#allocation13]   ;;  %s6045_s28 = smov [#allocation16]  }
  0x6d   : > { %s310_s26 = sshll.u32 %s6044_s25, 4  ;;  %s336_s29 = sshll.u32 %s6045_s28, 4  ;;  %s311_s26 = int_to_ptr.vmem [resolvable:$true] %s310_s26  ;;  %s6242_s29 = int_to_ptr.vmem [resolvable:$true] %s336_s29 }
  0x6e   : > { %s5866_s21 = scalar_lea.hbm %s7727_s6, 3072 }
  0x6f   : > { %p5867_p1 = scmp.ne.s32.totalorder %s7727_s6, %s5866_s21  ;;  %p5873_p12 = scmp.lt.u32.totalorder %s5866_s21, %s7727_s6 }
  0x71   : > { %p5869_p3 = pnand %p5867_p1, %p6158_p8 }
  0x73   : > { %p5870_p11 = pneg %p5869_p3 }
  0x75   : > { %p5875_p13 = pnand %p5873_p12, %p5870_p11 }
  0x77   : > { %5878 = shalt.err (!%p5875_p13)
}
  0x78   : > { %s5879_s24 = scalar_lea.vmem %s311_s26, 3072  ;;  %p5887_p7 = scmp.lt.s32.totalorder %s311_s26, %s311_s26 }
  0x79   : > { %p5880_p0 = scmp.ne.s32.totalorder %s311_s26, %s5879_s24  ;;  %p5888_p9 = scmp.lt.s32.totalorder %s5879_s24, %s5879_s24 }
  0x7b   : > { %p5882_p2 = pnand %p5880_p0, %p6158_p8  ;;  %p5889_p4 = por %p5888_p9, %p5887_p7 }
  0x7d   : > { %p5883_p5 = pneg %p5882_p2 }
  0x7f   : > { %p5890_p10 = pnand %p5889_p4, %p5883_p5 }
  0x81   : > { %5893 = shalt.err (!%p5890_p10)
}
  0x82   : > { %5072 = dma.hbm_to_vmem [thread:$0]  (!%p6142_p6), %s7727_s6, 3072, %s311_s26, [#allocation12], %s6042_s9, %s6042_s9, %s6043_s20  }
  0x83   : > { %s5894_s13 = scalar_lea.hbm %s7729_s8, 4096 }
  0x84   : > { %p5895_p1 = scmp.ne.s32.totalorder %s7729_s8, %s5894_s13  ;;  %p5901_p12 = scmp.lt.u32.totalorder %s5894_s13, %s7729_s8 }
  0x86   : > { %p5897_p3 = pnand %p5895_p1, %p6158_p8 }
  0x88   : > { %p5898_p11 = pneg %p5897_p3 }
  0x8a   : > { %p5903_p13 = pnand %p5901_p12, %p5898_p11 }
  0x8c   : > { %5906 = shalt.err (!%p5903_p13)
}
  0x8d   : > { %s5907_s9 = scalar_lea.vmem %s6242_s29, 4096  ;;  %p5915_p7 = scmp.lt.s32.totalorder %s6242_s29, %s6242_s29 }
  0x8e   : > { %p5908_p0 = scmp.ne.s32.totalorder %s6242_s29, %s5907_s9  ;;  %p5916_p9 = scmp.lt.s32.totalorder %s5907_s9, %s5907_s9 }
  0x90   : > { %p5910_p2 = pnand %p5908_p0, %p6158_p8  ;;  %p5917_p4 = por %p5916_p9, %p5915_p7 }
  0x92   : > { %p5911_p5 = pneg %p5910_p2 }
  0x94   : > { %p5918_p10 = pnand %p5917_p4, %p5911_p5 }
  0x96   : > { %5921 = shalt.err (!%p5918_p10)
}
  0x97   : > { %s7774_s20 = smov 16   ;;  %s7775_s26 = smov 256  }
  0x98   : > { %5078 = dma.hbm_to_vmem [thread:$0]  (!%p6142_p6), %s7729_s8, 4096, %s6242_s29, [#allocation15], %s7775_s26, %s7775_s26, %s7774_s20  }
  0x99   : > { %s4402_s19 = sadd.s32 4294967294, %s6030_s12   ;;  %s6290_s27 = sadd.s32 1, %s6030_s12  }
  0x9a   : > { %s32_s17 = ssub.s32 %s6030_s12, %s6290_s27  ;;  %s35_s25 = sadd.s32 1, %s6026_s11 }
  0x9b   : > { %p33_p8 = scmp.eq.s32.totalorder %s32_s17, 0  ;;  %p42_p1 = scmp.ne.s32.totalorder %s6026_s11, %s6022_s10 }
  0x9c   : > { %p43_p3 = scmp.eq.s32.totalorder %s6030_s12, 0  ;;  %p48_p11 = scmp.ne.s32.totalorder %s6022_s10, %s6018_s30 }
  0x9d   : > { %s6301_s28 = scalar_select %p33_p8, %s6026_s11, %s35_s25  }
  0x9e   : > { %p6303_p12 = por %p43_p3, %p42_p1  ;;  %p7777_p13 = scmp.eq.s32.totalorder %s6126_s15, 0 }
  0x9f   : > { %p240_p0 = scmp.eq.s32.totalorder %s6126_s15, 1  ;;  %p246_p2 = scmp.eq.s32.totalorder %s4402_s19, 1 }
  0xa0   : > { %p6309_p6 = por %p7777_p13, %p48_p11  ;;  %p5093_p5 = scmp.lt.s32.totalorder %s6030_s12, 2 }
  0xa1   : > { %s350_s14 = sand.u32 1, %s6026_s11   ;;  %p6316_p7 = por %p240_p0, %p42_p1 }
  0xa2   : > { %p6320_p9 = por %p246_p2, %p48_p11  ;;  %s4411_s23 = sshll.u32 %s350_s14, 7 }
  0xa3   : > { %s7779_s21 = scalar_select %p6316_p7, 1, 0 }
  0xa4   : > { %s7780_s22 = scalar_select %p6320_p9, 1, 0 }
  0xa5   : > { %s4614_s9 = sshll.u32 %s6030_s12, 11  ;;  %s354_s18 = scalar_lea.vmem [#allocation5], %s4411_s23 }
  0xa6   : > { %s6328_s24 = scalar_lea.hbm %s7721_s0, %s4614_s9  ;;  %s361_s19 = sshll.u32 %s354_s18, 4  ;;  %s6330_s19 = int_to_ptr.vmem [resolvable:$true] %s361_s19 }
  0xa7   : > { %p6334_p4 = pnand %p5093_p5, %p6303_p12  ;;  %s6338_s25 = scalar_lea.sflag [#allocation6], %s350_s14 }
  0xa8   : > { %s5922_s20 = scalar_lea.hbm %s6328_s24, 2048  ;;  %s5927_s13 = scalar_lea.hbm %s7721_s0, 4096 }
  0xa9   : > { %p5923_p10 = scmp.ne.s32.totalorder %s6328_s24, %s5922_s20  ;;  %p5924_p8 = pneg %p6334_p4 }
  0xaa   : > { %p5928_p11 = scmp.lt.u32.totalorder %s6328_s24, %s7721_s0  ;;  %p5929_p12 = scmp.lt.u32.totalorder %s5927_s13, %s5922_s20 }
  0xab   : > { %p5925_p1 = pnand %p5924_p8, %p5923_p10  ;;  %p5931_p0 = scmp.lt.u32.totalorder %s5922_s20, %s6328_s24 }
  0xac   : > { %p5930_p13 = por %p5929_p12, %p5928_p11 }
  0xad   : > { %p5926_p3 = pneg %p5925_p1 }
  0xae   : > { %p5932_p2 = por %p5931_p0, %p5930_p13 }
  0xb0   : > { %p5933_p5 = pnand %p5932_p2, %p5926_p3 }
  0xb2   : > { %5936 = shalt.err (!%p5933_p5)
}
  0xb3   : > { %s5937_s14 = scalar_lea.vmem %s6330_s19, 2048  ;;  %s6046_s23 = smov [#allocation5]  }
  0xb4   : > { %p5938_p10 = scmp.ne.s32.totalorder %s6330_s19, %s5937_s14  ;;  %s5942_s9 = sshll.u32 %s6046_s23, 4  ;;  %s5943_s9 = int_to_ptr.vmem [resolvable:$false] %s5942_s9 }
  0xb5   : > { %s5944_s26 = scalar_lea.vmem %s5943_s9, 4096  ;;  %p5945_p7 = scmp.lt.s32.totalorder %s6330_s19, %s5943_s9 }
  0xb6   : > { %p5940_p1 = pnand %p5938_p10, %p5924_p8  ;;  %p5946_p11 = scmp.lt.s32.totalorder %s5944_s26, %s5937_s14 }
  0xb8   : > { %p5941_p9 = pneg %p5940_p1  ;;  %p5947_p12 = por %p5946_p11, %p5945_p7 }
  0xba   : > { %p5948_p13 = pnand %p5947_p12, %p5941_p9 }
  0xbc   : > { %5951 = shalt.err (!%p5948_p13)
}
  0xbd   : > { %s6047_s20 = smov 128   ;;  %s6048_s13 = smov 8  }
  0xbe   : > { %5082 = dma.hbm_to_vmem [thread:$0]  (!%p6334_p4), %s6328_s24, 2048, %s6330_s19, %s6338_s25, %s6047_s20, %s6047_s20, %s6048_s13  }
  0xbf   : > { %p7782_p8 = scmp.ne.s32.totalorder %s7771_s16, 0 }
  0xc1   : > { %373 = sbr.rel (%p7782_p8) target bundleno = 2673 (0xa71), region = 56 }
  0xc8   : > { %s6369_s18 = sand.u32 1, %s6022_s10  }
  0xc9   : > { %s4415_s14 = sshll.u32 %s6369_s18, 7  ;;  %s376_s23 = scalar_lea.sflag [#allocation6], %s6369_s18 }
  0xca   : > { %s6375_s9 = scalar_lea.vmem [#allocation5], %s4415_s14 }
  0xcb   : > { %5997 = dma.done.wait (%p6309_p6), %s376_s23, 2048  }
  0xcc   : > { %5999 = vsyncadd (%p6309_p6), %s376_s23, 4294965248  ;;  %p7783_p7 = scmp.eq.s32.totalorder %s6126_s15, 0 }
  0xce   : > { %6001 = dma.done.wait (%p7783_p7), [#allocation9], 6144   ;;  %p7784_p9 = pmov %p7783_p7 }
  0xcf   : > { %p7785_p4 = pmov %p7783_p7 }
  0xd0   : > { %6003 = vsyncadd (%p7784_p9), [#allocation9], 4294961152 }
  0xd1   : > { %6005 = dma.done.wait (%p7785_p4), [#allocation12], 9216   ;;  %p7786_p3 = pmov %p7785_p4 }
  0xd3   : > { %6007 = vsyncadd (%p7786_p3), [#allocation12], 4294958080  ;;  %p7787_p0 = pmov %p7786_p3 }
  0xd5   : > { %6009 = dma.done.wait (%p7787_p0), [#allocation15], 8192   ;;  %p7788_p2 = pmov %p7787_p0 }
  0xd6   : > { %v6394_v0 = vld [vmem:[%s6375_s9] sm:$0xff]  ;;  %v6397_v1 = vld [vmem:[%s6375_s9 + $0x10] sm:$0xff]  ;;  %v6400_v2 = vld [vmem:[%s6375_s9 + $0x8] sm:$0xff]  ;;  %vm1362_vm0 = vcmask 523264   ;;  %s6050_s24 = smov 64   ;;  %s7638_s25 = scalar_lea.vmem [#allocation17], %s4415_s14 }
  0xd7   : > { %6011 = vsyncadd (%p7788_p2), [#allocation15], 4294959104  ;;  %v456_v3 = vmul.f32 %v6394_v0, %v6394_v0  ;;  %v458_v4 = vmul.f32 %v6397_v1, %v6397_v1  ;;  %v6407_v5 = vld [vmem:[%s6375_s9 + $0x18] sm:$0xff]  ;;  %v457_v6 = vmul.f32 %v6400_v2, %v6400_v2  ;;  %v6414_v8 = vld [vmem:[%s6375_s9 + $0x28] sm:$0xff]  ;;  %s4615_s26 = sshll.u32 %s6126_s15, 11  ;;  %s4272_s20 = sshll.u32 %s7638_s25, 4  ;;  %s7673_s20 = int_to_ptr.vmem [resolvable:$true] %s4272_s20 }
  0xd8   : > { %v459_v7 = vmul.f32 %v6407_v5, %v6407_v5  ;;  %v6417_v9 = vld [vmem:[%s6375_s9 + $0x20] sm:$0xff]  ;;  %v6420_v10 = vld [vmem:[%s6375_s9 + $0x38] sm:$0xff]  ;;  %v6423_v11 = vld [vmem:[%s6375_s9 + $0x30] sm:$0xff]  ;;  %v461_v13 = vmul.f32 %v6414_v8, %v6414_v8  ;;  %s7866_s23 = sld [smem:[#allocation60_spill]]  ;;  %s4259_s15 = scalar_lea.sflag [#allocation7], %s6369_s18 }
  0xd9   : > { %472 = vadd.xlane.f32.xlu0 %v456_v3  ;;  %476 = vadd.xlane.f32.xlu1 %v458_v4  ;;  %v5194_v12 = vld [vmem:[#allocation8 + $0x4] ss:$20 sps:$4 sm:$0xff]   ;;  %v460_v14 = vmul.f32 %v6417_v9, %v6417_v9  ;;  %v5196_v15 = vld [vmem:[#allocation8 + $0xc] ss:$20 sps:$4 sm:$0xff]   ;;  %v5199_v17 = vld [vmem:[#allocation8 + $0x8] ss:$20 sps:$4 sm:$0xff]   ;;  %v463_v24 = vmul.f32 %v6420_v10, %v6420_v10  ;;  %v462_v25 = vmul.f32 %v6423_v11, %v6423_v11 }
  0xda   : > { %v5198_v16 = vld [vmem:[#allocation8] ss:$20 sps:$4 sm:$0xff]   ;;  %855 = vmatprep.subr.bf16.mxu0 %v5194_v12  ;;  %968 = vmatprep.subr.bf16.mxu1 %v5196_v15  ;;  %v6430_v20 = vld [vmem:[%s6375_s9 + $0x48] sm:$0xff]  ;;  %v5205_v23 = vld [vmem:[#allocation8 + $0x30] ss:$20 sps:$4 sm:$0xff]   ;;  %v6049_v3 = vmov 0  }
  0xdb   : > { %v5200_v18 = vld [vmem:[#allocation8 + $0x2c] ss:$20 sps:$4 sm:$0xff]   ;;  %856 = vmatpush1.bf16.msra.mxu0 %v5198_v16  ;;  %v5202_v19 = vld [vmem:[#allocation8 + $0x34] ss:$20 sps:$4 sm:$0xff]   ;;  %969 = vmatpush1.bf16.msra.mxu1 %v5199_v17  ;;  %v6440_v26 = vld [vmem:[%s6375_s9 + $0x58] sm:$0xff]  ;;  %v465_v28 = vmul.f32 %v6430_v20, %v6430_v20  ;;  %s5952_s16 = scalar_lea.vmem %s7673_s20, 2048 }
  0xdc   : > { %v6433_v21 = vld [vmem:[%s6375_s9 + $0x40] sm:$0xff]  ;;  %857 = vmatprep.subr.bf16.mxu0 %v5200_v18  ;;  %v5204_v22 = vld [vmem:[#allocation8 + $0x28] ss:$20 sps:$4 sm:$0xff]   ;;  %970 = vmatprep.subr.bf16.mxu1 %v5202_v19  ;;  %v6443_v27 = vld [vmem:[%s6375_s9 + $0x50] sm:$0xff]  ;;  %v467_v36 = vmul.f32 %v6440_v26, %v6440_v26  ;;  %p5953_p6 = scmp.ne.s32.totalorder %s7673_s20, %s5952_s16  ;;  %p7868_p5 = scmp.ne.s32.totalorder %s7779_s21, 0 }
  0xdd   : > { %474 = vadd.xlane.f32.xlu0 %v457_v6  ;;  %478 = vadd.xlane.f32.xlu1 %v459_v7  ;;  %v464_v29 = vmul.f32 %v6433_v21, %v6433_v21  ;;  %v5206_v30 = vld [vmem:[#allocation8 + $0x54] ss:$20 sps:$4 sm:$0xff]   ;;  %v5208_v31 = vld [vmem:[#allocation8 + $0x5c] ss:$20 sps:$4 sm:$0xff]   ;;  %v5211_v33 = vld [vmem:[#allocation8 + $0x58] ss:$20 sps:$4 sm:$0xff]   ;;  %v466_v37 = vmul.f32 %v6443_v27, %v6443_v27 }
  0xde   : > { %v5210_v32 = vld [vmem:[#allocation8 + $0x50] ss:$20 sps:$4 sm:$0xff]   ;;  %v6450_v34 = vld [vmem:[%s6375_s9 + $0x68] sm:$0xff]  ;;  %v5217_v41 = vld [vmem:[#allocation8 + $0x80] ss:$20 sps:$4 sm:$0xff]   ;;  %887 = vmatprep.mubr.bf16.mxu0 %v6049_v3  ;;  %1000 = vmatprep.mubr.bf16.mxu1 %v6049_v3  ;;  %p5954_p10 = pnand %p5953_p6, %p7868_p5  ;;  %s6052_s29 = smov [#allocation17]  }
  0xdf   : > { %858 = vmatpush1.bf16.msra.mxu0 %v5204_v22  ;;  %971 = vmatpush1.bf16.msra.mxu1 %v5205_v23  ;;  %v6453_v35 = vld [vmem:[%s6375_s9 + $0x60] sm:$0xff]  ;;  %v5212_v38 = vld [vmem:[#allocation8 + $0x7c] ss:$20 sps:$4 sm:$0xff]   ;;  %v5216_v40 = vld [vmem:[#allocation8 + $0x78] ss:$20 sps:$4 sm:$0xff]   ;;  %v469_v44 = vmul.f32 %v6450_v34, %v6450_v34 }
  0xe0   : > { %859 = vmatprep.subr.bf16.mxu0 %v5206_v30  ;;  %972 = vmatprep.subr.bf16.mxu1 %v5208_v31  ;;  %v5214_v39 = vld [vmem:[#allocation8 + $0x84] ss:$20 sps:$4 sm:$0xff]   ;;  %v6463_v43 = vld [vmem:[%s6375_s9 + $0x70] sm:$0xff]  ;;  %v468_v45 = vmul.f32 %v6453_v35, %v6453_v35  ;;  %v5220_v47 = vld [vmem:[#allocation8 + $0xac] ss:$20 sps:$4 sm:$0xff]   ;;  %p5955_p1 = pneg %p5954_p10 }
  0xe1   : > { %482 = vadd.xlane.f32.xlu1 %v461_v13  ;;  %480 = vadd.xlane.f32.xlu0 %v460_v14  ;;  %v6460_v42 = vld [vmem:[%s6375_s9 + $0x78] sm:$0xff]  ;;  %v5222_v48 = vld [vmem:[#allocation8 + $0xa0] ss:$20 sps:$4 sm:$0xff]   ;;  %v470_v53 = vmul.f32 %v6463_v43, %v6463_v43  ;;  %v5229_v55 = vld [vmem:[#allocation8 + $0xd0] ss:$20 sps:$4 sm:$0xff]  }
  0xe2   : > { %v5218_v46 = vld [vmem:[#allocation8 + $0xa4] ss:$20 sps:$4 sm:$0xff]   ;;  %v5223_v49 = vld [vmem:[#allocation8 + $0xa8] ss:$20 sps:$4 sm:$0xff]   ;;  %v5224_v50 = vld [vmem:[#allocation8 + $0xcc] ss:$20 sps:$4 sm:$0xff]   ;;  %v471_v52 = vmul.f32 %v6460_v42, %v6460_v42 }
  0xe3   : > { %860 = vmatpush1.bf16.msra.mxu0 %v5210_v32  ;;  %973 = vmatpush1.bf16.msra.mxu1 %v5211_v33  ;;  %v5226_v51 = vld [vmem:[#allocation8 + $0xd4] ss:$20 sps:$4 sm:$0xff]   ;;  %v5232_v57 = vld [vmem:[#allocation8 + $0xfc] ss:$20 sps:$4 sm:$0xff]   ;;  %v5235_v59 = vld [vmem:[#allocation8 + $0xf8] ss:$20 sps:$4 sm:$0xff]  }
  0xe4   : > { %861 = vmatprep.subr.bf16.mxu0 %v5212_v38  ;;  %974 = vmatprep.subr.bf16.mxu1 %v5214_v39  ;;  %v5228_v54 = vld [vmem:[#allocation8 + $0xc8] ss:$20 sps:$4 sm:$0xff]   ;;  %v5234_v58 = vld [vmem:[#allocation8 + $0xf0] ss:$20 sps:$4 sm:$0xff]   ;;  %v5240_v62 = vld [vmem:[#allocation8 + $0x118] ss:$20 sps:$4 sm:$0xff]  }
  0xe5   : > { %486 = vadd.xlane.f32.xlu1 %v463_v24  ;;  %484 = vadd.xlane.f32.xlu0 %v462_v25  ;;  %v5230_v56 = vld [vmem:[#allocation8 + $0xf4] ss:$20 sps:$4 sm:$0xff]   ;;  %v5236_v60 = vld [vmem:[#allocation8 + $0x11c] ss:$20 sps:$4 sm:$0xff]   ;;  %v5238_v61 = vld [vmem:[#allocation8 + $0x124] ss:$20 sps:$4 sm:$0xff]  }
  0xe6   : > { %v5241_v63 = vld [vmem:[#allocation8 + $0x120] ss:$20 sps:$4 sm:$0xff]   ;;  %v5242_v4 = vld [vmem:[#allocation8 + $0x10] ss:$20 sps:$4 sm:$0xff]  }
  0xe7   : > { %862 = vmatpush1.bf16.msra.mxu0 %v5216_v40  ;;  %975 = vmatpush1.bf16.msra.mxu1 %v5217_v41  ;;  %v6479_v41 = vld [vmem:[%s7722_s1] ss:$0 sm:$0xff] }
  0xe8   : > { %863 = vmatprep.subr.bf16.mxu0 %v5218_v46  ;;  %976 = vmatprep.subr.bf16.mxu1 %v5220_v47 }
  0xe9   : > { %490 = vadd.xlane.f32.xlu1 %v465_v28  ;;  %488 = vadd.xlane.f32.xlu0 %v464_v29 }
  0xeb   : > { %864 = vmatpush1.bf16.msra.mxu0 %v5222_v48  ;;  %977 = vmatpush1.bf16.msra.mxu1 %v5223_v49 }
  0xec   : > { %865 = vmatprep.subr.bf16.mxu0 %v5224_v50  ;;  %978 = vmatprep.subr.bf16.mxu1 %v5226_v51 }
  0xed   : > { %494 = vadd.xlane.f32.xlu1 %v467_v36  ;;  %492 = vadd.xlane.f32.xlu0 %v466_v37 }
  0xef   : > { %866 = vmatpush1.bf16.msra.mxu0 %v5228_v54  ;;  %979 = vmatpush1.bf16.msra.mxu1 %v5229_v55 }
  0xf0   : > { %867 = vmatprep.subr.bf16.mxu0 %v5230_v56  ;;  %980 = vmatprep.subr.bf16.mxu1 %v5232_v57  ;;  %v5243_v57 = vld [vmem:[#allocation8 + $0x38] ss:$20 sps:$4 sm:$0xff]  }
  0xf1   : > { %498 = vadd.xlane.f32.xlu1 %v469_v44  ;;  %496 = vadd.xlane.f32.xlu0 %v468_v45 }
  0xf3   : > { %868 = vmatpush1.bf16.msra.mxu0 %v5234_v58  ;;  %981 = vmatpush1.bf16.msra.mxu1 %v5235_v59 }
  0xf4   : > { %869 = vmatprep.subr.bf16.mxu0 %v5236_v60  ;;  %982 = vmatprep.subr.bf16.mxu1 %v5238_v61 }
  0xf5   : > { %502 = vadd.xlane.f32.xlu1 %v471_v52  ;;  %500 = vadd.xlane.f32.xlu0 %v470_v53 }
  0xf7   : > { %870 = vmatpush1.bf16.msra.mxu0 %v5240_v62  ;;  %983 = vmatpush1.bf16.msra.mxu1 %v5241_v63  ;;  %v5244_v62 = vld [vmem:[#allocation8 + $0x60] ss:$20 sps:$4 sm:$0xff]  }
  0xf8   : > { %4792 = vmatprep.subr.bf16.mxu0 %v5242_v4 }
 0x166   : > { %v473_v6 = vpop.xlane.xlu0 %472  ;;  %v477_v7 = vpop.xlane.xlu1 %476 }
 0x167   : > { %v505_v12 = vmul.f32 0.0078125, %v473_v6  ;;  %v507_v13 = vmul.f32 0.0078125, %v477_v7 }
 0x169   : > { %v521_v14 = vadd.f32 1e-06, %v505_v12  ;;  %v523_v19 = vadd.f32 1e-06, %v507_v13 }
 0x16a   : > { %v475_v15 = vpop.xlane.xlu0 %474  ;;  %v479_v16 = vpop.xlane.xlu1 %478 }
 0x16b   : > { %5354 = vrsqrt.f32 %v521_v14  ;;  %v506_v17 = vmul.f32 0.0078125, %v475_v15  ;;  %v508_v18 = vmul.f32 0.0078125, %v479_v16  ;;  %v5245_v16 = vld [vmem:[#allocation8 + $0x88] ss:$20 sps:$4 sm:$0xff]  }
 0x16d   : > { %v522_v22 = vadd.f32 1e-06, %v506_v17  ;;  %v524_v23 = vadd.f32 1e-06, %v508_v18 }
 0x16e   : > { %v483_v24 = vpop.xlane.xlu1 %482  ;;  %v481_v25 = vpop.xlane.xlu0 %480 }
 0x16f   : > { %5356 = vrsqrt.f32 %v522_v22  ;;  %v510_v28 = vmul.f32 0.0078125, %v483_v24  ;;  %v509_v29 = vmul.f32 0.0078125, %v481_v25  ;;  %v5246_v22 = vld [vmem:[#allocation8 + $0xb0] ss:$20 sps:$4 sm:$0xff]  }
 0x170   : > { %5358 = vrsqrt.f32 %v523_v19 }
 0x171   : > { %5360 = vrsqrt.f32 %v524_v23  ;;  %v526_v30 = vadd.f32 1e-06, %v510_v28  ;;  %v525_v32 = vadd.f32 1e-06, %v509_v29 }
 0x172   : > { %v487_v31 = vpop.xlane.xlu1 %486  ;;  %v485_v33 = vpop.xlane.xlu0 %484 }
 0x173   : > { %v512_v37 = vmul.f32 0.0078125, %v487_v31  ;;  %5362 = vrsqrt.f32 %v526_v30  ;;  %v511_v38 = vmul.f32 0.0078125, %v485_v33  ;;  %v5247_v31 = vld [vmem:[#allocation8 + $0xd8] ss:$20 sps:$4 sm:$0xff]  }
 0x174   : > { %5364 = vrsqrt.f32 %v525_v32 }
 0x175   : > { %v5355_v36 = vpop.eup %5354  ;;  %v528_v44 = vadd.f32 1e-06, %v512_v37  ;;  %v527_v48 = vadd.f32 1e-06, %v511_v38 }
 0x176   : > { %v553_v39 = vmul.f32 %v5355_v36, %v6394_v0  ;;  %v491_v49 = vpop.xlane.xlu1 %490  ;;  %v489_v52 = vpop.xlane.xlu0 %488 }
 0x177   : > { %5366 = vrsqrt.f32 %v528_v44  ;;  %v514_v55 = vmul.f32 0.0078125, %v491_v49  ;;  %v513_v56 = vmul.f32 0.0078125, %v489_v52  ;;  %v5249_v49 = vld [vmem:[#allocation8 + $0x128] ss:$20 sps:$4 sm:$0xff]  }
 0x178   : > { %v575_v50 = vmul.f32 %v6479_v41, %v553_v39  ;;  %5368 = vrsqrt.f32 %v527_v48  ;;  %v5248_v39 = vld [vmem:[#allocation8 + $0x100] ss:$20 sps:$4 sm:$0xff]  }
 0x179   : > { %v5357_v40 = vpop.eup %5356  ;;  %v530_v60 = vadd.f32 1e-06, %v514_v55 }
 0x17a   : > { %v5359_v45 = vpop.eup %5358  ;;  %v554_v46 = vmul.f32 %v5357_v40, %v6400_v2  ;;  %v495_v61 = vpop.xlane.xlu1 %494 }
 0x17b   : > { %v5361_v47 = vpop.eup %5360  ;;  %v555_v53 = vmul.f32 %v5359_v45, %v6397_v1  ;;  %v493_v7 = vpop.xlane.xlu0 %492  ;;  %5370 = vrsqrt.f32 %v530_v60  ;;  %v516_v13 = vmul.f32 0.0078125, %v495_v61 }
 0x17c   : > { %v576_v51 = vmul.f32 %v6479_v41, %v554_v46  ;;  %v556_v54 = vmul.f32 %v5361_v47, %v6407_v5  ;;  %v529_v5 = vadd.f32 1e-06, %v513_v56  ;;  %v515_v15 = vmul.f32 0.0078125, %v493_v7 }
 0x17d   : > { %v5363_v2 = vpop.eup %5362  ;;  %v577_v59 = vmul.f32 %v6479_v41, %v555_v53  ;;  %v532_v17 = vadd.f32 1e-06, %v516_v13 }
 0x17e   : > { %v6484_v0 = vpack.c.bf16 %v576_v51, %v575_v50  ;;  %v5365_v58 = vpop.eup %5364  ;;  %v578_v1 = vmul.f32 %v6479_v41, %v556_v54  ;;  %v558_v6 = vmul.f32 %v5363_v2, %v6414_v8  ;;  %5372 = vrsqrt.f32 %v529_v5  ;;  %v499_v19 = vpop.xlane.xlu1 %498 }
 0x17f   : > { %v557_v63 = vmul.f32 %v5365_v58, %v6417_v9  ;;  %v531_v18 = vadd.f32 1e-06, %v515_v15  ;;  %v497_v28 = vpop.xlane.xlu0 %496  ;;  %5374 = vrsqrt.f32 %v532_v17  ;;  %v518_v29 = vmul.f32 0.0078125, %v499_v19  ;;  %v1245_v19 = vld [vmem:[#allocation16 + $0x18] sm:$0xff] }
 0x180   : > { %888 = vmatmul.mubr.bf16.vlgmr.msra.gmra.mrb[0].mxu0 %v6484_v0  ;;  %1001 = vmatmul.mubr.bf16.vlgmr.msra.gmra.mrb[0].mxu1 %v6484_v0  ;;  %v6496_v12 = vpack.c.bf16 %v578_v1, %v577_v59  ;;  %v580_v9 = vmul.f32 %v6479_v41, %v558_v6  ;;  %v517_v30 = vmul.f32 0.0078125, %v497_v28 }
 0x181   : > { %897 = vmatprep.mubr.bf16.mxu0 %v6049_v3  ;;  %1010 = vmatprep.mubr.bf16.mxu1 %v6049_v3  ;;  %v5367_v14 = vpop.eup %5366  ;;  %5376 = vrsqrt.f32 %v531_v18 }
 0x182   : > { %4793 = vmatpush3.bf16.msra.mxu0 %v5242_v4  ;;  %v579_v4 = vmul.f32 %v6479_v41, %v557_v63  ;;  %v5369_v8 = vpop.eup %5368  ;;  %v560_v25 = vmul.f32 %v5367_v14, %v6420_v10  ;;  %v534_v10 = vadd.f32 1e-06, %v518_v29  ;;  %v533_v37 = vadd.f32 1e-06, %v517_v30  ;;  %v503_v38 = vpop.xlane.xlu1 %502  ;;  %v1243_v14 = vld [vmem:[#allocation16 + $0x8] sm:$0xff] }
 0x183   : > { %4794 = vmatprep.subr.bf16.mxu0 %v5243_v57  ;;  %v559_v24 = vmul.f32 %v5369_v8, %v6423_v11  ;;  %v501_v46 = vpop.xlane.xlu0 %500  ;;  %v520_v47 = vmul.f32 0.0078125, %v503_v38  ;;  %v1182_v38 = vld [vmem:[#allocation14 + $0x20] sm:$0xff] }
 0x184   : > { %v6504_v23 = vpack.c.bf16 %v580_v9, %v579_v4  ;;  %v582_v36 = vmul.f32 %v6479_v41, %v560_v25  ;;  %5378 = vrsqrt.f32 %v534_v10  ;;  %v519_v48 = vmul.f32 0.0078125, %v501_v46  ;;  %v1180_v4 = vld [vmem:[#allocation14 + $0x10] sm:$0xff] }
 0x185   : > { %v5371_v32 = vpop.eup %5370  ;;  %v581_v33 = vmul.f32 %v6479_v41, %v559_v24  ;;  %5380 = vrsqrt.f32 %v533_v37  ;;  %v1244_v9 = vld [vmem:[#allocation16 + $0x10] sm:$0xff] }
 0x186   : > { %4795 = vmatpush3.bf16.msra.mxu0 %v5243_v57  ;;  %v562_v45 = vmul.f32 %v5371_v32, %v6430_v20  ;;  %v536_v20 = vadd.f32 1e-06, %v520_v47 }
 0x187   : > { %4796 = vmatprep.subr.bf16.mxu0 %v5244_v62  ;;  %v594_v40 = vpack.c.bf16 %v582_v36, %v581_v33 }
 0x188   : > { %898 = vmatmul.mubr.bf16.gmra.mrb[4].mxu0 %v6496_v12  ;;  %1011 = vmatmul.mubr.bf16.gmra.mrb[4].mxu1 %v6496_v12  ;;  %v5373_v11 = vpop.eup %5372  ;;  %v584_v52 = vmul.f32 %v6479_v41, %v562_v45  ;;  %5382 = vrsqrt.f32 %v536_v20  ;;  %v1247_v45 = vld [vmem:[#allocation16 + $0x28] sm:$0xff] }
 0x189   : > { %907 = vmatprep.mubr.bf16.mxu0 %v6049_v3  ;;  %1020 = vmatprep.mubr.bf16.mxu1 %v6049_v3  ;;  %v561_v44 = vmul.f32 %v5373_v11, %v6433_v21  ;;  %v5375_v50 = vpop.eup %5374  ;;  %v535_v21 = vadd.f32 1e-06, %v519_v48  ;;  %v1248_v48 = vld [vmem:[#allocation16 + $0x30] sm:$0xff] }
 0x18a   : > { %4797 = vmatpush3.bf16.msra.mxu0 %v5244_v62  ;;  %v564_v56 = vmul.f32 %v5375_v50, %v6440_v26  ;;  %v1184_v50 = vld [vmem:[#allocation14 + $0x30] sm:$0xff] }
 0x18b   : > { %4798 = vmatprep.subr.bf16.mxu0 %v5245_v16  ;;  %v583_v51 = vmul.f32 %v6479_v41, %v561_v44  ;;  %v5377_v53 = vpop.eup %5376  ;;  %5384 = vrsqrt.f32 %v535_v21  ;;  %v1183_v44 = vld [vmem:[#allocation14 + $0x28] sm:$0xff]  ;;  %v1185_v21 = vld [vmem:[#allocation14 + $0x38] sm:$0xff] }
 0x18c   : > { %v563_v55 = vmul.f32 %v5377_v53, %v6443_v27  ;;  %v586_v58 = vmul.f32 %v6479_v41, %v564_v56 }
 0x18d   : > { %v595_v54 = vpack.c.bf16 %v584_v52, %v583_v51 }
 0x18e   : > { %4799 = vmatpush3.bf16.msra.mxu0 %v5245_v16  ;;  %v5379_v57 = vpop.eup %5378  ;;  %v585_v2 = vmul.f32 %v6479_v41, %v563_v55 }
 0x18f   : > { %4800 = vmatprep.subr.bf16.mxu0 %v5246_v22  ;;  %v5381_v59 = vpop.eup %5380  ;;  %v566_v26 = vmul.f32 %v5379_v57, %v6450_v34 }
 0x190   : > { %908 = vmatmul.mubr.bf16.gmra.mrb[8].mxu0 %v6504_v23  ;;  %1021 = vmatmul.mubr.bf16.gmra.mrb[8].mxu1 %v6504_v23  ;;  %v596_v1 = vpack.c.bf16 %v586_v58, %v585_v2  ;;  %v565_v27 = vmul.f32 %v5381_v59, %v6453_v35 }
 0x191   : > { %917 = vmatprep.mubr.bf16.mxu0 %v6049_v3  ;;  %1030 = vmatprep.mubr.bf16.mxu1 %v6049_v3  ;;  %v588_v61 = vmul.f32 %v6479_v41, %v566_v26 }
 0x192   : > { %4801 = vmatpush3.bf16.msra.mxu0 %v5246_v22  ;;  %v5383_v60 = vpop.eup %5382  ;;  %v587_v5 = vmul.f32 %v6479_v41, %v565_v27 }
 0x193   : > { %4802 = vmatprep.subr.bf16.mxu0 %v5247_v31  ;;  %v568_v7 = vmul.f32 %v5383_v60, %v6460_v42  ;;  %v1178_v42 = vld [vmem:[#allocation14] sm:$0xff] }
 0x194   : > { %v597_v63 = vpack.c.bf16 %v588_v61, %v587_v5 }
 0x195   : > { %v5385_v62 = vpop.eup %5384  ;;  %v590_v35 = vmul.f32 %v6479_v41, %v568_v7  ;;  %v1250_v7 = vld [vmem:[#allocation16 + $0x40] sm:$0xff] }
 0x196   : > { %4803 = vmatpush3.bf16.msra.mxu0 %v5247_v31  ;;  %v567_v6 = vmul.f32 %v5385_v62, %v6463_v43  ;;  %v1242_v43 = vld [vmem:[#allocation16] sm:$0xff] }
 0x197   : > { %4804 = vmatprep.subr.bf16.mxu0 %v5248_v39 }
 0x198   : > { %918 = vmatmul.mubr.bf16.gmra.mrb[12].mxu0 %v594_v40  ;;  %1031 = vmatmul.mubr.bf16.gmra.mrb[12].mxu1 %v594_v40  ;;  %v589_v34 = vmul.f32 %v6479_v41, %v567_v6  ;;  %v1179_v41 = vld [vmem:[#allocation14 + $0x8] sm:$0xff]  ;;  %v1186_v6 = vld [vmem:[#allocation14 + $0x40] sm:$0xff] }
 0x199   : > { %927 = vmatprep.mubr.bf16.mxu0 %v6049_v3  ;;  %1040 = vmatprep.mubr.bf16.mxu1 %v6049_v3 }
 0x19a   : > { %4805 = vmatpush3.bf16.msra.mxu0 %v5248_v39  ;;  %v598_v13 = vpack.c.bf16 %v590_v35, %v589_v34  ;;  %v1246_v39 = vld [vmem:[#allocation16 + $0x20] sm:$0xff]  ;;  %v1187_v34 = vld [vmem:[#allocation14 + $0x48] sm:$0xff] }
 0x19b   : > { %4806 = vmatprep.subr.bf16.mxu0 %v5249_v49  ;;  %v1251_v35 = vld [vmem:[#allocation16 + $0x48] sm:$0xff] }
 0x19e   : > { %4807 = vmatpush3.bf16.msra.mxu0 %v5249_v49 }
 0x1a0   : > { %928 = vmatmul.mubr.bf16.gmra.mrb[16].mxu0 %v595_v54  ;;  %1041 = vmatmul.mubr.bf16.gmra.mrb[16].mxu1 %v595_v54 }
 0x1a1   : > { %937 = vmatprep.mubr.bf16.mxu0 %v6049_v3  ;;  %1050 = vmatprep.mubr.bf16.mxu1 %v6049_v3 }
 0x1a8   : > { %938 = vmatmul.mubr.bf16.gmra.mrb[20].mxu0 %v596_v1  ;;  %1051 = vmatmul.mubr.bf16.gmra.mrb[20].mxu1 %v596_v1 }
 0x1a9   : > { %947 = vmatprep.mubr.bf16.mxu0 %v6049_v3  ;;  %1060 = vmatprep.mubr.bf16.mxu1 %v6049_v3 }
 0x1b0   : > { %948 = vmatmul.mubr.bf16.gmra.mrb[24].mxu0 %v597_v63  ;;  %1061 = vmatmul.mubr.bf16.gmra.mrb[24].mxu1 %v597_v63 }
 0x1b1   : > { %957 = vmatprep.mubr.bf16.mxu0 %v6049_v3  ;;  %1070 = vmatprep.mubr.bf16.mxu1 %v6049_v3 }
 0x1b8   : > { %958 = vmatmul.mubr.bf16.gmra.mrb[28].mxu0 %v598_v13  ;;  %1071 = vmatmul.mubr.bf16.gmra.mrb[28].mxu1 %v598_v13 }
 0x1b9   : > { %4808 = vmatprep.mubr.bf16.mxu0 %v6484_v0 }
 0x1c0   : > { %4809 = vmatmul.mubr.bf16.vlgmr.msra.gmra.mrb[32].mxu0 %v6496_v12  ;;  %v1181_v12 = vld [vmem:[#allocation14 + $0x18] sm:$0xff] }
 0x1c1   : > { %4812 = vmatprep.mubr.bf16.mxu0 %v6504_v23 }
 0x1c8   : > { %4813 = vmatmul.mubr.bf16.gmra.mrb[36].mxu0 %v594_v40 }
 0x1c9   : > { %4816 = vmatprep.mubr.bf16.mxu0 %v595_v54  ;;  %v1249_v54 = vld [vmem:[#allocation16 + $0x38] sm:$0xff] }
 0x1d0   : > { %4817 = vmatmul.mubr.bf16.gmra.mrb[40].mxu0 %v596_v1 }
 0x1d1   : > { %4820 = vmatprep.mubr.bf16.mxu0 %v597_v63 }
 0x1d8   : > { %4821 = vmatmul.mubr.bf16.gmra.mrb[44].mxu0 %v598_v13 }
 0x253   : > { %v889_v15 = vpop.f32.mrb[0].mxu0  ;;  %v1002_v16 = vpop.f32.mrb[0].mxu1 }
 0x254   : > { %v1210_v8 = vmul.f32 %v1178_v42, %v889_v15  ;;  %v1274_v17 = vmul.f32 %v1242_v43, %v1002_v16  ;;  %v891_v0 = vpop.f32.mrb[1].mxu0  ;;  %v1004_v18 = vpop.f32.mrb[1].mxu1  ;;  %v1188_v15 = vld [vmem:[#allocation14 + $0x50] sm:$0xff] }
 0x255   : > { %v1211_v22 = vmul.f32 %v1179_v41, %v891_v0  ;;  %v1275_v23 = vmul.f32 %v1243_v14, %v1004_v18  ;;  %v893_v24 = vpop.f32.mrb[2].mxu0  ;;  %v1006_v25 = vpop.f32.mrb[2].mxu1  ;;  %v1252_v16 = vld [vmem:[#allocation16 + $0x50] sm:$0xff]  ;;  %v1189_v18 = vld [vmem:[#allocation14 + $0x58] sm:$0xff] }
 0x256   : > { %v1306_v28 = vadd.f32 %v1274_v17, %v1210_v8  ;;  %v1212_v29 = vmul.f32 %v1180_v4, %v893_v24  ;;  %v1276_v30 = vmul.f32 %v1244_v9, %v1006_v25  ;;  %v895_v31 = vpop.f32.mrb[3].mxu0  ;;  %v1008_v32 = vpop.f32.mrb[3].mxu1 }
 0x257   : > { %v1307_v33 = vadd.f32 %v1275_v23, %v1211_v22  ;;  %v1213_v36 = vmul.f32 %v1181_v12, %v895_v31  ;;  %v1277_v11 = vmul.f32 %v1245_v19, %v1008_v32  ;;  %v1253_v12 = vld [vmem:[#allocation16 + $0x58] sm:$0xff] }
 0x258   : > { %v1308_v10 = vadd.f32 %v1276_v30, %v1212_v29 }
 0x259   : > { %v1309_v37 = vadd.f32 %v1277_v11, %v1213_v36 }
 0x25a   : > { %v6541_v40 = vpack.c.bf16 %v1308_v10, %v1306_v28 }
 0x25b   : > { %v899_v46 = vpop.f32.mrb[4].mxu0  ;;  %v1012_v47 = vpop.f32.mrb[4].mxu1  ;;  %v1339_v49 = vpack.c.bf16 %v1309_v37, %v1307_v33 }
 0x25c   : > { %1363 = vst.msk [vmem:[#allocation2] sm:$0xff] %vm1362_vm0, %v6541_v40  ;;  %v1214_v51 = vmul.f32 %v1182_v38, %v899_v46  ;;  %v1278_v52 = vmul.f32 %v1246_v39, %v1012_v47  ;;  %v901_v53 = vpop.f32.mrb[5].mxu0  ;;  %v1014_v20 = vpop.f32.mrb[5].mxu1  ;;  %v1190_v38 = vld [vmem:[#allocation14 + $0x60] sm:$0xff] }
 0x25d   : > { %v1215_v55 = vmul.f32 %v1183_v44, %v901_v53  ;;  %v1279_v56 = vmul.f32 %v1247_v45, %v1014_v20  ;;  %v1016_v57 = vpop.f32.mrb[6].mxu1  ;;  %1436 = vrot.lane.b32.xlu0 %v1339_v49, %s6050_s24  ;;  %1371 = vst.msk [vmem:[#allocation3] sm:$0xff] %vm1362_vm0, %v1339_v49  ;;  %v903_v2 = vpop.f32.mrb[6].mxu0  ;;  %v1254_v39 = vld [vmem:[#allocation16 + $0x60] sm:$0xff]  ;;  %v1191_v44 = vld [vmem:[#allocation14 + $0x68] sm:$0xff] }
 0x25e   : > { %v1310_v58 = vadd.f32 %v1278_v52, %v1214_v51  ;;  %v1280_v59 = vmul.f32 %v1248_v48, %v1016_v57  ;;  %v1216_v1 = vmul.f32 %v1184_v50, %v903_v2  ;;  %v905_v27 = vpop.f32.mrb[7].mxu0  ;;  %v1018_v26 = vpop.f32.mrb[7].mxu1  ;;  %v1255_v45 = vld [vmem:[#allocation16 + $0x68] sm:$0xff]  ;;  %v1192_v50 = vld [vmem:[#allocation14 + $0x70] sm:$0xff] }
 0x25f   : > { %v1311_v60 = vadd.f32 %v1279_v56, %v1215_v55  ;;  %v1217_v5 = vmul.f32 %v1185_v21, %v905_v27  ;;  %v1281_v61 = vmul.f32 %v1249_v54, %v1018_v26  ;;  %v1256_v51 = vld [vmem:[#allocation16 + $0x70] sm:$0xff]  ;;  %v1193_v55 = vld [vmem:[#allocation14 + $0x78] sm:$0xff] }
 0x260   : > { %v1312_v62 = vadd.f32 %v1280_v59, %v1216_v1  ;;  %v1257_v56 = vld [vmem:[#allocation16 + $0x78] sm:$0xff] }
 0x261   : > { %v1313_v63 = vadd.f32 %v1281_v61, %v1217_v5 }
 0x262   : > { %v6547_v13 = vpack.c.bf16 %v1312_v62, %v1310_v58 }
 0x263   : > { %v909_v42 = vpop.f32.mrb[8].mxu0  ;;  %v1022_v43 = vpop.f32.mrb[8].mxu1  ;;  %v1561_v41 = vld [vmem:[#allocation2] sm:$0xff]  ;;  %v1341_v14 = vpack.c.bf16 %v1313_v63, %v1311_v60 }
 0x264   : > { %v1218_v4 = vmul.f32 %v1186_v6, %v909_v42  ;;  %v1282_v9 = vmul.f32 %v1250_v7, %v1022_v43  ;;  %v911_v8 = vpop.f32.mrb[9].mxu0  ;;  %v1024_v17 = vpop.f32.mrb[9].mxu1  ;;  %4840 = vmatprep.mubr.msk.bf16.mxu1 %vm1362_vm0, %v1561_v41  ;;  %v1577_v0 = vld [vmem:[#allocation3] sm:$0xff]  ;;  %1364 = vst.msk [vmem:[#allocation2 + $0x8] sm:$0xff] %vm1362_vm0, %v6547_v13  ;;  %v1195_v43 = vld [vmem:[#allocation14 + $0x88] sm:$0xff] }
 0x265   : > { %v1219_v19 = vmul.f32 %v1187_v34, %v911_v8  ;;  %v1283_v22 = vmul.f32 %v1251_v35, %v1024_v17  ;;  %5016 = vmatprep.subr.msk.bf16.mxu1 %vm1362_vm0, %v1577_v0  ;;  %1438 = vrot.lane.b32.xlu1 %v1341_v14, %s6050_s24  ;;  %1372 = vst.msk [vmem:[#allocation3 + $0x8] sm:$0xff] %vm1362_vm0, %v1341_v14  ;;  %v913_v23 = vpop.f32.mrb[10].mxu0  ;;  %v1026_v24 = vpop.f32.mrb[10].mxu1  ;;  %v1618_v25 = vsel %vm1362_vm0, %v1577_v0, 0  ;;  %v1194_v35 = vld [vmem:[#allocation14 + $0x80] sm:$0xff]  ;;  %v1259_v41 = vld [vmem:[#allocation16 + $0x88] sm:$0xff] }
 0x266   : > { %v1314_v28 = vadd.f32 %v1282_v9, %v1218_v4  ;;  %v1220_v29 = vmul.f32 %v1188_v15, %v913_v23  ;;  %v1284_v30 = vmul.f32 %v1252_v16, %v1026_v24  ;;  %v915_v31 = vpop.f32.mrb[11].mxu0  ;;  %v1028_v32 = vpop.f32.mrb[11].mxu1  ;;  %4825 = vmatpush3.bf16.xpose.msra.mxu1 %v1618_v25  ;;  %v1258_v42 = vld [vmem:[#allocation16 + $0x80] sm:$0xff]  ;;  %v1196_v9 = vld [vmem:[#allocation14 + $0x90] sm:$0xff]  ;;  %v1261_v23 = vld [vmem:[#allocation16 + $0x98] sm:$0xff] }
 0x267   : > { %v1315_v33 = vadd.f32 %v1283_v22, %v1219_v19  ;;  %v1221_v36 = vmul.f32 %v1189_v18, %v915_v31  ;;  %v1285_v11 = vmul.f32 %v1253_v12, %v1028_v32  ;;  %v1260_v8 = vld [vmem:[#allocation16 + $0x90] sm:$0xff]  ;;  %v1197_v22 = vld [vmem:[#allocation14 + $0x98] sm:$0xff] }
 0x268   : > { %v1316_v10 = vadd.f32 %v1284_v30, %v1220_v29 }
 0x269   : > { %v1317_v37 = vadd.f32 %v1285_v11, %v1221_v36 }
 0x26a   : > { %v6556_v46 = vpack.c.bf16 %v1316_v10, %v1314_v28 }
 0x26b   : > { %v919_v47 = vpop.f32.mrb[12].mxu0  ;;  %v1032_v48 = vpop.f32.mrb[12].mxu1  ;;  %v1343_v49 = vpack.c.bf16 %v1317_v37, %v1315_v33 }
 0x26c   : > { %v1222_v52 = vmul.f32 %v1190_v38, %v919_v47  ;;  %v1286_v53 = vmul.f32 %v1254_v39, %v1032_v48  ;;  %v921_v20 = vpop.f32.mrb[13].mxu0  ;;  %v1034_v21 = vpop.f32.mrb[13].mxu1  ;;  %v1578_v54 = vld [vmem:[#allocation3 + $0x8] sm:$0xff]  ;;  %1365 = vst.msk [vmem:[#allocation2 + $0x10] sm:$0xff] %vm1362_vm0, %v6556_v46  ;;  %v1262_v47 = vld [vmem:[#allocation16 + $0xa0] sm:$0xff] }
 0x26d   : > { %v1223_v57 = vmul.f32 %v1191_v44, %v921_v20  ;;  %v1287_v2 = vmul.f32 %v1255_v45, %v1034_v21  ;;  %5017 = vmatprep.subr.msk.bf16.mxu1 %vm1362_vm0, %v1578_v54  ;;  %1440 = vrot.lane.b32.xlu1 %v1343_v49, %s6050_s24  ;;  %1373 = vst.msk [vmem:[#allocation3 + $0x10] sm:$0xff] %vm1362_vm0, %v1343_v49  ;;  %v923_v58 = vpop.f32.mrb[14].mxu0  ;;  %v1036_v59 = vpop.f32.mrb[14].mxu1  ;;  %v1621_v1 = vsel %vm1362_vm0, %v1578_v54, 0  ;;  %v1198_v45 = vld [vmem:[#allocation14 + $0xa0] sm:$0xff]  ;;  %v1199_v48 = vld [vmem:[#allocation14 + $0xa8] sm:$0xff] }
 0x26e   : > { %v1318_v27 = vadd.f32 %v1286_v53, %v1222_v52  ;;  %v1224_v26 = vmul.f32 %v1192_v50, %v923_v58  ;;  %v1288_v60 = vmul.f32 %v1256_v51, %v1036_v59  ;;  %v925_v5 = vpop.f32.mrb[15].mxu0  ;;  %v1038_v61 = vpop.f32.mrb[15].mxu1  ;;  %4827 = vmatpush3.bf16.xpose.msra.mxu1 %v1621_v1  ;;  %v1263_v49 = vld [vmem:[#allocation16 + $0xa8] sm:$0xff]  ;;  %v1200_v20 = vld [vmem:[#allocation14 + $0xb0] sm:$0xff]  ;;  %v1201_v58 = vld [vmem:[#allocation14 + $0xb8] sm:$0xff] }
 0x26f   : > { %v1319_v62 = vadd.f32 %v1287_v2, %v1223_v57  ;;  %v1225_v63 = vmul.f32 %v1193_v55, %v925_v5  ;;  %v1289_v6 = vmul.f32 %v1257_v56, %v1038_v61  ;;  %v1264_v21 = vld [vmem:[#allocation16 + $0xb0] sm:$0xff]  ;;  %v1265_v59 = vld [vmem:[#allocation16 + $0xb8] sm:$0xff] }
 0x270   : > { %v1320_v7 = vadd.f32 %v1288_v60, %v1224_v26 }
 0x271   : > { %v1321_v34 = vadd.f32 %v1289_v6, %v1225_v63 }
 0x272   : > { %v6564_v14 = vpack.c.bf16 %v1320_v7, %v1318_v27 }
 0x273   : > { %v929_v15 = vpop.f32.mrb[16].mxu0  ;;  %v1042_v16 = vpop.f32.mrb[16].mxu1  ;;  %v1345_v4 = vpack.c.bf16 %v1321_v34, %v1319_v62 }
 0x274   : > { %v1226_v17 = vmul.f32 %v1194_v35, %v929_v15  ;;  %v1290_v0 = vmul.f32 %v1258_v42, %v1042_v16  ;;  %v931_v18 = vpop.f32.mrb[17].mxu0  ;;  %v1044_v12 = vpop.f32.mrb[17].mxu1  ;;  %v1579_v19 = vld [vmem:[#allocation3 + $0x10] sm:$0xff]  ;;  %1366 = vst.msk [vmem:[#allocation2 + $0x18] sm:$0xff] %vm1362_vm0, %v6564_v14  ;;  %v1202_v15 = vld [vmem:[#allocation14 + $0xc0] sm:$0xff] }
 0x275   : > { %v1227_v24 = vmul.f32 %v1195_v43, %v931_v18  ;;  %v1291_v25 = vmul.f32 %v1259_v41, %v1044_v12  ;;  %5018 = vmatprep.subr.msk.bf16.mxu1 %vm1362_vm0, %v1579_v19  ;;  %1442 = vrot.lane.b32.xlu1 %v1345_v4, %s6050_s24  ;;  %1374 = vst.msk [vmem:[#allocation3 + $0x18] sm:$0xff] %vm1362_vm0, %v1345_v4  ;;  %v933_v28 = vpop.f32.mrb[18].mxu0  ;;  %v1046_v29 = vpop.f32.mrb[18].mxu1  ;;  %v1624_v30 = vsel %vm1362_vm0, %v1579_v19, 0  ;;  %v1266_v16 = vld [vmem:[#allocation16 + $0xc0] sm:$0xff]  ;;  %v1203_v4 = vld [vmem:[#allocation14 + $0xc8] sm:$0xff] }
 0x276   : > { %v1322_v31 = vadd.f32 %v1290_v0, %v1226_v17  ;;  %v1228_v32 = vmul.f32 %v1196_v9, %v933_v28  ;;  %v1292_v33 = vmul.f32 %v1260_v8, %v1046_v29  ;;  %v935_v36 = vpop.f32.mrb[19].mxu0  ;;  %v1048_v11 = vpop.f32.mrb[19].mxu1  ;;  %4829 = vmatpush3.bf16.xpose.msra.mxu1 %v1624_v30  ;;  %v1267_v9 = vld [vmem:[#allocation16 + $0xc8] sm:$0xff]  ;;  %v1204_v12 = vld [vmem:[#allocation14 + $0xd0] sm:$0xff]  ;;  %v1205_v29 = vld [vmem:[#allocation14 + $0xd8] sm:$0xff] }
 0x277   : > { %v1323_v10 = vadd.f32 %v1291_v25, %v1227_v24  ;;  %v1229_v37 = vmul.f32 %v1197_v22, %v935_v36  ;;  %v1293_v38 = vmul.f32 %v1261_v23, %v1048_v11  ;;  %v1268_v19 = vld [vmem:[#allocation16 + $0xd0] sm:$0xff]  ;;  %v1269_v30 = vld [vmem:[#allocation16 + $0xd8] sm:$0xff] }
 0x278   : > { %v1324_v39 = vadd.f32 %v1292_v33, %v1228_v32 }
 0x279   : > { %v1325_v44 = vadd.f32 %v1293_v38, %v1229_v37 }
 0x27a   : > { %v6572_v50 = vpack.c.bf16 %v1324_v39, %v1322_v31 }
 0x27b   : > { %v939_v51 = vpop.f32.mrb[20].mxu0  ;;  %v1052_v52 = vpop.f32.mrb[20].mxu1  ;;  %v1347_v53 = vpack.c.bf16 %v1325_v44, %v1323_v10 }
 0x27c   : > { %v1230_v54 = vmul.f32 %v1198_v45, %v939_v51  ;;  %v1294_v55 = vmul.f32 %v1262_v47, %v1052_v52  ;;  %v941_v56 = vpop.f32.mrb[21].mxu0  ;;  %v1054_v57 = vpop.f32.mrb[21].mxu1  ;;  %v1580_v2 = vld [vmem:[#allocation3 + $0x18] sm:$0xff]  ;;  %1367 = vst.msk [vmem:[#allocation2 + $0x20] sm:$0xff] %vm1362_vm0, %v6572_v50  ;;  %v1206_v52 = vld [vmem:[#allocation14 + $0xe0] sm:$0xff] }
 0x27d   : > { %v1231_v1 = vmul.f32 %v1199_v48, %v941_v56  ;;  %v1295_v27 = vmul.f32 %v1263_v49, %v1054_v57  ;;  %5019 = vmatprep.subr.msk.bf16.mxu1 %vm1362_vm0, %v1580_v2  ;;  %1444 = vrot.lane.b32.xlu0 %v1347_v53, %s6050_s24  ;;  %1375 = vst.msk [vmem:[#allocation3 + $0x20] sm:$0xff] %vm1362_vm0, %v1347_v53  ;;  %v943_v26 = vpop.f32.mrb[22].mxu0  ;;  %v1056_v60 = vpop.f32.mrb[22].mxu1  ;;  %v1627_v5 = vsel %vm1362_vm0, %v1580_v2, 0  ;;  %v1270_v53 = vld [vmem:[#allocation16 + $0xe0] sm:$0xff]  ;;  %v1208_v2 = vld [vmem:[#allocation14 + $0xf0] sm:$0xff] }
 0x27e   : > { %v1326_v61 = vadd.f32 %v1294_v55, %v1230_v54  ;;  %v1232_v62 = vmul.f32 %v1200_v20, %v943_v26  ;;  %v1296_v63 = vmul.f32 %v1264_v21, %v1056_v60  ;;  %v945_v6 = vpop.f32.mrb[23].mxu0  ;;  %v1058_v7 = vpop.f32.mrb[23].mxu1  ;;  %4831 = vmatpush3.bf16.xpose.msra.mxu1 %v1627_v5  ;;  %v1207_v20 = vld [vmem:[#allocation14 + $0xe8] sm:$0xff]  ;;  %v1209_v5 = vld [vmem:[#allocation14 + $0xf8] sm:$0xff] }
 0x27f   : > { %v1327_v34 = vadd.f32 %v1295_v27, %v1231_v1  ;;  %v1233_v35 = vmul.f32 %v1201_v58, %v945_v6  ;;  %v1297_v42 = vmul.f32 %v1265_v59, %v1058_v7  ;;  %v1271_v21 = vld [vmem:[#allocation16 + $0xe8] sm:$0xff]  ;;  %v1272_v58 = vld [vmem:[#allocation16 + $0xf0] sm:$0xff] }
 0x280   : > { %v1328_v43 = vadd.f32 %v1296_v63, %v1232_v62 }
 0x281   : > { %v1329_v41 = vadd.f32 %v1297_v42, %v1233_v35 }
 0x282   : > { %v6580_v8 = vpack.c.bf16 %v1328_v43, %v1326_v61  ;;  %v1273_v61 = vld [vmem:[#allocation16 + $0xf8] sm:$0xff] }
 0x283   : > { %v949_v17 = vpop.f32.mrb[24].mxu0  ;;  %v1062_v0 = vpop.f32.mrb[24].mxu1  ;;  %v1349_v18 = vpack.c.bf16 %v1329_v41, %v1327_v34 }
 0x284   : > { %v1234_v22 = vmul.f32 %v1202_v15, %v949_v17  ;;  %v1298_v23 = vmul.f32 %v1266_v16, %v1062_v0  ;;  %v951_v24 = vpop.f32.mrb[25].mxu0  ;;  %v1064_v25 = vpop.f32.mrb[25].mxu1  ;;  %v1581_v28 = vld [vmem:[#allocation3 + $0x20] sm:$0xff]  ;;  %1368 = vst.msk [vmem:[#allocation2 + $0x28] sm:$0xff] %vm1362_vm0, %v6580_v8 }
 0x285   : > { %v1235_v31 = vmul.f32 %v1203_v4, %v951_v24  ;;  %v1299_v32 = vmul.f32 %v1267_v9, %v1064_v25  ;;  %5020 = vmatprep.subr.msk.bf16.mxu1 %vm1362_vm0, %v1581_v28  ;;  %1446 = vrot.lane.b32.xlu1 %v1349_v18, %s6050_s24  ;;  %1376 = vst.msk [vmem:[#allocation3 + $0x28] sm:$0xff] %vm1362_vm0, %v1349_v18  ;;  %v953_v33 = vpop.f32.mrb[26].mxu0  ;;  %v1066_v36 = vpop.f32.mrb[26].mxu1  ;;  %v1630_v11 = vsel %vm1362_vm0, %v1581_v28, 0 }
 0x286   : > { %v1330_v10 = vadd.f32 %v1298_v23, %v1234_v22  ;;  %v1236_v37 = vmul.f32 %v1204_v12, %v953_v33  ;;  %v1300_v38 = vmul.f32 %v1268_v19, %v1066_v36  ;;  %v955_v39 = vpop.f32.mrb[27].mxu0  ;;  %v1068_v44 = vpop.f32.mrb[27].mxu1  ;;  %4833 = vmatpush3.bf16.xpose.msra.mxu1 %v1630_v11 }
 0x287   : > { %v1331_v45 = vadd.f32 %v1299_v32, %v1235_v31  ;;  %v1237_v47 = vmul.f32 %v1205_v29, %v955_v39  ;;  %v1301_v48 = vmul.f32 %v1269_v30, %v1068_v44  ;;  %v1563_v39 = vld [vmem:[#allocation2 + $0x10] sm:$0xff] }
 0x288   : > { %v1332_v49 = vadd.f32 %v1300_v38, %v1236_v37  ;;  %v1562_v38 = vld [vmem:[#allocation2 + $0x8] sm:$0xff] }
 0x289   : > { %v1333_v51 = vadd.f32 %v1301_v48, %v1237_v47 }
 0x28a   : > { %v1350_v54 = vpack.c.bf16 %v1332_v49, %v1330_v10 }
 0x28b   : > { %v959_v55 = vpop.f32.mrb[28].mxu0  ;;  %v1072_v56 = vpop.f32.mrb[28].mxu1  ;;  %v1351_v57 = vpack.c.bf16 %v1333_v51, %v1331_v45 }
 0x28c   : > { %v1238_v59 = vmul.f32 %v1206_v52, %v959_v55  ;;  %v1302_v1 = vmul.f32 %v1270_v53, %v1072_v56  ;;  %v961_v27 = vpop.f32.mrb[29].mxu0  ;;  %v1074_v26 = vpop.f32.mrb[29].mxu1  ;;  %v1582_v60 = vld [vmem:[#allocation3 + $0x28] sm:$0xff]  ;;  %1369 = vst.msk [vmem:[#allocation2 + $0x30] sm:$0xff] %vm1362_vm0, %v1350_v54  ;;  %v1564_v52 = vld [vmem:[#allocation2 + $0x18] sm:$0xff] }
 0x28d   : > { %v1239_v62 = vmul.f32 %v1207_v20, %v961_v27  ;;  %v1303_v63 = vmul.f32 %v1271_v21, %v1074_v26  ;;  %5021 = vmatprep.subr.msk.bf16.mxu1 %vm1362_vm0, %v1582_v60  ;;  %1448 = vrot.lane.b32.xlu0 %v1351_v57, %s6050_s24  ;;  %1377 = vst.msk [vmem:[#allocation3 + $0x30] sm:$0xff] %vm1362_vm0, %v1351_v57  ;;  %v963_v6 = vpop.f32.mrb[30].mxu0  ;;  %v1076_v7 = vpop.f32.mrb[30].mxu1  ;;  %v1633_v34 = vsel %vm1362_vm0, %v1582_v60, 0  ;;  %v1565_v20 = vld [vmem:[#allocation2 + $0x20] sm:$0xff] }
 0x28e   : > { %v1334_v35 = vadd.f32 %v1302_v1, %v1238_v59  ;;  %v1240_v42 = vmul.f32 %v1208_v2, %v963_v6  ;;  %v1304_v43 = vmul.f32 %v1272_v58, %v1076_v7  ;;  %v965_v41 = vpop.f32.mrb[31].mxu0  ;;  %v1078_v15 = vpop.f32.mrb[31].mxu1  ;;  %4835 = vmatpush3.bf16.xpose.msra.mxu1 %v1633_v34  ;;  %v1566_v2 = vld [vmem:[#allocation2 + $0x28] sm:$0xff] }
 0x28f   : > { %v1335_v16 = vadd.f32 %v1303_v63, %v1239_v62  ;;  %v1241_v4 = vmul.f32 %v1209_v5, %v965_v41  ;;  %v1305_v9 = vmul.f32 %v1273_v61, %v1078_v15 }
 0x290   : > { %v1336_v17 = vadd.f32 %v1304_v43, %v1240_v42 }
 0x291   : > { %v1337_v0 = vadd.f32 %v1305_v9, %v1241_v4  ;;  %1395 = vrot.lane.b32.xlu0 %v6541_v40, %s6050_s24 }
 0x292   : > { %v1352_v18 = vpack.c.bf16 %v1336_v17, %v1334_v35 }
 0x293   : > { %v4810_v12 = vpop.f32.mrb[32].mxu0  ;;  %v1353_v19 = vpack.c.bf16 %v1337_v0, %v1335_v16  ;;  %v1567_v58 = vld [vmem:[#allocation2 + $0x30] sm:$0xff] }
 0x294   : > { %v1115_v22 = vpop.f32.mrb[33].mxu0  ;;  %v1583_v23 = vld [vmem:[#allocation3 + $0x30] sm:$0xff]  ;;  %1370 = vst.msk [vmem:[#allocation2 + $0x38] sm:$0xff] %vm1362_vm0, %v1352_v18 }
 0x295   : > { %1399 = vrot.lane.b32.xlu0 %v6556_v46, %s6050_s24  ;;  %5022 = vmatprep.subr.msk.bf16.mxu1 %vm1362_vm0, %v1583_v23  ;;  %1378 = vst.msk [vmem:[#allocation3 + $0x38] sm:$0xff] %vm1362_vm0, %v1353_v19  ;;  %v4811_v24 = vpop.f32.mrb[34].mxu0  ;;  %v1636_v25 = vsel %vm1362_vm0, %v1583_v23, 0 }
 0x296   : > { %1450 = vrot.lane.b32.xlu1 %v1353_v19, %s6050_s24  ;;  %v1355_v40 = vpack.c.bf16 %v4811_v24, %v4810_v12  ;;  %v1118_v28 = vpop.f32.mrb[35].mxu0  ;;  %4837 = vmatpush3.bf16.xpose.msra.mxu1 %v1636_v25 }
 0x297   : > { %v1354_v29 = vpack.c.bf16 %v1118_v28, %v1115_v22 }
 0x298   : > { %1380 = vst.msk [vmem:[#allocation4 + $0x8] sm:$0xff] %vm1362_vm0, %v1355_v40 }
 0x299   : > { %1379 = vst.msk [vmem:[#allocation4] sm:$0xff] %vm1362_vm0, %v1354_v29  ;;  %1403 = vrot.lane.b32.xlu0 %v6572_v50, %s6050_s24 }
 0x29a   : > { %1397 = vrot.lane.b32.xlu1 %v6547_v13, %s6050_s24 }
 0x29b   : > { %v4814_v46 = vpop.f32.mrb[36].mxu0  ;;  %v1568_v27 = vld [vmem:[#allocation2 + $0x38] sm:$0xff] }
 0x29c   : > { %v1131_v30 = vpop.f32.mrb[37].mxu0  ;;  %v1584_v31 = vld [vmem:[#allocation3 + $0x38] sm:$0xff] }
 0x29d   : > { %1407 = vrot.lane.b32.xlu0 %v1350_v54, %s6050_s24  ;;  %v4815_v32 = vpop.f32.mrb[38].mxu0  ;;  %5023 = vmatprep.subr.msk.bf16.mxu1 %vm1362_vm0, %v1584_v31  ;;  %v1639_v33 = vsel %vm1362_vm0, %v1584_v31, 0 }
 0x29e   : > { %1401 = vrot.lane.b32.xlu1 %v6564_v14, %s6050_s24  ;;  %v1357_v36 = vpack.c.bf16 %v4815_v32, %v4814_v46  ;;  %v1134_v11 = vpop.f32.mrb[39].mxu0  ;;  %4839 = vmatpush3.bf16.xpose.msra.mxu1 %v1639_v33 }
 0x29f   : > { %v1356_v50 = vpack.c.bf16 %v1134_v11, %v1131_v30  ;;  %v2188_v48 = vld [vmem:[#allocation4 + $0x8] sm:$0xff] }
 0x2a0   : > { %1382 = vst.msk [vmem:[#allocation4 + $0x18] sm:$0xff] %vm1362_vm0, %v1357_v36  ;;  %v2187_v13 = vld [vmem:[#allocation4] sm:$0xff] }
 0x2a1   : > { %1381 = vst.msk [vmem:[#allocation4 + $0x10] sm:$0xff] %vm1362_vm0, %v1356_v50  ;;  %1477 = vrot.lane.b32.xlu0 %v1354_v29, %s6050_s24  ;;  %4888 = vmatprep.subr.bf16.mxu1 %v2187_v13 }
 0x2a2   : > { %1405 = vrot.lane.b32.xlu1 %v6580_v8, %s6050_s24 }
 0x2a3   : > { %v4818_v10 = vpop.f32.mrb[40].mxu0 }
 0x2a4   : > { %v1147_v37 = vpop.f32.mrb[41].mxu0 }
 0x2a5   : > { %4841 = vmatmul.mubr.msk.bf16.vlgmr.msra.gmra.mrb[32].mxu1 %vm1362_vm0, %v1562_v38  ;;  %1483 = vrot.lane.b32.xlu0 %v1357_v36, %s6050_s24  ;;  %v4819_v14 = vpop.f32.mrb[42].mxu0 }
 0x2a6   : > { %1409 = vrot.lane.b32.xlu1 %v1352_v18, %s6050_s24  ;;  %v1359_v44 = vpack.c.bf16 %v4819_v14, %v4818_v10  ;;  %v1150_v45 = vpop.f32.mrb[43].mxu0  ;;  %4844 = vmatprep.mubr.msk.bf16.mxu1 %vm1362_vm0, %v1563_v39 }
 0x2a7   : > { %v1358_v47 = vpack.c.bf16 %v1150_v45, %v1147_v37  ;;  %4889 = vmatpush3.bf16.msra.mxu1 %v2187_v13  ;;  %v2190_v56 = vld [vmem:[#allocation4 + $0x18] sm:$0xff] }
 0x2a8   : > { %1384 = vst.msk [vmem:[#allocation4 + $0x28] sm:$0xff] %vm1362_vm0, %v1359_v44  ;;  %4890 = vmatprep.subr.bf16.mxu1 %v2188_v48  ;;  %v2189_v49 = vld [vmem:[#allocation4 + $0x10] sm:$0xff] }
 0x2a9   : > { %1383 = vst.msk [vmem:[#allocation4 + $0x20] sm:$0xff] %vm1362_vm0, %v1358_v47  ;;  %1481 = vrot.lane.b32.xlu0 %v1356_v50, %s6050_s24 }
 0x2aa   : > { %1479 = vrot.lane.b32.xlu1 %v1355_v40, %s6050_s24 }
 0x2ab   : > { %4891 = vmatpush3.bf16.msra.mxu1 %v2188_v48  ;;  %v4822_v8 = vpop.f32.mrb[44].mxu0 }
 0x2ac   : > { %4892 = vmatprep.subr.bf16.mxu1 %v2189_v49  ;;  %v1163_v51 = vpop.f32.mrb[45].mxu0 }
 0x2ad   : > { %4845 = vmatmul.mubr.msk.bf16.gmra.mrb[36].mxu1 %vm1362_vm0, %v1564_v52  ;;  %v4823_v53 = vpop.f32.mrb[46].mxu0 }
 0x2ae   : > { %1487 = vrot.lane.b32.xlu1 %v1359_v44, %s6050_s24  ;;  %v6628_v21 = vpack.c.bf16 %v4823_v53, %v4822_v8  ;;  %v1166_v54 = vpop.f32.mrb[47].mxu0  ;;  %4848 = vmatprep.mubr.msk.bf16.mxu1 %vm1362_vm0, %v1565_v20 }
 0x2af   : > { %v6631_v55 = vpack.c.bf16 %v1166_v54, %v1163_v51  ;;  %4893 = vmatpush3.bf16.msra.mxu1 %v2189_v49  ;;  %v2192_v59 = vld [vmem:[#allocation4 + $0x28] sm:$0xff]  ;;  %v1510_v49 = vlaneseq  ;;  %v6051_v54 = vmov -3.4028235e+38  }
 0x2b0   : > { %1386 = vst.msk [vmem:[#allocation4 + $0x38] sm:$0xff] %vm1362_vm0, %v6628_v21  ;;  %4894 = vmatprep.subr.bf16.mxu1 %v2190_v56  ;;  %v2191_v57 = vld [vmem:[#allocation4 + $0x20] sm:$0xff] }
 0x2b1   : > { %1385 = vst.msk [vmem:[#allocation4 + $0x30] sm:$0xff] %vm1362_vm0, %v6631_v55  ;;  %v6690_v51 = vshrl.u32 %v1510_v49, 7  ;;  %v6693_v53 = vand.u32 127, %v1510_v49 }
 0x2b2   : > { %1485 = vrot.lane.b32.xlu1 %v1358_v47, %s6050_s24 }
 0x2b3   : > { %4895 = vmatpush3.bf16.msra.mxu1 %v2190_v56  ;;  %v1513_v52 = vadd.s32 16, %v6690_v51  ;;  %v1512_v20 = vadd.s32 8, %v6690_v51  ;;  %vm1529_vm3 = vcmp.le.s32.totalorder %v6693_v53, %v6690_v51 }
 0x2b4   : > { %4896 = vmatprep.subr.bf16.mxu1 %v2191_v57 }
 0x2b5   : > { %4849 = vmatmul.mubr.msk.bf16.gmra.mrb[40].mxu1 %vm1362_vm0, %v1566_v2  ;;  %vm1531_vm1 = vcmp.le.s32.totalorder %v6693_v53, %v1513_v52  ;;  %vm1530_vm2 = vcmp.le.s32.totalorder %v6693_v53, %v1512_v20 }
 0x2b6   : > { %4852 = vmatprep.mubr.msk.bf16.mxu1 %vm1362_vm0, %v1567_v58  ;;  %v6698_v56 = vsel %vm1531_vm1, 0.0, %v6051_v54 }
 0x2b7   : > { %4897 = vmatpush3.bf16.msra.mxu1 %v2191_v57  ;;  %v2194_v26 = vld [vmem:[#allocation4 + $0x38] sm:$0xff]  ;;  %v1514_v57 = vadd.s32 24, %v6690_v51 }
 0x2b8   : > { %4898 = vmatprep.subr.bf16.mxu1 %v2192_v59  ;;  %v2193_v1 = vld [vmem:[#allocation4 + $0x30] sm:$0xff] }
 0x2b9   : > { %vm1532_vm4 = vcmp.le.s32.totalorder %v6693_v53, %v1514_v57 }
 0x2bb   : > { %4899 = vmatpush3.bf16.msra.mxu1 %v2192_v59 }
 0x2bc   : > { %4900 = vmatprep.subr.bf16.mxu1 %v2193_v1 }
 0x2bd   : > { %4853 = vmatmul.mubr.msk.bf16.gmra.mrb[44].mxu1 %vm1362_vm0, %v1568_v27  ;;  %v1518_v27 = vadd.s32 56, %v6690_v51 }
 0x2bf   : > { %4901 = vmatpush3.bf16.msra.mxu1 %v2193_v1  ;;  %v6708_v1 = vsel %vm1530_vm2, 0.0, %v6051_v54  ;;  %vm1536_vm5 = vcmp.le.s32.totalorder %v6693_v53, %v1518_v27 }
 0x2c0   : > { %4902 = vmatprep.subr.bf16.mxu1 %v2194_v26 }
 0x2c3   : > { %4903 = vmatpush3.bf16.msra.mxu1 %v2194_v26  ;;  %v6712_v26 = vsel %vm1529_vm3, 0.0, %v6051_v54 }
 0x2cf   : > { %v1437_v60 = vpop.permute.xlu0 %1436 }
 0x2d0   : > { %1461 = vst.msk [vmem:[#allocation3 + $0x40] sm:$0xff] %vm1362_vm0, %v1437_v60 }
 0x2d7   : > { %v1439_v5 = vpop.permute.xlu1 %1438  ;;  %v1585_v61 = vld [vmem:[#allocation3 + $0x40] sm:$0xff] }
 0x2d8   : > { %1462 = vst.msk [vmem:[#allocation3 + $0x48] sm:$0xff] %vm1362_vm0, %v1439_v5  ;;  %5024 = vmatprep.subr.msk.bf16.mxu0 %vm1362_vm0, %v1585_v61  ;;  %v1763_v62 = vsel %vm1362_vm0, %v1585_v61, 0  ;;  %v1517_v61 = vadd.s32 48, %v6690_v51 }
 0x2d9   : > { %4857 = vmatpush3.bf16.xpose.msra.mxu0 %v1763_v62 }
 0x2da   : > { %vm1535_vm6 = vcmp.le.s32.totalorder %v6693_v53, %v1517_v61 }
 0x2df   : > { %v1441_v63 = vpop.permute.xlu1 %1440  ;;  %v1586_v6 = vld [vmem:[#allocation3 + $0x48] sm:$0xff] }
 0x2e0   : > { %1463 = vst.msk [vmem:[#allocation3 + $0x50] sm:$0xff] %vm1362_vm0, %v1441_v63  ;;  %5025 = vmatprep.subr.msk.bf16.mxu0 %vm1362_vm0, %v1586_v6  ;;  %v1766_v7 = vsel %vm1362_vm0, %v1586_v6, 0  ;;  %v1516_v6 = vadd.s32 40, %v6690_v51 }
 0x2e1   : > { %4859 = vmatpush3.bf16.xpose.msra.mxu0 %v1766_v7  ;;  %v6726_v7 = vsel %vm1532_vm4, 0.0, %v6051_v54 }
 0x2e2   : > { %vm1534_vm7 = vcmp.le.s32.totalorder %v6693_v53, %v1516_v6 }
 0x2e7   : > { %v1443_v34 = vpop.permute.xlu1 %1442  ;;  %v1587_v35 = vld [vmem:[#allocation3 + $0x50] sm:$0xff] }
 0x2e8   : > { %1464 = vst.msk [vmem:[#allocation3 + $0x58] sm:$0xff] %vm1362_vm0, %v1443_v34  ;;  %5026 = vmatprep.subr.msk.bf16.mxu0 %vm1362_vm0, %v1587_v35  ;;  %v1769_v42 = vsel %vm1362_vm0, %v1587_v35, 0  ;;  %v1515_v34 = vadd.s32 32, %v6690_v51 }
 0x2e9   : > { %4861 = vmatpush3.bf16.xpose.msra.mxu0 %v1769_v42  ;;  %v6733_v42 = vsel %vm1536_vm5, 0.0, %v6051_v54 }
 0x2ea   : > { %vm1533_vm8 = vcmp.le.s32.totalorder %v6693_v53, %v1515_v34 }
 0x2ef   : > { %v1445_v43 = vpop.permute.xlu0 %1444  ;;  %v1588_v41 = vld [vmem:[#allocation3 + $0x58] sm:$0xff] }
 0x2f0   : > { %1465 = vst.msk [vmem:[#allocation3 + $0x60] sm:$0xff] %vm1362_vm0, %v1445_v43  ;;  %5027 = vmatprep.subr.msk.bf16.mxu0 %vm1362_vm0, %v1588_v41  ;;  %v1772_v15 = vsel %vm1362_vm0, %v1588_v41, 0 }
 0x2f1   : > { %4863 = vmatpush3.bf16.xpose.msra.mxu0 %v1772_v15  ;;  %v1522_v15 = vadd.s32 88, %v6690_v51 }
 0x2f3   : > { %vm1540_vm9 = vcmp.le.s32.totalorder %v6693_v53, %v1522_v15 }
 0x2f7   : > { %v1447_v16 = vpop.permute.xlu1 %1446  ;;  %v1589_v4 = vld [vmem:[#allocation3 + $0x60] sm:$0xff] }
 0x2f8   : > { %1466 = vst.msk [vmem:[#allocation3 + $0x68] sm:$0xff] %vm1362_vm0, %v1447_v16  ;;  %5028 = vmatprep.subr.msk.bf16.mxu0 %vm1362_vm0, %v1589_v4  ;;  %v1775_v9 = vsel %vm1362_vm0, %v1589_v4, 0  ;;  %v6741_v16 = vsel %vm1535_vm6, 0.0, %v6051_v54 }
 0x2f9   : > { %4865 = vmatpush3.bf16.xpose.msra.mxu0 %v1775_v9 }
 0x2ff   : > { %v1449_v17 = vpop.permute.xlu0 %1448  ;;  %v1590_v0 = vld [vmem:[#allocation3 + $0x68] sm:$0xff] }
 0x300   : > { %1467 = vst.msk [vmem:[#allocation3 + $0x70] sm:$0xff] %vm1362_vm0, %v1449_v17  ;;  %5029 = vmatprep.subr.msk.bf16.mxu0 %vm1362_vm0, %v1590_v0  ;;  %v1778_v18 = vsel %vm1362_vm0, %v1590_v0, 0  ;;  %v1521_v0 = vadd.s32 80, %v6690_v51 }
 0x301   : > { %4867 = vmatpush3.bf16.xpose.msra.mxu0 %v1778_v18  ;;  %v6750_v18 = vsel %vm1534_vm7, 0.0, %v6051_v54 }
 0x302   : > { %vm1539_vm10 = vcmp.le.s32.totalorder %v6693_v53, %v1521_v0 }
 0x303   : > { %v1396_v12 = vpop.permute.xlu0 %1395 }
 0x304   : > { %1420 = vst.msk [vmem:[#allocation2 + $0x40] sm:$0xff] %vm1362_vm0, %v1396_v12 }
 0x307   : > { %v1400_v19 = vpop.permute.xlu0 %1399  ;;  %v1591_v22 = vld [vmem:[#allocation3 + $0x70] sm:$0xff] }
 0x308   : > { %v1451_v23 = vpop.permute.xlu1 %1450  ;;  %1422 = vst.msk [vmem:[#allocation2 + $0x50] sm:$0xff] %vm1362_vm0, %v1400_v19  ;;  %5030 = vmatprep.subr.msk.bf16.mxu0 %vm1362_vm0, %v1591_v22  ;;  %v1781_v24 = vsel %vm1362_vm0, %v1591_v22, 0  ;;  %v1520_v19 = vadd.s32 72, %v6690_v51  ;;  %v6759_v22 = vsel %vm1533_vm8, 0.0, %v6051_v54 }
 0x309   : > { %1468 = vst.msk [vmem:[#allocation3 + $0x78] sm:$0xff] %vm1362_vm0, %v1451_v23  ;;  %4869 = vmatpush3.bf16.xpose.msra.mxu0 %v1781_v24  ;;  %v1519_v24 = vadd.s32 64, %v6690_v51 }
 0x30a   : > { %vm1538_vm11 = vcmp.le.s32.totalorder %v6693_v53, %v1520_v19 }
 0x30b   : > { %v1404_v25 = vpop.permute.xlu0 %1403  ;;  %v1569_v40 = vld [vmem:[#allocation2 + $0x40] sm:$0xff]  ;;  %vm1537_vm12 = vcmp.le.s32.totalorder %v6693_v53, %v1519_v24 }
 0x30c   : > { %v1398_v28 = vpop.permute.xlu1 %1397  ;;  %1424 = vst.msk [vmem:[#allocation2 + $0x60] sm:$0xff] %vm1362_vm0, %v1404_v25  ;;  %4872 = vmatprep.mubr.msk.bf16.mxu0 %vm1362_vm0, %v1569_v40  ;;  %v6768_v40 = vsel %vm1540_vm9, 0.0, %v6051_v54 }
 0x30d   : > { %1421 = vst.msk [vmem:[#allocation2 + $0x48] sm:$0xff] %vm1362_vm0, %v1398_v28 }
 0x30f   : > { %v1408_v29 = vpop.permute.xlu0 %1407  ;;  %v1571_v13 = vld [vmem:[#allocation2 + $0x50] sm:$0xff] }
 0x310   : > { %v1402_v46 = vpop.permute.xlu1 %1401  ;;  %1426 = vst.msk [vmem:[#allocation2 + $0x70] sm:$0xff] %vm1362_vm0, %v1408_v29  ;;  %v1592_v30 = vld [vmem:[#allocation3 + $0x78] sm:$0xff] }
 0x311   : > { %1423 = vst.msk [vmem:[#allocation2 + $0x58] sm:$0xff] %vm1362_vm0, %v1402_v46  ;;  %5031 = vmatprep.subr.msk.bf16.mxu0 %vm1362_vm0, %v1592_v30  ;;  %v1784_v31 = vsel %vm1362_vm0, %v1592_v30, 0  ;;  %v1526_v46 = vadd.s32 120, %v6690_v51  ;;  %v1555_v30 = vsel %vm1539_vm10, 0.0, %v6051_v54 }
 0x312   : > { %4871 = vmatpush3.bf16.xpose.msra.mxu0 %v1784_v31 }
 0x313   : > { %v1478_v32 = vpop.permute.xlu0 %1477  ;;  %v1573_v44 = vld [vmem:[#allocation2 + $0x60] sm:$0xff]  ;;  %vm1544_vm13 = vcmp.le.s32.totalorder %v6693_v53, %v1526_v46 }
 0x314   : > { %v1406_v33 = vpop.permute.xlu1 %1405  ;;  %1502 = vst.msk [vmem:[#allocation4 + $0x40] sm:$0xff] %vm1362_vm0, %v1478_v32  ;;  %v1570_v50 = vld [vmem:[#allocation2 + $0x48] sm:$0xff] }
 0x315   : > { %1425 = vst.msk [vmem:[#allocation2 + $0x68] sm:$0xff] %vm1362_vm0, %v1406_v33 }
 0x317   : > { %v1484_v36 = vpop.permute.xlu0 %1483  ;;  %v1575_v48 = vld [vmem:[#allocation2 + $0x70] sm:$0xff] }
 0x318   : > { %v1410_v11 = vpop.permute.xlu1 %1409  ;;  %1505 = vst.msk [vmem:[#allocation4 + $0x58] sm:$0xff] %vm1362_vm0, %v1484_v36  ;;  %v1572_v39 = vld [vmem:[#allocation2 + $0x58] sm:$0xff]  ;;  %v1525_v36 = vadd.s32 112, %v6690_v51 }
 0x319   : > { %1427 = vst.msk [vmem:[#allocation2 + $0x78] sm:$0xff] %vm1362_vm0, %v1410_v11  ;;  %4873 = vmatmul.mubr.msk.bf16.vlgmr.msra.gmra.mrb[48].mxu0 %vm1362_vm0, %v1570_v50  ;;  %v6784_v11 = vsel %vm1538_vm11, 0.0, %v6051_v54 }
 0x31a   : > { %4876 = vmatprep.mubr.msk.bf16.mxu0 %vm1362_vm0, %v1571_v13  ;;  %v1524_v13 = vadd.s32 104, %v6690_v51  ;;  %vm1543_vm14 = vcmp.le.s32.totalorder %v6693_v53, %v1525_v36 }
 0x31b   : > { %v1482_v10 = vpop.permute.xlu0 %1481  ;;  %v6678_v37 = vld [vmem:[#allocation4 + $0x40] sm:$0xff] }
 0x31c   : > { %v1480_v38 = vpop.permute.xlu1 %1479  ;;  %1504 = vst.msk [vmem:[#allocation4 + $0x50] sm:$0xff] %vm1362_vm0, %v1482_v10  ;;  %4920 = vmatprep.subr.bf16.mxu1 %v6678_v37  ;;  %v1574_v47 = vld [vmem:[#allocation2 + $0x68] sm:$0xff]  ;;  %v1553_v10 = vsel %vm1537_vm12, 0.0, %v6051_v54  ;;  %vm1542_vm15 = vcmp.le.s32.totalorder %v6693_v53, %v1524_v13 }
 0x31d   : > { %1503 = vst.msk [vmem:[#allocation4 + $0x48] sm:$0xff] %vm1362_vm0, %v1480_v38 }
 0x320   : > { %v1488_v14 = vpop.permute.xlu1 %1487  ;;  %v1576_v8 = vld [vmem:[#allocation2 + $0x78] sm:$0xff] }
 0x321   : > { %1507 = vst.msk [vmem:[#allocation4 + $0x68] sm:$0xff] %vm1362_vm0, %v1488_v14  ;;  %4877 = vmatmul.mubr.msk.bf16.gmra.mrb[52].mxu0 %vm1362_vm0, %v1572_v39  ;;  %v1523_v14 = vadd.s32 96, %v6690_v51  ;;  %v1558_v51 = vsel %vm1542_vm15, 0.0, %v6051_v54 }
 0x322   : > { %4880 = vmatprep.mubr.msk.bf16.mxu0 %vm1362_vm0, %v1573_v44  ;;  %v1560_v44 = vsel %vm1544_vm13, 0.0, %v6051_v54 }
 0x323   : > { %vm1541_vm1 = vcmp.le.s32.totalorder %v6693_v53, %v1523_v14 }
 0x324   : > { %v1486_v45 = vpop.permute.xlu1 %1485  ;;  %v1557_v57 = vsel %vm1541_vm1, 0.0, %v6051_v54 }
 0x325   : > { %1506 = vst.msk [vmem:[#allocation4 + $0x60] sm:$0xff] %vm1362_vm0, %v1486_v45 }
 0x329   : > { %4881 = vmatmul.mubr.msk.bf16.gmra.mrb[56].mxu0 %vm1362_vm0, %v1574_v47 }
 0x32a   : > { %4884 = vmatprep.mubr.msk.bf16.mxu0 %vm1362_vm0, %v1575_v48  ;;  %v1559_v48 = vsel %vm1543_vm14, 0.0, %v6051_v54 }
 0x331   : > { %4885 = vmatmul.mubr.msk.bf16.gmra.mrb[60].mxu0 %vm1362_vm0, %v1576_v8 }
 0x378   : > { %v4842_v2 = vpop.f32.mrb[32].mxu1 }
 0x379   : > { %v6705_v58 = vadd.f32 %v4842_v2, %v6698_v56  ;;  %v1675_v59 = vpop.f32.mrb[33].mxu1 }
 0x37a   : > { %v4843_v60 = vpop.f32.mrb[34].mxu1  ;;  %v6721_v63 = vadd.f32 %v1675_v59, %v6712_v26 }
 0x37b   : > { %v1678_v5 = vpop.f32.mrb[35].mxu1  ;;  %1887 = vmax.xlane.f32.xlu0 %v6705_v58  ;;  %v6736_v43 = vadd.f32 %v4843_v60, %v6726_v7 }
 0x37c   : > { %v6718_v62 = vadd.f32 %v1678_v5, %v6708_v1 }
 0x37e   : > { %1885 = vmax.xlane.f32.xlu1 %v6718_v62 }
 0x37f   : > { %1883 = vmax.xlane.f32.xlu0 %v6721_v63 }
 0x380   : > { %v4846_v35 = vpop.f32.mrb[36].mxu1 }
 0x381   : > { %v1691_v41 = vpop.f32.mrb[37].mxu1  ;;  %v6753_v12 = vadd.f32 %v4846_v35, %v6741_v16 }
 0x382   : > { %v4847_v4 = vpop.f32.mrb[38].mxu1  ;;  %v6771_v28 = vadd.f32 %v1691_v41, %v6759_v22 }
 0x383   : > { %v6745_v9 = vadd.f32 %v4847_v4, %v6733_v42  ;;  %v1694_v17 = vpop.f32.mrb[39].mxu1  ;;  %1889 = vmax.xlane.f32.xlu0 %v6736_v43 }
 0x384   : > { %v6762_v23 = vadd.f32 %v1694_v17, %v6750_v18 }
 0x385   : > { %1897 = vmax.xlane.f32.xlu1 %v6745_v9 }
 0x387   : > { %1895 = vmax.xlane.f32.xlu0 %v6753_v12 }
 0x388   : > { %v4850_v25 = vpop.f32.mrb[40].mxu1 }
 0x389   : > { %v1707_v29 = vpop.f32.mrb[41].mxu1  ;;  %1893 = vmax.xlane.f32.xlu1 %v6762_v23  ;;  %v6786_v50 = vadd.f32 %v4850_v25, %v1555_v30 }
 0x38a   : > { %v4851_v31 = vpop.f32.mrb[42].mxu1  ;;  %v6799_v45 = vadd.f32 %v1707_v29, %v1553_v10 }
 0x38b   : > { %v6779_v32 = vadd.f32 %v4851_v31, %v6768_v40  ;;  %v1710_v33 = vpop.f32.mrb[43].mxu1  ;;  %1891 = vmax.xlane.f32.xlu0 %v6771_v28 }
 0x38c   : > { %v6793_v38 = vadd.f32 %v1710_v33, %v6784_v11 }
 0x38d   : > { %1905 = vmax.xlane.f32.xlu1 %v6779_v32 }
 0x38f   : > { %1903 = vmax.xlane.f32.xlu0 %v6786_v50 }
 0x390   : > { %v4854_v39 = vpop.f32.mrb[44].mxu1 }
 0x391   : > { %v1723_v47 = vpop.f32.mrb[45].mxu1  ;;  %1901 = vmax.xlane.f32.xlu1 %v6793_v38  ;;  %v6809_v20 = vadd.f32 %v4854_v39, %v1559_v48 }
 0x392   : > { %v4855_v8 = vpop.f32.mrb[46].mxu1  ;;  %v6816_v59 = vadd.f32 %v1723_v47, %v1557_v57 }
 0x393   : > { %v6805_v49 = vadd.f32 %v4855_v8, %v1560_v44  ;;  %v1726_v52 = vpop.f32.mrb[47].mxu1  ;;  %1899 = vmax.xlane.f32.xlu0 %v6799_v45 }
 0x394   : > { %v6813_v2 = vadd.f32 %v1726_v52, %v1558_v51 }
 0x395   : > { %1913 = vmax.xlane.f32.xlu1 %v6805_v49 }
 0x397   : > { %1911 = vmax.xlane.f32.xlu0 %v6809_v20 }
 0x399   : > { %1909 = vmax.xlane.f32.xlu1 %v6813_v2 }
 0x39b   : > { %1907 = vmax.xlane.f32.xlu0 %v6816_v59 }
 0x3ec   : > { %v4874_v53 = vpop.f32.mrb[48].mxu0 }
 0x3ed   : > { %v6821_v27 = vadd.f32 %v4874_v53, %v6698_v56  ;;  %v1820_v60 = vpop.f32.mrb[49].mxu0 }
 0x3ee   : > { %v4875_v5 = vpop.f32.mrb[50].mxu0  ;;  %v6828_v6 = vadd.f32 %v1820_v60, %v6712_v26 }
 0x3ef   : > { %v6824_v61 = vadd.f32 %v4875_v5, %v6726_v7  ;;  %1919 = vmax.xlane.f32.xlu0 %v6821_v27  ;;  %v1823_v54 = vpop.f32.mrb[51].mxu0 }
 0x3f0   : > { %v6832_v34 = vadd.f32 %v1823_v54, %v6708_v1 }
 0x3f1   : > { %1921 = vmax.xlane.f32.xlu1 %v6824_v61 }
 0x3f3   : > { %1915 = vmax.xlane.f32.xlu0 %v6828_v6 }
 0x3f4   : > { %v4878_v56 = vpop.f32.mrb[52].mxu0 }
 0x3f5   : > { %v6836_v35 = vadd.f32 %v4878_v56, %v6741_v16  ;;  %1917 = vmax.xlane.f32.xlu1 %v6832_v34  ;;  %v1836_v7 = vpop.f32.mrb[53].mxu0 }
 0x3f6   : > { %v4879_v41 = vpop.f32.mrb[54].mxu0  ;;  %v6844_v4 = vadd.f32 %v1836_v7, %v6759_v22 }
 0x3f7   : > { %v6840_v15 = vadd.f32 %v4879_v41, %v6733_v42  ;;  %1927 = vmax.xlane.f32.xlu0 %v6836_v35  ;;  %v1839_v26 = vpop.f32.mrb[55].mxu0 }
 0x3f8   : > { %v6848_v1 = vadd.f32 %v1839_v26, %v6750_v18 }
 0x3f9   : > { %1929 = vmax.xlane.f32.xlu1 %v6840_v15 }
 0x3fb   : > { %1923 = vmax.xlane.f32.xlu0 %v6844_v4 }
 0x3fc   : > { %v4882_v16 = vpop.f32.mrb[56].mxu0 }
 0x3fd   : > { %v6851_v17 = vadd.f32 %v4882_v16, %v1555_v30  ;;  %1925 = vmax.xlane.f32.xlu1 %v6848_v1  ;;  %v1852_v42 = vpop.f32.mrb[57].mxu0 }
 0x3fe   : > { %v4883_v0 = vpop.f32.mrb[58].mxu0  ;;  %v6858_v24 = vadd.f32 %v1852_v42, %v1553_v10 }
 0x3ff   : > { %v6855_v19 = vadd.f32 %v4883_v0, %v6768_v40  ;;  %1935 = vmax.xlane.f32.xlu0 %v6851_v17  ;;  %v1855_v22 = vpop.f32.mrb[59].mxu0 }
 0x400   : > { %v6862_v18 = vadd.f32 %v1855_v22, %v6784_v11 }
 0x401   : > { %1937 = vmax.xlane.f32.xlu1 %v6855_v19 }
 0x403   : > { %1931 = vmax.xlane.f32.xlu0 %v6858_v24 }
 0x404   : > { %v4886_v25 = vpop.f32.mrb[60].mxu0 }
 0x405   : > { %v6865_v29 = vadd.f32 %v4886_v25, %v1559_v48  ;;  %1933 = vmax.xlane.f32.xlu1 %v6862_v18  ;;  %v1868_v46 = vpop.f32.mrb[61].mxu0 }
 0x406   : > { %v4887_v40 = vpop.f32.mrb[62].mxu0  ;;  %v6871_v36 = vadd.f32 %v1868_v46, %v1557_v57 }
 0x407   : > { %v6868_v30 = vadd.f32 %v4887_v40, %v1560_v44  ;;  %1943 = vmax.xlane.f32.xlu0 %v6865_v29  ;;  %v1871_v31 = vpop.f32.mrb[63].mxu0 }
 0x408   : > { %v1888_v33 = vpop.xlane.xlu0 %1887  ;;  %v6875_v13 = vadd.f32 %v1871_v31, %v1558_v51 }
 0x409   : > { %1945 = vmax.xlane.f32.xlu1 %v6868_v30  ;;  %v1949_v11 = vsub.f32 %v6705_v58, %v1888_v33 }
 0x40b   : > { %v1983_v10 = vmul.f32 1.442695, %v1949_v11  ;;  %1939 = vmax.xlane.f32.xlu0 %v6871_v36  ;;  %v1886_v39 = vpop.xlane.xlu1 %1885 }
 0x40c   : > { %v1884_v14 = vpop.xlane.xlu0 %1883  ;;  %v1948_v48 = vsub.f32 %v6718_v62, %v1886_v39 }
 0x40d   : > { %5386 = vpow2.f32 %v1983_v10  ;;  %1941 = vmax.xlane.f32.xlu1 %v6875_v13  ;;  %v1947_v44 = vsub.f32 %v6721_v63, %v1884_v14 }
 0x40e   : > { %v1981_v57 = vmul.f32 1.442695, %v1948_v48 }
 0x40f   : > { %v1979_v47 = vmul.f32 1.442695, %v1947_v44 }
 0x410   : > { %v1890_v8 = vpop.xlane.xlu0 %1889 }
 0x411   : > { %5388 = vpow2.f32 %v1979_v47  ;;  %v1950_v52 = vsub.f32 %v6736_v43, %v1890_v8 }
 0x412   : > { %v1898_v58 = vpop.xlane.xlu1 %1897 }
 0x413   : > { %v1985_v51 = vmul.f32 1.442695, %v1950_v52  ;;  %v1954_v53 = vsub.f32 %v6745_v9, %v1898_v58 }
 0x414   : > { %v1896_v60 = vpop.xlane.xlu0 %1895 }
 0x415   : > { %5390 = vpow2.f32 %v1985_v51  ;;  %v1953_v5 = vsub.f32 %v6753_v12, %v1896_v60  ;;  %v1993_v7 = vmul.f32 1.442695, %v1954_v53 }
 0x416   : > { %v1894_v54 = vpop.xlane.xlu1 %1893  ;;  %5392 = vpow2.f32 %v1981_v57 }
 0x417   : > { %v6884_v56 = vpop.eup %5386  ;;  %v1991_v63 = vmul.f32 1.442695, %v1953_v5  ;;  %v1952_v62 = vsub.f32 %v6762_v23, %v1894_v54 }
 0x418   : > { %2047 = vadd.xlane.f32.xlu0 %v6884_v56  ;;  %v1892_v43 = vpop.xlane.xlu0 %1891 }
 0x419   : > { %5394 = vpow2.f32 %v1991_v63  ;;  %v1951_v41 = vsub.f32 %v6771_v28, %v1892_v43  ;;  %v1989_v12 = vmul.f32 1.442695, %v1952_v62 }
 0x41a   : > { %v1906_v26 = vpop.xlane.xlu1 %1905  ;;  %5396 = vpow2.f32 %v1993_v7 }
 0x41b   : > { %v6889_v9 = vpop.eup %5388  ;;  %v1987_v16 = vmul.f32 1.442695, %v1951_v41  ;;  %v1958_v42 = vsub.f32 %v6779_v32, %v1906_v26 }
 0x41c   : > { %2043 = vadd.xlane.f32.xlu0 %v6889_v9  ;;  %v1904_v0 = vpop.xlane.xlu0 %1903 }
 0x41d   : > { %5398 = vpow2.f32 %v1987_v16  ;;  %v1957_v23 = vsub.f32 %v6786_v50, %v1904_v0  ;;  %v2001_v28 = vmul.f32 1.442695, %v1958_v42 }
 0x41e   : > { %v1902_v22 = vpop.xlane.xlu1 %1901  ;;  %5400 = vpow2.f32 %v1989_v12 }
 0x41f   : > { %v6894_v25 = vpop.eup %5390  ;;  %v1999_v46 = vmul.f32 1.442695, %v1957_v23  ;;  %v1956_v31 = vsub.f32 %v6793_v38, %v1902_v22 }
 0x420   : > { %2049 = vadd.xlane.f32.xlu1 %v6894_v25  ;;  %v1900_v40 = vpop.xlane.xlu0 %1899  ;;  %v6899_v33 = vpop.eup %5392 }
 0x421   : > { %5402 = vpow2.f32 %v1999_v46  ;;  %v1955_v32 = vsub.f32 %v6799_v45, %v1900_v40  ;;  %v1997_v14 = vmul.f32 1.442695, %v1956_v31 }
 0x422   : > { %5404 = vpow2.f32 %v2001_v28  ;;  %v1914_v45 = vpop.xlane.xlu1 %1913 }
 0x423   : > { %v6901_v11 = vpop.eup %5394  ;;  %v1995_v10 = vmul.f32 1.442695, %v1955_v32 }
 0x424   : > { %2045 = vadd.xlane.f32.xlu1 %v6899_v33  ;;  %2055 = vadd.xlane.f32.xlu0 %v6901_v11  ;;  %v1912_v50 = vpop.xlane.xlu0 %1911  ;;  %v6906_v44 = vpop.eup %5396 }
 0x425   : > { %5406 = vpow2.f32 %v1995_v10  ;;  %v1961_v39 = vsub.f32 %v6809_v20, %v1912_v50  ;;  %v1962_v20 = vsub.f32 %v6805_v49, %v1914_v45 }
 0x426   : > { %5408 = vpow2.f32 %v1997_v14  ;;  %v1910_v53 = vpop.xlane.xlu1 %1909 }
 0x427   : > { %v6908_v38 = vpop.eup %5398  ;;  %v2007_v48 = vmul.f32 1.442695, %v1961_v39  ;;  %v1960_v5 = vsub.f32 %v6813_v2, %v1910_v53 }
 0x428   : > { %2057 = vadd.xlane.f32.xlu1 %v6906_v44  ;;  %2051 = vadd.xlane.f32.xlu0 %v6908_v38  ;;  %v1908_v47 = vpop.xlane.xlu0 %1907  ;;  %v6913_v52 = vpop.eup %5400 }
 0x429   : > { %v1959_v8 = vsub.f32 %v6816_v59, %v1908_v47  ;;  %5410 = vpow2.f32 %v2007_v48  ;;  %v2009_v59 = vmul.f32 1.442695, %v1962_v20  ;;  %v2005_v49 = vmul.f32 1.442695, %v1960_v5 }
 0x42b   : > { %v6915_v58 = vpop.eup %5402  ;;  %v2003_v51 = vmul.f32 1.442695, %v1959_v8 }
 0x42c   : > { %2053 = vadd.xlane.f32.xlu1 %v6913_v52  ;;  %2063 = vadd.xlane.f32.xlu0 %v6915_v58  ;;  %v6920_v57 = vpop.eup %5404 }
 0x42d   : > { %5412 = vpow2.f32 %v2003_v51 }
 0x42e   : > { %5414 = vpow2.f32 %v2009_v59 }
 0x42f   : > { %v6922_v60 = vpop.eup %5406  ;;  %5416 = vpow2.f32 %v2005_v49 }
 0x430   : > { %2065 = vadd.xlane.f32.xlu1 %v6920_v57  ;;  %2059 = vadd.xlane.f32.xlu0 %v6922_v60  ;;  %v6927_v54 = vpop.eup %5408 }
 0x433   : > { %v6930_v63 = vpop.eup %5410 }
 0x434   : > { %2061 = vadd.xlane.f32.xlu1 %v6927_v54 }
 0x437   : > { %v6933_v7 = vpop.eup %5412 }
 0x438   : > { %2071 = vadd.xlane.f32.xlu1 %v6930_v63  ;;  %v6936_v62 = vpop.eup %5414 }
 0x439   : > { %v6939_v2 = vpop.eup %5416 }
 0x43c   : > { %2067 = vadd.xlane.f32.xlu1 %v6933_v7 }
 0x440   : > { %2073 = vadd.xlane.f32.xlu1 %v6936_v62 }
 0x444   : > { %2069 = vadd.xlane.f32.xlu1 %v6939_v2 }
 0x47c   : > { %v1920_v43 = vpop.xlane.xlu0 %1919 }
 0x47d   : > { %v1965_v41 = vsub.f32 %v6821_v27, %v1920_v43 }
 0x47e   : > { %v1922_v26 = vpop.xlane.xlu1 %1921 }
 0x47f   : > { %v2015_v16 = vmul.f32 1.442695, %v1965_v41  ;;  %v1966_v42 = vsub.f32 %v6824_v61, %v1922_v26 }
 0x480   : > { %v1916_v12 = vpop.xlane.xlu0 %1915 }
 0x481   : > { %5418 = vpow2.f32 %v2015_v16  ;;  %v1963_v0 = vsub.f32 %v6828_v6, %v1916_v12  ;;  %v2017_v40 = vmul.f32 1.442695, %v1966_v42 }
 0x482   : > { %v1918_v23 = vpop.xlane.xlu1 %1917 }
 0x483   : > { %v2011_v22 = vmul.f32 1.442695, %v1963_v0  ;;  %v1964_v46 = vsub.f32 %v6832_v34, %v1918_v23 }
 0x484   : > { %v1928_v28 = vpop.xlane.xlu0 %1927 }
 0x485   : > { %5420 = vpow2.f32 %v2011_v22  ;;  %v2013_v31 = vmul.f32 1.442695, %v1964_v46  ;;  %v1969_v16 = vsub.f32 %v6836_v35, %v1928_v28 }
 0x486   : > { %v6949_v50 = vpop.xlane.xlu1 %1929 }
 0x487   : > { %5422 = vpow2.f32 %v2013_v31 }
 0x488   : > { %v1924_v32 = vpop.xlane.xlu0 %1923  ;;  %5424 = vpow2.f32 %v2017_v40 }
 0x489   : > { %v1967_v27 = vsub.f32 %v6844_v4, %v1924_v32 }
 0x48a   : > { %v1926_v14 = vpop.xlane.xlu1 %1925 }
 0x48b   : > { %v6947_v10 = vpop.eup %5418  ;;  %v2019_v61 = vmul.f32 1.442695, %v1967_v27  ;;  %v1968_v12 = vsub.f32 %v6848_v1, %v1926_v14 }
 0x48c   : > { %2079 = vadd.xlane.f32.xlu0 %v6947_v10  ;;  %v6957_v39 = vpop.xlane.xlu0 %1935 }
 0x48d   : > { %5426 = vpow2.f32 %v2019_v61  ;;  %v2021_v22 = vmul.f32 1.442695, %v1968_v12 }
 0x48e   : > { %v6965_v47 = vpop.xlane.xlu1 %1937 }
 0x48f   : > { %v6952_v6 = vpop.eup %5420 }
 0x490   : > { %2075 = vadd.xlane.f32.xlu0 %v6952_v6  ;;  %v6967_v48 = vpop.xlane.xlu0 %1931 }
 0x491   : > { %v6955_v34 = vpop.eup %5422  ;;  %v1971_v12 = vsub.f32 %v6858_v24, %v6967_v48 }
 0x492   : > { %2077 = vadd.xlane.f32.xlu1 %v6955_v34  ;;  %v6960_v4 = vpop.eup %5424  ;;  %v6970_v8 = vpop.xlane.xlu1 %1933 }
 0x494   : > { %2081 = vadd.xlane.f32.xlu0 %v6960_v4  ;;  %v6972_v20 = vpop.xlane.xlu0 %1943 }
 0x496   : > { %v6974_v51 = vpop.xlane.xlu1 %1945 }
 0x497   : > { %v6963_v45 = vpop.eup %5426 }
 0x498   : > { %2083 = vadd.xlane.f32.xlu1 %v6963_v45  ;;  %v1940_v53 = vpop.xlane.xlu0 %1939 }
 0x499   : > { %v1975_v23 = vsub.f32 %v6871_v36, %v1940_v53  ;;  %v1970_v53 = vsub.f32 %v6840_v15, %v6949_v50  ;;  %v2196_v15 = vld [vmem:[#allocation4 + $0x48] sm:$0xff] }
 0x49a   : > { %v6976_v5 = vpop.xlane.xlu1 %1941 }
 0x49b   : > { %v2035_v32 = vmul.f32 1.442695, %v1975_v23 }
 0x4a5   : > { %v2048_v59 = vpop.xlane.xlu0 %2047 }
 0x4a9   : > { %1491 = vrot.lane.b32.xlu1 %v6628_v21, %s6050_s24  ;;  %v2044_v49 = vpop.xlane.xlu0 %2043  ;;  %v2023_v21 = vmul.f32 1.442695, %v1969_v16  ;;  %v2025_v16 = vmul.f32 1.442695, %v1970_v53 }
 0x4aa   : > { %1489 = vrot.lane.b32.xlu0 %v6631_v55, %s6050_s24 }
 0x4ad   : > { %v2050_v43 = vpop.xlane.xlu1 %2049 }
 0x4ae   : > { %5428 = vrcp.f32 %v2050_v43 }
 0x4af   : > { %5430 = vrcp.f32 %v2044_v49 }
 0x4b0   : > { %5432 = vrcp.f32 %v2048_v59 }
 0x4b1   : > { %v2046_v41 = vpop.xlane.xlu1 %2045  ;;  %v2056_v26 = vpop.xlane.xlu0 %2055 }
 0x4b2   : > { %5434 = vrcp.f32 %v2046_v41 }
 0x4b5   : > { %v2058_v42 = vpop.xlane.xlu1 %2057  ;;  %v2052_v0 = vpop.xlane.xlu0 %2051 }
 0x4b6   : > { %5436 = vrcp.f32 %v2058_v42 }
 0x4b7   : > { %5438 = vrcp.f32 %v2052_v0 }
 0x4b8   : > { %v5429_v55 = vpop.eup %5428  ;;  %5440 = vrcp.f32 %v2056_v26 }
 0x4b9   : > { %v2054_v46 = vpop.xlane.xlu1 %2053  ;;  %v2064_v40 = vpop.xlane.xlu0 %2063  ;;  %v2142_v35 = vmul.f32 %v5429_v55, %v6894_v25 }
 0x4ba   : > { %v5431_v31 = vpop.eup %5430  ;;  %5442 = vrcp.f32 %v2054_v46 }
 0x4bb   : > { %v5433_v27 = vpop.eup %5432  ;;  %5444 = vpow2.f32 %v2023_v21  ;;  %v2139_v36 = vmul.f32 %v5431_v31, %v6889_v9  ;;  %v1973_v9 = vsub.f32 %v6851_v17, %v6957_v39 }
 0x4bc   : > { %v5435_v61 = vpop.eup %5434  ;;  %5446 = vpow2.f32 %v2021_v22  ;;  %v2141_v59 = vmul.f32 %v5433_v27, %v6884_v56 }
 0x4bd   : > { %v2066_v1 = vpop.xlane.xlu1 %2065  ;;  %v2060_v28 = vpop.xlane.xlu0 %2059  ;;  %v2140_v14 = vmul.f32 %v5435_v61, %v6899_v33  ;;  %5448 = vpow2.f32 %v2035_v32  ;;  %v2031_v17 = vmul.f32 1.442695, %v1973_v9 }
 0x4be   : > { %5450 = vrcp.f32 %v2066_v1  ;;  %v2172_v43 = vpack.c.bf16 %v2142_v35, %v2141_v59  ;;  %v1974_v1 = vsub.f32 %v6855_v19, %v6965_v47  ;;  %v1977_v19 = vsub.f32 %v6865_v29, %v6972_v20 }
 0x4bf   : > { %v2171_v49 = vpack.c.bf16 %v2140_v14, %v2139_v36  ;;  %5452 = vrcp.f32 %v2060_v28  ;;  %v2199_v36 = vld [vmem:[#allocation4 + $0x60] sm:$0xff] }
 0x4c0   : > { %v5437_v41 = vpop.eup %5436  ;;  %5454 = vrcp.f32 %v2064_v40  ;;  %v2039_v59 = vmul.f32 1.442695, %v1977_v19 }
 0x4c1   : > { %v2062_v25 = vpop.xlane.xlu1 %2061  ;;  %4904 = vmatprep.mubr.bf16.mxu1 %v2171_v49  ;;  %v5439_v26 = vpop.eup %5438  ;;  %v2146_v50 = vmul.f32 %v5437_v41, %v6906_v44  ;;  %v2197_v44 = vld [vmem:[#allocation4 + $0x50] sm:$0xff]  ;;  %v1976_v49 = vsub.f32 %v6875_v13, %v6976_v5 }
 0x4c2   : > { %5456 = vrcp.f32 %v2062_v25  ;;  %4905 = vmatmul.mubr.bf16.vlgmr.msra.gmra.mrb[48].mxu1 %v2172_v43  ;;  %v5441_v33 = vpop.eup %5440  ;;  %v2143_v0 = vmul.f32 %v5439_v26, %v6908_v38  ;;  %v1978_v25 = vsub.f32 %v6868_v30, %v6974_v51 }
 0x4c3   : > { %4921 = vmatpush3.bf16.msra.mxu1 %v6678_v37  ;;  %5458 = vpow2.f32 %v2025_v16  ;;  %v1972_v37 = vsub.f32 %v6862_v18, %v6970_v8  ;;  %v2145_v39 = vmul.f32 %v5441_v33, %v6901_v11  ;;  %v2198_v8 = vld [vmem:[#allocation4 + $0x58] sm:$0xff]  ;;  %v2037_v26 = vmul.f32 1.442695, %v1976_v49 }
 0x4c4   : > { %v5443_v56 = vpop.eup %5442  ;;  %4922 = vmatprep.subr.bf16.mxu1 %v2196_v15  ;;  %5460 = vpow2.f32 %v2031_v17 }
 0x4c5   : > { %v2072_v42 = vpop.xlane.xlu1 %2071  ;;  %v2144_v23 = vmul.f32 %v5443_v56, %v6913_v52  ;;  %v6999_v21 = vpop.eup %5444  ;;  %v2174_v38 = vpack.c.bf16 %v2146_v50, %v2145_v39  ;;  %v2027_v52 = vmul.f32 1.442695, %v1971_v12  ;;  %v2029_v18 = vmul.f32 1.442695, %v1972_v37 }
 0x4c6   : > { %v7004_v55 = vpop.eup %5446 }
 0x4c7   : > { %4923 = vmatpush3.bf16.msra.mxu1 %v2196_v15  ;;  %v2173_v22 = vpack.c.bf16 %v2144_v23, %v2143_v0  ;;  %v7006_v24 = vpop.eup %5448  ;;  %5462 = vpow2.f32 %v2027_v52  ;;  %v2041_v15 = vmul.f32 1.442695, %v1978_v25 }
 0x4c8   : > { %4924 = vmatprep.subr.bf16.mxu1 %v2197_v44  ;;  %v5451_v48 = vpop.eup %5450  ;;  %5464 = vpow2.f32 %v2029_v18 }
 0x4c9   : > { %2087 = vadd.xlane.f32.xlu0 %v6999_v21  ;;  %v2068_v46 = vpop.xlane.xlu1 %2067  ;;  %4908 = vmatprep.mubr.bf16.mxu1 %v2173_v22  ;;  %v5453_v40 = vpop.eup %5452  ;;  %v2150_v32 = vmul.f32 %v5451_v48, %v6920_v57 }
 0x4ca   : > { %4909 = vmatmul.mubr.bf16.gmra.mrb[52].mxu1 %v2174_v38  ;;  %v5455_v11 = vpop.eup %5454  ;;  %v2147_v61 = vmul.f32 %v5453_v40, %v6922_v60 }
 0x4cb   : > { %4925 = vmatpush3.bf16.msra.mxu1 %v2197_v44  ;;  %v2149_v28 = vmul.f32 %v5455_v11, %v6915_v58  ;;  %v2200_v58 = vld [vmem:[#allocation4 + $0x68] sm:$0xff] }
 0x4cc   : > { %v5457_v31 = vpop.eup %5456  ;;  %4926 = vmatprep.subr.bf16.mxu1 %v2198_v8 }
 0x4cd   : > { %2085 = vadd.xlane.f32.xlu0 %v7004_v55  ;;  %2099 = vadd.xlane.f32.xlu1 %v7006_v24  ;;  %v2074_v27 = vpop.xlane.xlu1 %2073  ;;  %v2148_v35 = vmul.f32 %v5457_v31, %v6927_v54  ;;  %v7017_v14 = vpop.eup %5458  ;;  %v2176_v53 = vpack.c.bf16 %v2150_v32, %v2149_v28  ;;  %v2033_v54 = vmul.f32 1.442695, %v1974_v1 }
 0x4ce   : > { %5466 = vrcp.f32 %v2074_v27  ;;  %v7022_v47 = vpop.eup %5460 }
 0x4cf   : > { %4927 = vmatpush3.bf16.msra.mxu1 %v2198_v8  ;;  %v2175_v57 = vpack.c.bf16 %v2148_v35, %v2147_v61  ;;  %5468 = vrcp.f32 %v2068_v46 }
 0x4d0   : > { %4928 = vmatprep.subr.bf16.mxu1 %v2199_v36  ;;  %5470 = vrcp.f32 %v2072_v42 }
 0x4d1   : > { %2089 = vadd.xlane.f32.xlu0 %v7017_v14  ;;  %v2070_v60 = vpop.xlane.xlu1 %2069  ;;  %4912 = vmatprep.mubr.bf16.mxu1 %v2175_v57  ;;  %v7027_v43 = vpop.eup %5462 }
 0x4d2   : > { %5472 = vrcp.f32 %v2070_v60  ;;  %4913 = vmatmul.mubr.bf16.gmra.mrb[56].mxu1 %v2176_v53  ;;  %v7029_v41 = vpop.eup %5464 }
 0x4d3   : > { %4929 = vmatpush3.bf16.msra.mxu1 %v2199_v36  ;;  %5474 = vpow2.f32 %v2033_v54 }
 0x4d4   : > { %4930 = vmatprep.subr.bf16.mxu1 %v2200_v58  ;;  %5476 = vpow2.f32 %v2039_v59 }
 0x4d5   : > { %2095 = vadd.xlane.f32.xlu0 %v7022_v47  ;;  %5478 = vpow2.f32 %v2037_v26 }
 0x4d6   : > { %5480 = vpow2.f32 %v2041_v15 }
 0x4d7   : > { %4931 = vmatpush3.bf16.msra.mxu1 %v2200_v58 }
 0x4d8   : > { %v5467_v29 = vpop.eup %5466 }
 0x4d9   : > { %2091 = vadd.xlane.f32.xlu0 %v7027_v43  ;;  %v5469_v20 = vpop.eup %5468  ;;  %v2154_v33 = vmul.f32 %v5467_v29, %v6936_v62 }
 0x4da   : > { %v5471_v16 = vpop.eup %5470  ;;  %v2151_v13 = vmul.f32 %v5469_v20, %v6933_v7 }
 0x4db   : > { %v2153_v56 = vmul.f32 %v5471_v16, %v6930_v63 }
 0x4dc   : > { %v5473_v9 = vpop.eup %5472 }
 0x4dd   : > { %2093 = vadd.xlane.f32.xlu0 %v7029_v41  ;;  %v2152_v5 = vmul.f32 %v5473_v9, %v6939_v2  ;;  %v7039_v12 = vpop.eup %5474  ;;  %v2178_v42 = vpack.c.bf16 %v2154_v33, %v2153_v56 }
 0x4de   : > { %v7042_v30 = vpop.eup %5476 }
 0x4df   : > { %v2177_v50 = vpack.c.bf16 %v2152_v5, %v2151_v13  ;;  %v7045_v7 = vpop.eup %5478 }
 0x4e0   : > { %v7048_v62 = vpop.eup %5480 }
 0x4e1   : > { %2097 = vadd.xlane.f32.xlu0 %v7039_v12  ;;  %4916 = vmatprep.mubr.bf16.mxu1 %v2177_v50 }
 0x4e2   : > { %4917 = vmatmul.mubr.bf16.gmra.mrb[60].mxu1 %v2178_v42 }
 0x4e5   : > { %2103 = vadd.xlane.f32.xlu0 %v7042_v30 }
 0x4e9   : > { %2101 = vadd.xlane.f32.xlu0 %v7045_v7 }
 0x4ed   : > { %2105 = vadd.xlane.f32.xlu0 %v7048_v62 }
 0x519   : > { %v2080_v63 = vpop.xlane.xlu0 %2079 }
 0x51d   : > { %v2076_v2 = vpop.xlane.xlu0 %2075 }
 0x51e   : > { %5482 = vrcp.f32 %v2076_v2 }
 0x51f   : > { %v2078_v51 = vpop.xlane.xlu1 %2077 }
 0x520   : > { %5484 = vrcp.f32 %v2078_v51 }
 0x521   : > { %v2082_v0 = vpop.xlane.xlu0 %2081 }
 0x522   : > { %5486 = vrcp.f32 %v2082_v0 }
 0x523   : > { %5488 = vrcp.f32 %v2080_v63 }
 0x525   : > { %v2084_v23 = vpop.xlane.xlu1 %2083  ;;  %v1490_v17 = vpop.permute.xlu0 %1489 }
 0x526   : > { %1508 = vst.msk [vmem:[#allocation4 + $0x70] sm:$0xff] %vm1362_vm0, %v1490_v17  ;;  %5490 = vrcp.f32 %v2084_v23 }
 0x528   : > { %v5483_v37 = vpop.eup %5482 }
 0x529   : > { %v1492_v39 = vpop.permute.xlu1 %1491  ;;  %v2155_v22 = vmul.f32 %v5483_v37, %v6952_v6 }
 0x52a   : > { %v5485_v44 = vpop.eup %5484  ;;  %1509 = vst.msk [vmem:[#allocation4 + $0x78] sm:$0xff] %vm1362_vm0, %v1492_v39 }
 0x52b   : > { %v2156_v38 = vmul.f32 %v5485_v44, %v6955_v34 }
 0x52c   : > { %v5487_v48 = vpop.eup %5486 }
 0x52d   : > { %v2201_v52 = vld [vmem:[#allocation4 + $0x70] sm:$0xff]  ;;  %v2179_v46 = vpack.c.bf16 %v2156_v38, %v2155_v22  ;;  %v5489_v40 = vpop.eup %5488  ;;  %v2158_v18 = vmul.f32 %v5487_v48, %v6960_v4 }
 0x52e   : > { %4932 = vmatprep.subr.bf16.mxu1 %v2201_v52  ;;  %v2157_v8 = vmul.f32 %v5489_v40, %v6947_v10  ;;  %v5251_v40 = vld [vmem:[#allocation10 + $0x8] sm:$0xff]  }
 0x52f   : > { %4933 = vmatpush3.bf16.msra.mxu1 %v2201_v52  ;;  %4936 = vmatprep.mubr.bf16.mxu1 %v2179_v46  ;;  %v5250_v46 = vld [vmem:[#allocation10] sm:$0xff]  }
 0x530   : > { %v2180_v31 = vpack.c.bf16 %v2158_v18, %v2157_v8  ;;  %v5491_v61 = vpop.eup %5490  ;;  %4952 = vmatprep.subr.bf16.mxu0 %v5250_v46  ;;  %v5252_v18 = vld [vmem:[#allocation10 + $0x10] sm:$0xff]   ;;  %v5254_v8 = vld [vmem:[#allocation10 + $0x20] sm:$0xff]  }
 0x531   : > { %v2202_v11 = vld [vmem:[#allocation4 + $0x78] sm:$0xff]  ;;  %v2159_v4 = vmul.f32 %v5491_v61, %v6963_v45  ;;  %4953 = vmatpush3.bf16.msra.mxu0 %v5250_v46 }
 0x532   : > { %4934 = vmatprep.subr.bf16.mxu1 %v2202_v11  ;;  %4954 = vmatprep.subr.bf16.mxu0 %v5251_v40 }
 0x533   : > { %4935 = vmatpush3.bf16.msra.mxu1 %v2202_v11  ;;  %v5253_v11 = vld [vmem:[#allocation10 + $0x18] sm:$0xff]  }
 0x535   : > { %4955 = vmatpush3.bf16.msra.mxu0 %v5251_v40 }
 0x536   : > { %4937 = vmatmul.mubr.bf16.vlgmr.msra.gmra.mrb[64].mxu1 %v2180_v31  ;;  %4956 = vmatprep.subr.bf16.mxu0 %v5252_v18  ;;  %v5255_v31 = vld [vmem:[#allocation10 + $0x28] sm:$0xff]  }
 0x539   : > { %4957 = vmatpush3.bf16.msra.mxu0 %v5252_v18 }
 0x53a   : > { %4958 = vmatprep.subr.bf16.mxu0 %v5253_v11 }
 0x53d   : > { %4959 = vmatpush3.bf16.msra.mxu0 %v5253_v11 }
 0x53e   : > { %4960 = vmatprep.subr.bf16.mxu0 %v5254_v8 }
 0x541   : > { %4961 = vmatpush3.bf16.msra.mxu0 %v5254_v8 }
 0x542   : > { %4962 = vmatprep.subr.bf16.mxu0 %v5255_v31 }
 0x545   : > { %4963 = vmatpush3.bf16.msra.mxu0 %v5255_v31 }
 0x556   : > { %v2088_v32 = vpop.xlane.xlu0 %2087 }
 0x55a   : > { %v2086_v6 = vpop.xlane.xlu0 %2085  ;;  %v2100_v59 = vpop.xlane.xlu1 %2099 }
 0x55b   : > { %5492 = vrcp.f32 %v2086_v6  ;;  %v5257_v6 = vld [vmem:[#allocation10 + $0x38] sm:$0xff]  }
 0x55c   : > { %5494 = vrcp.f32 %v2088_v32  ;;  %v5256_v32 = vld [vmem:[#allocation10 + $0x30] sm:$0xff]  }
 0x55d   : > { %4964 = vmatprep.subr.bf16.mxu0 %v5256_v32 }
 0x55e   : > { %v2090_v34 = vpop.xlane.xlu0 %2089  ;;  %4965 = vmatpush3.bf16.msra.mxu0 %v5256_v32 }
 0x55f   : > { %5496 = vrcp.f32 %v2090_v34  ;;  %4966 = vmatprep.subr.bf16.mxu0 %v5257_v6 }
 0x562   : > { %v2096_v27 = vpop.xlane.xlu0 %2095  ;;  %4967 = vmatpush3.bf16.msra.mxu0 %v5257_v6 }
 0x565   : > { %v5493_v35 = vpop.eup %5492 }
 0x566   : > { %v2092_v1 = vpop.xlane.xlu0 %2091  ;;  %v5495_v28 = vpop.eup %5494  ;;  %v2160_v10 = vmul.f32 %v5493_v35, %v7004_v55 }
 0x567   : > { %5498 = vrcp.f32 %v2092_v1  ;;  %v2161_v60 = vmul.f32 %v5495_v28, %v6999_v21 }
 0x568   : > { %v2181_v57 = vpack.c.bf16 %v2160_v10, %v2159_v4 }
 0x569   : > { %v5497_v36 = vpop.eup %5496 }
 0x56a   : > { %v2094_v53 = vpop.xlane.xlu0 %2093  ;;  %v2162_v54 = vmul.f32 %v5497_v36, %v7017_v14  ;;  %4940 = vmatprep.mubr.bf16.mxu1 %v2181_v57 }
 0x56b   : > { %5500 = vrcp.f32 %v2094_v53 }
 0x56c   : > { %v2182_v19 = vpack.c.bf16 %v2162_v54, %v2161_v60  ;;  %5502 = vrcp.f32 %v2096_v27 }
 0x56e   : > { %4941 = vmatmul.mubr.bf16.gmra.mrb[68].mxu1 %v2182_v19  ;;  %v2098_v58 = vpop.xlane.xlu0 %2097 }
 0x56f   : > { %5504 = vrcp.f32 %v2098_v58 }
 0x570   : > { %5506 = vrcp.f32 %v2100_v59 }
 0x571   : > { %v5499_v45 = vpop.eup %5498 }
 0x572   : > { %v2104_v49 = vpop.xlane.xlu0 %2103  ;;  %v2163_v20 = vmul.f32 %v5499_v45, %v7027_v43 }
 0x575   : > { %v5501_v29 = vpop.eup %5500 }
 0x576   : > { %v2102_v55 = vpop.xlane.xlu0 %2101  ;;  %v2164_v25 = vmul.f32 %v5501_v29, %v7029_v41  ;;  %v5503_v21 = vpop.eup %5502 }
 0x577   : > { %5508 = vrcp.f32 %v2102_v55  ;;  %v2165_v9 = vmul.f32 %v5503_v21, %v7022_v47 }
 0x578   : > { %v2183_v14 = vpack.c.bf16 %v2164_v25, %v2163_v20  ;;  %5510 = vrcp.f32 %v2104_v49 }
 0x579   : > { %v5505_v26 = vpop.eup %5504 }
 0x57a   : > { %4944 = vmatprep.mubr.bf16.mxu1 %v2183_v14  ;;  %v2106_v16 = vpop.xlane.xlu0 %2105  ;;  %v2166_v33 = vmul.f32 %v5505_v26, %v7039_v12  ;;  %v5507_v5 = vpop.eup %5506 }
 0x57b   : > { %5512 = vrcp.f32 %v2106_v16  ;;  %v2167_v43 = vmul.f32 %v5507_v5, %v7006_v24 }
 0x57c   : > { %v2184_v13 = vpack.c.bf16 %v2166_v33, %v2165_v9 }
 0x57e   : > { %4945 = vmatmul.mubr.bf16.gmra.mrb[72].mxu1 %v2184_v13 }
 0x581   : > { %v5509_v15 = vpop.eup %5508 }
 0x582   : > { %v2168_v41 = vmul.f32 %v5509_v15, %v7045_v7  ;;  %v5511_v56 = vpop.eup %5510 }
 0x583   : > { %v2169_v63 = vmul.f32 %v5511_v56, %v7042_v30 }
 0x584   : > { %v2185_v50 = vpack.c.bf16 %v2168_v41, %v2167_v43 }
 0x585   : > { %v5513_v42 = vpop.eup %5512 }
 0x586   : > { %4948 = vmatprep.mubr.bf16.mxu1 %v2185_v50  ;;  %v2170_v2 = vmul.f32 %v5513_v42, %v7048_v62 }
 0x588   : > { %v2186_v47 = vpack.c.bf16 %v2170_v2, %v2169_v63 }
 0x58a   : > { %4949 = vmatmul.mubr.bf16.gmra.mrb[76].mxu1 %v2186_v47 }
 0x58b   : > { %3125 = vmatprep.mubr.bf16.mxu1 %v6049_v3 }
 0x595   : > { %v7070_v12 = vpop.f32.mrb[48].mxu1 }
 0x596   : > { %v7072_v51 = vpop.f32.mrb[49].mxu1 }
 0x597   : > { %v7074_v0 = vpop.f32.mrb[50].mxu1 }
 0x598   : > { %v7076_v24 = vpop.f32.mrb[51].mxu1 }
 0x59d   : > { %v7078_v7 = vpop.f32.mrb[52].mxu1 }
 0x59e   : > { %v7080_v23 = vpop.f32.mrb[53].mxu1 }
 0x59f   : > { %v7082_v17 = vpop.f32.mrb[54].mxu1 }
 0x5a0   : > { %v7084_v30 = vpop.f32.mrb[55].mxu1 }
 0x5a5   : > { %v7086_v62 = vpop.f32.mrb[56].mxu1 }
 0x5a6   : > { %v7088_v37 = vpop.f32.mrb[57].mxu1 }
 0x5a7   : > { %v7090_v39 = vpop.f32.mrb[58].mxu1 }
 0x5a8   : > { %v7092_v44 = vpop.f32.mrb[59].mxu1 }
 0x5b5   : > { %v7094_v22 = vpop.f32.mrb[60].mxu1 }
 0x5b6   : > { %v7096_v38 = vpop.f32.mrb[61].mxu1 }
 0x5b7   : > { %v7098_v48 = vpop.f32.mrb[62].mxu1 }
 0x5b8   : > { %v7100_v52 = vpop.f32.mrb[63].mxu1 }
 0x609   : > { %v4938_v34 = vpop.f32.mrb[64].mxu1 }
 0x60a   : > { %v2334_v27 = vpop.f32.mrb[65].mxu1 }
 0x60b   : > { %v4939_v61 = vpop.f32.mrb[66].mxu1 }
 0x60c   : > { %v5159_v35 = vpack.i.bf16 %v4939_v61, %v4938_v34  ;;  %v2337_v1 = vpop.f32.mrb[67].mxu1 }
 0x60d   : > { %v5154_v28 = vpack.i.bf16 %v2337_v1, %v2334_v27 }
 0x60e   : > { %5160 = vrot.lane.b32.xlu1 %v5159_v35, %s6050_s24 }
 0x60f   : > { %5155 = vrot.lane.b32.xlu0 %v5154_v28, %s6050_s24 }
 0x641   : > { %v4942_v4 = vpop.f32.mrb[68].mxu1 }
 0x642   : > { %v2350_v10 = vpop.f32.mrb[69].mxu1 }
 0x643   : > { %v4943_v36 = vpop.f32.mrb[70].mxu1 }
 0x644   : > { %v5169_v57 = vpack.i.bf16 %v4943_v36, %v4942_v4  ;;  %v2353_v53 = vpop.f32.mrb[71].mxu1 }
 0x645   : > { %v5164_v60 = vpack.i.bf16 %v2353_v53, %v2350_v10 }
 0x647   : > { %5165 = vrot.lane.b32.xlu0 %v5164_v60, %s6050_s24 }
 0x64b   : > { %5170 = vrot.lane.b32.xlu0 %v5169_v57, %s6050_s24 }
 0x651   : > { %v4946_v54 = vpop.f32.mrb[72].mxu1 }
 0x652   : > { %v2366_v19 = vpop.f32.mrb[73].mxu1 }
 0x653   : > { %v4947_v58 = vpop.f32.mrb[74].mxu1 }
 0x654   : > { %v5179_v59 = vpack.i.bf16 %v4947_v58, %v4946_v54  ;;  %v2369_v49 = vpop.f32.mrb[75].mxu1  ;;  %v5260_v58 = vld [vmem:[#allocation11 + $0x4] ss:$24 sps:$4 sm:$0xff]  }
 0x655   : > { %v5174_v45 = vpack.i.bf16 %v2369_v49, %v2366_v19  ;;  %v5258_v19 = vld [vmem:[#allocation11] ss:$24 sps:$4 sm:$0xff]   ;;  %v5263_v49 = vld [vmem:[#allocation11 + $0xc] ss:$24 sps:$4 sm:$0xff]   ;;  %3093 = vmatprep.subr.bf16.mxu1 %v5260_v58 }
 0x656   : > { %3206 = vmatprep.subr.bf16.mxu0 %v5263_v49  ;;  %3094 = vmatpush1.bf16.msra.mxu1 %v5258_v19  ;;  %v5746_v49 = vld [vmem:[%s6375_s9 + $0x40] sm:$0xff] }
 0x657   : > { %5175 = vrot.lane.b32.xlu0 %v5174_v45, %s6050_s24  ;;  %v5269_v45 = vld [vmem:[#allocation11 + $0x3c] ss:$24 sps:$4 sm:$0xff]  }
 0x65b   : > { %5180 = vrot.lane.b32.xlu0 %v5179_v59, %s6050_s24  ;;  %v5261_v59 = vld [vmem:[#allocation11 + $0x8] ss:$24 sps:$4 sm:$0xff]  }
 0x65d   : > { %v4950_v29 = vpop.f32.mrb[76].mxu1 }
 0x65e   : > { %v2382_v55 = vpop.f32.mrb[77].mxu1 }
 0x65f   : > { %v4951_v20 = vpop.f32.mrb[78].mxu1 }
 0x660   : > { %v5189_v25 = vpack.i.bf16 %v4951_v20, %v4950_v29  ;;  %v2385_v21 = vpop.f32.mrb[79].mxu1  ;;  %v5275_v29 = vld [vmem:[#allocation11 + $0x6c] ss:$24 sps:$4 sm:$0xff]   ;;  %v5273_v20 = vld [vmem:[#allocation11 + $0x68] ss:$24 sps:$4 sm:$0xff]  }
 0x661   : > { %v5184_v14 = vpack.i.bf16 %v2385_v21, %v2382_v55  ;;  %v5270_v55 = vld [vmem:[#allocation11 + $0x60] ss:$24 sps:$4 sm:$0xff]  }
 0x662   : > { %5190 = vrot.lane.b32.xlu1 %v5189_v25, %s6050_s24 }
 0x663   : > { %5185 = vrot.lane.b32.xlu0 %v5184_v14, %s6050_s24  ;;  %v5738_v14 = vld [vmem:[%s6375_s9] sm:$0xff]  ;;  %s5956_s24 = sshll.u32 %s6052_s29, 4  ;;  %s5957_s24 = int_to_ptr.vmem [resolvable:$false] %s5956_s24 }
 0x664   : > { %s5958_s19 = scalar_lea.vmem %s5957_s24, 4096  ;;  %p5959_p11 = scmp.lt.s32.totalorder %s7673_s20, %s5957_s24 }
 0x665   : > { %p5960_p12 = scmp.lt.s32.totalorder %s5958_s19, %s5952_s16 }
 0x667   : > { %p5961_p13 = por %p5960_p12, %p5959_p11 }
 0x669   : > { %p5962_p8 = pnand %p5961_p13, %p5955_p1 }
 0x680   : > { %v5161_v26 = vpop.permute.xlu1 %5160 }
 0x681   : > { %v5163_v16 = vunpack.i.h.bf16 %v5161_v26  ;;  %v5162_v9 = vunpack.i.l.bf16 %v5161_v26  ;;  %v5156_v33 = vpop.permute.xlu0 %5155 }
 0x682   : > { %v5158_v13 = vunpack.i.h.bf16 %v5156_v33  ;;  %v5157_v5 = vunpack.i.l.bf16 %v5156_v33  ;;  %v5739_v33 = vld [vmem:[%s6375_s9 + $0x10] sm:$0xff] }
 0x683   : > { %v2464_v15 = vsel %vm1362_vm0, %v7074_v0, %v5163_v16  ;;  %v2463_v43 = vsel %vm1362_vm0, %v7070_v12, %v5162_v9 }
 0x684   : > { %v2478_v41 = vpack.c.bf16 %v2464_v15, %v2463_v43  ;;  %v2461_v56 = vsel %vm1362_vm0, %v7072_v51, %v5157_v5  ;;  %v2462_v50 = vsel %vm1362_vm0, %v7076_v24, %v5158_v13  ;;  %v5740_v5 = vld [vmem:[%s6375_s9 + $0x8] sm:$0xff] }
 0x685   : > { %v2477_v42 = vpack.c.bf16 %v2462_v50, %v2461_v56  ;;  %v5741_v56 = vld [vmem:[%s6375_s9 + $0x18] sm:$0xff] }
 0x687   : > { %4968 = vmatprep.mubr.bf16.mxu0 %v2477_v42 }
 0x688   : > { %4969 = vmatmul.mubr.bf16.vlgmr.msra.gmra.mrb[64].mxu0 %v2478_v41 }
 0x689   : > { %3207 = vmatpush1.bf16.msra.mxu0 %v5261_v59 }
 0x68a   : > { %3208 = vmatprep.subr.bf16.mxu0 %v5269_v45 }
 0x6b9   : > { %v5166_v63 = vpop.permute.xlu0 %5165 }
 0x6ba   : > { %v5168_v2 = vunpack.i.h.bf16 %v5166_v63  ;;  %v5167_v47 = vunpack.i.l.bf16 %v5166_v63 }
 0x6bc   : > { %v2465_v46 = vsel %vm1362_vm0, %v7080_v23, %v5167_v47  ;;  %v2466_v0 = vsel %vm1362_vm0, %v7084_v30, %v5168_v2  ;;  %v5278_v2 = vld [vmem:[#allocation11 + $0x94] ss:$24 sps:$4 sm:$0xff]  }
 0x6bd   : > { %v5171_v12 = vpop.permute.xlu0 %5170  ;;  %v2479_v40 = vpack.c.bf16 %v2466_v0, %v2465_v46  ;;  %v5281_v47 = vld [vmem:[#allocation11 + $0x9c] ss:$24 sps:$4 sm:$0xff]   ;;  %v5276_v46 = vld [vmem:[#allocation11 + $0x90] ss:$24 sps:$4 sm:$0xff]  }
 0x6be   : > { %v5173_v18 = vunpack.i.h.bf16 %v5171_v12  ;;  %v5172_v11 = vunpack.i.l.bf16 %v5171_v12  ;;  %v5279_v0 = vld [vmem:[#allocation11 + $0x98] ss:$24 sps:$4 sm:$0xff]   ;;  %v5284_v12 = vld [vmem:[#allocation11 + $0xc4] ss:$24 sps:$4 sm:$0xff]  }
 0x6bf   : > { %4972 = vmatprep.mubr.bf16.mxu0 %v2479_v40  ;;  %v5287_v40 = vld [vmem:[#allocation11 + $0xcc] ss:$24 sps:$4 sm:$0xff]  }
 0x6c0   : > { %v2467_v51 = vsel %vm1362_vm0, %v7078_v7, %v5172_v11  ;;  %v2468_v24 = vsel %vm1362_vm0, %v7082_v17, %v5173_v18  ;;  %v5282_v18 = vld [vmem:[#allocation11 + $0xc0] ss:$24 sps:$4 sm:$0xff]  }
 0x6c1   : > { %v2480_v8 = vpack.c.bf16 %v2468_v24, %v2467_v51  ;;  %v5285_v11 = vld [vmem:[#allocation11 + $0xc8] ss:$24 sps:$4 sm:$0xff]   ;;  %v5290_v51 = vld [vmem:[#allocation11 + $0xf4] ss:$24 sps:$4 sm:$0xff]  }
 0x6c2   : > { %v5293_v24 = vld [vmem:[#allocation11 + $0xfc] ss:$24 sps:$4 sm:$0xff]  }
 0x6c3   : > { %4973 = vmatmul.mubr.bf16.gmra.mrb[68].mxu0 %v2480_v8  ;;  %v5288_v8 = vld [vmem:[#allocation11 + $0xf0] ss:$24 sps:$4 sm:$0xff]  }
 0x6c9   : > { %v5176_v31 = vpop.permute.xlu0 %5175 }
 0x6ca   : > { %v5178_v32 = vunpack.i.h.bf16 %v5176_v31  ;;  %v5177_v6 = vunpack.i.l.bf16 %v5176_v31  ;;  %v5291_v31 = vld [vmem:[#allocation11 + $0xf8] ss:$24 sps:$4 sm:$0xff]  }
 0x6cc   : > { %v2469_v23 = vsel %vm1362_vm0, %v7088_v37, %v5177_v6  ;;  %v2470_v30 = vsel %vm1362_vm0, %v7092_v44, %v5178_v32  ;;  %v5296_v32 = vld [vmem:[#allocation11 + $0x124] ss:$24 sps:$4 sm:$0xff]  }
 0x6cd   : > { %v5181_v34 = vpop.permute.xlu0 %5180  ;;  %v2481_v27 = vpack.c.bf16 %v2470_v30, %v2469_v23  ;;  %v5299_v6 = vld [vmem:[#allocation11 + $0x12c] ss:$24 sps:$4 sm:$0xff]   ;;  %v5294_v23 = vld [vmem:[#allocation11 + $0x120] ss:$24 sps:$4 sm:$0xff]  }
 0x6ce   : > { %v5183_v61 = vunpack.i.h.bf16 %v5181_v34  ;;  %v5182_v35 = vunpack.i.l.bf16 %v5181_v34  ;;  %v5297_v30 = vld [vmem:[#allocation11 + $0x128] ss:$24 sps:$4 sm:$0xff]  }
 0x6cf   : > { %4976 = vmatprep.mubr.bf16.mxu0 %v2481_v27  ;;  %v5300_v34 = vld [vmem:[#allocation11 + $0x150] ss:$24 sps:$4 sm:$0xff]   ;;  %v5302_v27 = vld [vmem:[#allocation11 + $0x154] ss:$24 sps:$4 sm:$0xff]  }
 0x6d0   : > { %v2471_v7 = vsel %vm1362_vm0, %v7086_v62, %v5182_v35  ;;  %v2472_v17 = vsel %vm1362_vm0, %v7090_v39, %v5183_v61  ;;  %v5303_v61 = vld [vmem:[#allocation11 + $0x158] ss:$24 sps:$4 sm:$0xff]   ;;  %v5305_v35 = vld [vmem:[#allocation11 + $0x15c] ss:$24 sps:$4 sm:$0xff]  }
 0x6d1   : > { %v2482_v1 = vpack.c.bf16 %v2472_v17, %v2471_v7 }
 0x6d3   : > { %4977 = vmatmul.mubr.bf16.gmra.mrb[72].mxu0 %v2482_v1  ;;  %v5742_v1 = vld [vmem:[%s6375_s9 + $0x20] sm:$0xff] }
 0x6d4   : > { %v5191_v28 = vpop.permute.xlu1 %5190 }
 0x6d5   : > { %v5193_v4 = vunpack.i.h.bf16 %v5191_v28  ;;  %v5192_v10 = vunpack.i.l.bf16 %v5191_v28  ;;  %v5186_v37 = vpop.permute.xlu0 %5185 }
 0x6d6   : > { %v5188_v36 = vunpack.i.h.bf16 %v5186_v37  ;;  %v5187_v57 = vunpack.i.l.bf16 %v5186_v37  ;;  %v5743_v37 = vld [vmem:[%s6375_s9 + $0x30] sm:$0xff] }
 0x6d7   : > { %v2475_v44 = vsel %vm1362_vm0, %v7094_v22, %v5192_v10  ;;  %v2476_v53 = vsel %vm1362_vm0, %v7098_v48, %v5193_v4  ;;  %v5266_v22 = vld [vmem:[#allocation11 + $0x34] ss:$24 sps:$4 sm:$0xff]   ;;  %v5264_v48 = vld [vmem:[#allocation11 + $0x30] ss:$24 sps:$4 sm:$0xff]  }
 0x6d8   : > { %v2473_v62 = vsel %vm1362_vm0, %v7096_v38, %v5187_v57  ;;  %v2474_v39 = vsel %vm1362_vm0, %v7100_v52, %v5188_v36  ;;  %v2484_v60 = vpack.c.bf16 %v2476_v53, %v2475_v44  ;;  %3095 = vmatprep.subr.bf16.mxu1 %v5266_v22  ;;  %v5267_v38 = vld [vmem:[#allocation11 + $0x38] ss:$24 sps:$4 sm:$0xff]   ;;  %v5272_v52 = vld [vmem:[#allocation11 + $0x64] ss:$24 sps:$4 sm:$0xff]   ;;  %v5744_v57 = vld [vmem:[%s6375_s9 + $0x28] sm:$0xff] }
 0x6d9   : > { %v2483_v54 = vpack.c.bf16 %v2474_v39, %v2473_v62  ;;  %3096 = vmatpush1.bf16.msra.mxu1 %v5264_v48  ;;  %3209 = vmatpush1.bf16.msra.mxu0 %v5267_v38  ;;  %v5745_v62 = vld [vmem:[%s6375_s9 + $0x38] sm:$0xff]  ;;  %v5747_v38 = vld [vmem:[%s6375_s9 + $0x50] sm:$0xff] }
 0x6da   : > { %3097 = vmatprep.subr.bf16.mxu1 %v5272_v52  ;;  %3210 = vmatprep.subr.bf16.mxu0 %v5275_v29  ;;  %v5748_v29 = vld [vmem:[%s6375_s9 + $0x48] sm:$0xff] }
 0x6db   : > { %4980 = vmatprep.mubr.bf16.mxu0 %v2483_v54 }
 0x6dc   : > { %4981 = vmatmul.mubr.bf16.gmra.mrb[76].mxu0 %v2484_v60 }
 0x6dd   : > { %3238 = vmatprep.mubr.bf16.mxu0 %v6049_v3  ;;  %3098 = vmatpush1.bf16.msra.mxu1 %v5270_v55 }
 0x6de   : > { %3211 = vmatpush1.bf16.msra.mxu0 %v5273_v20  ;;  %3099 = vmatprep.subr.bf16.mxu1 %v5278_v2 }
 0x6df   : > { %3212 = vmatprep.subr.bf16.mxu0 %v5281_v47  ;;  %v5752_v47 = vld [vmem:[%s6375_s9 + $0x68] sm:$0xff] }
 0x6e1   : > { %3100 = vmatpush1.bf16.msra.mxu1 %v5276_v46 }
 0x6e2   : > { %3213 = vmatpush1.bf16.msra.mxu0 %v5279_v0  ;;  %3101 = vmatprep.subr.bf16.mxu1 %v5284_v12  ;;  %v5308_v12 = vld [vmem:[#allocation11 + $0x14] ss:$24 sps:$4 sm:$0xff]  }
 0x6e3   : > { %3214 = vmatprep.subr.bf16.mxu0 %v5287_v40  ;;  %v5753_v40 = vld [vmem:[%s6375_s9 + $0x78] sm:$0xff] }
 0x6e5   : > { %3102 = vmatpush1.bf16.msra.mxu1 %v5282_v18 }
 0x6e6   : > { %3215 = vmatpush1.bf16.msra.mxu0 %v5285_v11  ;;  %3103 = vmatprep.subr.bf16.mxu1 %v5290_v51 }
 0x6e7   : > { %3216 = vmatprep.subr.bf16.mxu0 %v5293_v24 }
 0x6e9   : > { %3104 = vmatpush1.bf16.msra.mxu1 %v5288_v8 }
 0x6ea   : > { %3217 = vmatpush1.bf16.msra.mxu0 %v5291_v31  ;;  %3105 = vmatprep.subr.bf16.mxu1 %v5296_v32 }
 0x6eb   : > { %3218 = vmatprep.subr.bf16.mxu0 %v5299_v6 }
 0x6ed   : > { %3106 = vmatpush1.bf16.msra.mxu1 %v5294_v23 }
 0x6ee   : > { %3219 = vmatpush1.bf16.msra.mxu0 %v5297_v30  ;;  %3107 = vmatprep.subr.bf16.mxu1 %v5302_v27 }
 0x6ef   : > { %3220 = vmatprep.subr.bf16.mxu0 %v5305_v35 }
 0x6f1   : > { %3108 = vmatpush1.bf16.msra.mxu1 %v5300_v34 }
 0x6f2   : > { %3221 = vmatpush1.bf16.msra.mxu0 %v5303_v61  ;;  %3319 = vmatprep.subr.bf16.mxu1 %v5308_v12 }
 0x75b   : > { %v4970_v25 = vpop.f32.mrb[64].mxu0 }
 0x75c   : > { %v2583_v21 = vpop.f32.mrb[65].mxu0  ;;  %v7147_v13 = vadd.f32 %v5739_v33, %v4970_v25  ;;  %v5749_v25 = vld [vmem:[%s6375_s9 + $0x58] sm:$0xff] }
 0x75d   : > { %v7144_v26 = vadd.f32 %v5738_v14, %v2583_v21  ;;  %v4971_v16 = vpop.f32.mrb[66].mxu0 }
 0x75e   : > { %v2586_v9 = vpop.f32.mrb[67].mxu0  ;;  %7790 = vst [vmem:[#allocation24_spill] sm:$0xff] %v7147_v13  ;;  %v7157_v50 = vadd.f32 %v5741_v56, %v4971_v16  ;;  %v2665_v42 = vmul.f32 %v7147_v13, %v7147_v13 }
 0x75f   : > { %7789 = vst [vmem:[#allocation23_spill] sm:$0xff] %v7144_v26  ;;  %v7150_v15 = vadd.f32 %v5740_v5, %v2586_v9  ;;  %v2663_v43 = vmul.f32 %v7144_v26, %v7144_v26 }
 0x760   : > { %7792 = vst [vmem:[#allocation26_spill] sm:$0xff] %v7157_v50  ;;  %v2666_v63 = vmul.f32 %v7157_v50, %v7157_v50 }
 0x761   : > { %7791 = vst [vmem:[#allocation25_spill] sm:$0xff] %v7150_v15  ;;  %2679 = vadd.xlane.f32.xlu0 %v2663_v43  ;;  %v2664_v41 = vmul.f32 %v7150_v15, %v7150_v15  ;;  %v5750_v43 = vld [vmem:[%s6375_s9 + $0x60] sm:$0xff] }
 0x763   : > { %2681 = vadd.xlane.f32.xlu1 %v2664_v41 }
 0x765   : > { %2683 = vadd.xlane.f32.xlu0 %v2665_v42 }
 0x769   : > { %2685 = vadd.xlane.f32.xlu0 %v2666_v63  ;;  %v5751_v63 = vld [vmem:[%s6375_s9 + $0x70] sm:$0xff]  ;;  %s7671_s9 = scalar_lea.hbm %s7866_s23, %s4615_s26 }
 0x796   : > { %v4974_v7 = vpop.f32.mrb[68].mxu0 }
 0x797   : > { %v2599_v17 = vpop.f32.mrb[69].mxu0  ;;  %v7167_v36 = vadd.f32 %v5743_v37, %v4974_v7  ;;  %v7227_v37 = vld [vmem:[%s7723_s2] ss:$0 sm:$0xff] }
 0x798   : > { %v7164_v28 = vadd.f32 %v5742_v1, %v2599_v17  ;;  %v4975_v4 = vpop.f32.mrb[70].mxu0 }
 0x799   : > { %v2602_v10 = vpop.f32.mrb[71].mxu0  ;;  %7794 = vst [vmem:[#allocation28_spill] sm:$0xff] %v7167_v36  ;;  %v7175_v39 = vadd.f32 %v5745_v62, %v4975_v4  ;;  %v2669_v54 = vmul.f32 %v7167_v36, %v7167_v36 }
 0x79a   : > { %7793 = vst [vmem:[#allocation27_spill] sm:$0xff] %v7164_v28  ;;  %v7170_v44 = vadd.f32 %v5744_v57, %v2602_v10  ;;  %v2667_v53 = vmul.f32 %v7164_v28, %v7164_v28 }
 0x79b   : > { %7796 = vst [vmem:[#allocation30_spill] sm:$0xff] %v7175_v39  ;;  %v2670_v19 = vmul.f32 %v7175_v39, %v7175_v39 }
 0x79c   : > { %7795 = vst [vmem:[#allocation29_spill] sm:$0xff] %v7170_v44  ;;  %2687 = vadd.xlane.f32.xlu1 %v2667_v53  ;;  %v2668_v60 = vmul.f32 %v7170_v44, %v7170_v44 }
 0x79e   : > { %2689 = vadd.xlane.f32.xlu0 %v2668_v60 }
 0x7a0   : > { %2691 = vadd.xlane.f32.xlu1 %v2669_v54 }
 0x7a2   : > { %2693 = vadd.xlane.f32.xlu0 %v2670_v19  ;;  %v5306_v19 = vld [vmem:[#allocation11 + $0x10] ss:$24 sps:$4 sm:$0xff]  }
 0x7a6   : > { %v4978_v58 = vpop.f32.mrb[72].mxu0 }
 0x7a7   : > { %v2615_v59 = vpop.f32.mrb[73].mxu0  ;;  %v7187_v52 = vadd.f32 %v5747_v38, %v4978_v58  ;;  %v5309_v38 = vld [vmem:[#allocation11 + $0x40] ss:$24 sps:$4 sm:$0xff]  }
 0x7a8   : > { %v7184_v22 = vadd.f32 %v5746_v49, %v2615_v59  ;;  %v4979_v45 = vpop.f32.mrb[74].mxu0  ;;  %v5311_v59 = vld [vmem:[#allocation11 + $0x44] ss:$24 sps:$4 sm:$0xff]  }
 0x7a9   : > { %v2618_v48 = vpop.f32.mrb[75].mxu0  ;;  %7798 = vst [vmem:[#allocation32_spill] sm:$0xff] %v7187_v52  ;;  %v7195_v21 = vadd.f32 %v5749_v25, %v4979_v45  ;;  %v2673_v16 = vmul.f32 %v7187_v52, %v7187_v52 }
 0x7aa   : > { %7797 = vst [vmem:[#allocation31_spill] sm:$0xff] %v7184_v22  ;;  %v7190_v55 = vadd.f32 %v5748_v29, %v2618_v48  ;;  %v2671_v20 = vmul.f32 %v7184_v22, %v7184_v22  ;;  %v5314_v29 = vld [vmem:[#allocation11 + $0x74] ss:$24 sps:$4 sm:$0xff]  }
 0x7ab   : > { %7800 = vst [vmem:[#allocation34_spill] sm:$0xff] %v7195_v21  ;;  %v2674_v5 = vmul.f32 %v7195_v21, %v7195_v21 }
 0x7ac   : > { %7799 = vst [vmem:[#allocation33_spill] sm:$0xff] %v7190_v55  ;;  %2695 = vadd.xlane.f32.xlu1 %v2671_v20  ;;  %v2672_v14 = vmul.f32 %v7190_v55, %v7190_v55 }
 0x7ae   : > { %2697 = vadd.xlane.f32.xlu0 %v2672_v14  ;;  %v5312_v14 = vld [vmem:[#allocation11 + $0x70] ss:$24 sps:$4 sm:$0xff]  }
 0x7af   : > { %v4982_v9 = vpop.f32.mrb[76].mxu0 }
 0x7b0   : > { %2699 = vadd.xlane.f32.xlu1 %v2673_v16  ;;  %v2631_v33 = vpop.f32.mrb[77].mxu0  ;;  %v7207_v2 = vadd.f32 %v5751_v63, %v4982_v9  ;;  %v5317_v16 = vld [vmem:[#allocation11 + $0xa4] ss:$24 sps:$4 sm:$0xff]   ;;  %v5315_v9 = vld [vmem:[#allocation11 + $0xa0] ss:$24 sps:$4 sm:$0xff]  }
 0x7b1   : > { %v7204_v41 = vadd.f32 %v5750_v43, %v2631_v33  ;;  %v4983_v56 = vpop.f32.mrb[78].mxu0  ;;  %v5320_v33 = vld [vmem:[#allocation11 + $0xd4] ss:$24 sps:$4 sm:$0xff]   ;;  %v5323_v43 = vld [vmem:[#allocation11 + $0x104] ss:$24 sps:$4 sm:$0xff]  }
 0x7b2   : > { %2701 = vadd.xlane.f32.xlu0 %v2674_v5  ;;  %v2634_v42 = vpop.f32.mrb[79].mxu0  ;;  %7802 = vst [vmem:[#allocation36_spill] sm:$0xff] %v7207_v2  ;;  %v7215_v18 = vadd.f32 %v5753_v40, %v4983_v56  ;;  %v2677_v51 = vmul.f32 %v7207_v2, %v7207_v2  ;;  %v5318_v5 = vld [vmem:[#allocation11 + $0xd0] ss:$24 sps:$4 sm:$0xff]   ;;  %v5321_v56 = vld [vmem:[#allocation11 + $0x100] ss:$24 sps:$4 sm:$0xff]  }
 0x7b3   : > { %7801 = vst [vmem:[#allocation35_spill] sm:$0xff] %v7204_v41  ;;  %v7210_v46 = vadd.f32 %v5752_v47, %v2634_v42  ;;  %v2675_v0 = vmul.f32 %v7204_v41, %v7204_v41  ;;  %v5326_v42 = vld [vmem:[#allocation11 + $0x134] ss:$24 sps:$4 sm:$0xff]   ;;  %v5324_v63 = vld [vmem:[#allocation11 + $0x130] ss:$24 sps:$4 sm:$0xff]  }
 0x7b4   : > { %7804 = vst [vmem:[#allocation38_spill] sm:$0xff] %v7215_v18  ;;  %v2678_v24 = vmul.f32 %v7215_v18, %v7215_v18  ;;  %v5329_v47 = vld [vmem:[#allocation11 + $0x164] ss:$24 sps:$4 sm:$0xff]  }
 0x7b5   : > { %7803 = vst [vmem:[#allocation37_spill] sm:$0xff] %v7210_v46  ;;  %2703 = vadd.xlane.f32.xlu1 %v2675_v0  ;;  %v2676_v11 = vmul.f32 %v7210_v46, %v7210_v46  ;;  %v5327_v0 = vld [vmem:[#allocation11 + $0x160] ss:$24 sps:$4 sm:$0xff]  }
 0x7b7   : > { %2705 = vadd.xlane.f32.xlu0 %v2676_v11 }
 0x7b9   : > { %2707 = vadd.xlane.f32.xlu1 %v2677_v51 }
 0x7bb   : > { %2709 = vadd.xlane.f32.xlu0 %v2678_v24 }
 0x7ee   : > { %v2680_v8 = vpop.xlane.xlu0 %2679 }
 0x7ef   : > { %v2711_v31 = vmul.f32 0.0078125, %v2680_v8 }
 0x7f0   : > { %v2682_v32 = vpop.xlane.xlu1 %2681 }
 0x7f1   : > { %v2727_v6 = vadd.f32 1e-06, %v2711_v31  ;;  %v2712_v23 = vmul.f32 0.0078125, %v2682_v32 }
 0x7f2   : > { %v2684_v30 = vpop.xlane.xlu0 %2683 }
 0x7f3   : > { %5514 = vrsqrt.f32 %v2727_v6  ;;  %v2728_v34 = vadd.f32 1e-06, %v2712_v23  ;;  %v2713_v27 = vmul.f32 0.0078125, %v2684_v30 }
 0x7f5   : > { %5516 = vrsqrt.f32 %v2728_v34  ;;  %v2729_v61 = vadd.f32 1e-06, %v2713_v27 }
 0x7f6   : > { %v2686_v35 = vpop.xlane.xlu0 %2685 }
 0x7f7   : > { %v2714_v7 = vmul.f32 0.0078125, %v2686_v35  ;;  %5518 = vrsqrt.f32 %v2729_v61 }
 0x7f9   : > { %v2730_v17 = vadd.f32 1e-06, %v2714_v7 }
 0x7fb   : > { %5520 = vrsqrt.f32 %v2730_v17 }
 0x7fd   : > { %v5515_v1 = vpop.eup %5514 }
 0x7fe   : > { %v2759_v4 = vmul.f32 %v5515_v1, %v7144_v26 }
 0x7ff   : > { %v5517_v10 = vpop.eup %5516 }
 0x800   : > { %v2760_v57 = vmul.f32 %v5517_v10, %v7150_v15  ;;  %v2781_v53 = vmul.f32 %v7227_v37, %v2759_v4 }
 0x801   : > { %v5519_v60 = vpop.eup %5518 }
 0x802   : > { %v2782_v62 = vmul.f32 %v7227_v37, %v2760_v57  ;;  %v2761_v49 = vmul.f32 %v5519_v60, %v7147_v13 }
 0x804   : > { %v7232_v54 = vpack.c.bf16 %v2782_v62, %v2781_v53  ;;  %v2783_v20 = vmul.f32 %v7227_v37, %v2761_v49 }
 0x805   : > { %v5521_v58 = vpop.eup %5520 }
 0x806   : > { %3126 = vmatmul.mubr.bf16.vlgmr.msra.gmra.mrb[80].mxu1 %v7232_v54  ;;  %3239 = vmatmul.mubr.bf16.vlgmr.msra.gmra.mrb[80].mxu0 %v7232_v54  ;;  %v2762_v45 = vmul.f32 %v5521_v58, %v7157_v50 }
 0x807   : > { %3135 = vmatprep.mubr.bf16.mxu1 %v6049_v3  ;;  %3248 = vmatprep.mubr.bf16.mxu0 %v6049_v3 }
 0x808   : > { %v2784_v48 = vmul.f32 %v7227_v37, %v2762_v45  ;;  %3320 = vmatpush1.bf16.msra.mxu1 %v5306_v19 }
 0x809   : > { %3321 = vmatprep.subr.bf16.mxu1 %v5311_v59 }
 0x80a   : > { %v7242_v25 = vpack.c.bf16 %v2784_v48, %v2783_v20 }
 0x80c   : > { %3322 = vmatpush1.bf16.msra.mxu1 %v5309_v38 }
 0x80d   : > { %3323 = vmatprep.subr.bf16.mxu1 %v5314_v29 }
 0x80e   : > { %3136 = vmatmul.mubr.bf16.gmra.mrb[84].mxu1 %v7242_v25  ;;  %3249 = vmatmul.mubr.bf16.gmra.mrb[84].mxu0 %v7242_v25 }
 0x80f   : > { %3145 = vmatprep.mubr.bf16.mxu1 %v6049_v3  ;;  %3258 = vmatprep.mubr.bf16.mxu0 %v6049_v3 }
 0x810   : > { %3324 = vmatpush1.bf16.msra.mxu1 %v5312_v14 }
 0x811   : > { %3325 = vmatprep.subr.bf16.mxu1 %v5317_v16 }
 0x814   : > { %3326 = vmatpush1.bf16.msra.mxu1 %v5315_v9 }
 0x815   : > { %3327 = vmatprep.subr.bf16.mxu1 %v5320_v33 }
 0x818   : > { %3328 = vmatpush1.bf16.msra.mxu1 %v5318_v5 }
 0x819   : > { %3329 = vmatprep.subr.bf16.mxu1 %v5323_v43 }
 0x81c   : > { %3330 = vmatpush1.bf16.msra.mxu1 %v5321_v56 }
 0x81d   : > { %3331 = vmatprep.subr.bf16.mxu1 %v5326_v42 }
 0x820   : > { %3332 = vmatpush1.bf16.msra.mxu1 %v5324_v63 }
 0x821   : > { %3333 = vmatprep.subr.bf16.mxu1 %v5329_v47 }
 0x824   : > { %3334 = vmatpush1.bf16.msra.mxu1 %v5327_v0 }
 0x829   : > { %v2688_v12 = vpop.xlane.xlu1 %2687 }
 0x82a   : > { %v2715_v40 = vmul.f32 0.0078125, %v2688_v12 }
 0x82b   : > { %v2690_v11 = vpop.xlane.xlu0 %2689 }
 0x82c   : > { %v2731_v51 = vadd.f32 1e-06, %v2715_v40  ;;  %v2716_v24 = vmul.f32 0.0078125, %v2690_v11 }
 0x82d   : > { %v2692_v8 = vpop.xlane.xlu1 %2691 }
 0x82e   : > { %5522 = vrsqrt.f32 %v2731_v51  ;;  %v2732_v31 = vadd.f32 1e-06, %v2716_v24  ;;  %v2717_v32 = vmul.f32 0.0078125, %v2692_v8 }
 0x82f   : > { %v2694_v6 = vpop.xlane.xlu0 %2693 }
 0x830   : > { %5524 = vrsqrt.f32 %v2732_v31  ;;  %v2733_v23 = vadd.f32 1e-06, %v2717_v32  ;;  %v2718_v30 = vmul.f32 0.0078125, %v2694_v6 }
 0x832   : > { %v2734_v34 = vadd.f32 1e-06, %v2718_v30  ;;  %5526 = vrsqrt.f32 %v2733_v23 }
 0x834   : > { %5528 = vrsqrt.f32 %v2734_v34 }
 0x838   : > { %v5523_v27 = vpop.eup %5522 }
 0x839   : > { %v2696_v61 = vpop.xlane.xlu1 %2695  ;;  %v2763_v35 = vmul.f32 %v5523_v27, %v7164_v28 }
 0x83a   : > { %v5525_v7 = vpop.eup %5524  ;;  %v2719_v17 = vmul.f32 0.0078125, %v2696_v61 }
 0x83b   : > { %v2698_v1 = vpop.xlane.xlu0 %2697  ;;  %v2764_v4 = vmul.f32 %v5525_v7, %v7170_v44  ;;  %v2785_v60 = vmul.f32 %v7227_v37, %v2763_v35 }
 0x83c   : > { %v2735_v10 = vadd.f32 1e-06, %v2719_v17  ;;  %v2720_v57 = vmul.f32 0.0078125, %v2698_v1  ;;  %v5527_v53 = vpop.eup %5526 }
 0x83d   : > { %v2700_v62 = vpop.xlane.xlu1 %2699  ;;  %v2786_v19 = vmul.f32 %v7227_v37, %v2764_v4  ;;  %v2765_v14 = vmul.f32 %v5527_v53, %v7167_v36 }
 0x83e   : > { %v5529_v58 = vpop.eup %5528  ;;  %5530 = vrsqrt.f32 %v2735_v10  ;;  %v2736_v59 = vadd.f32 1e-06, %v2720_v57  ;;  %v2721_v49 = vmul.f32 0.0078125, %v2700_v62 }
 0x83f   : > { %v2702_v45 = vpop.xlane.xlu0 %2701  ;;  %v7252_v48 = vpack.c.bf16 %v2786_v19, %v2785_v60  ;;  %v2766_v38 = vmul.f32 %v5529_v58, %v7175_v39  ;;  %v2787_v42 = vmul.f32 %v7227_v37, %v2765_v14 }
 0x840   : > { %5532 = vrsqrt.f32 %v2736_v59  ;;  %v2737_v29 = vadd.f32 1e-06, %v2721_v49  ;;  %v2722_v20 = vmul.f32 0.0078125, %v2702_v45 }
 0x841   : > { %3146 = vmatmul.mubr.bf16.gmra.mrb[88].mxu1 %v7252_v48  ;;  %3259 = vmatmul.mubr.bf16.gmra.mrb[88].mxu0 %v7252_v48  ;;  %v2788_v33 = vmul.f32 %v7227_v37, %v2766_v38 }
 0x842   : > { %v2738_v16 = vadd.f32 1e-06, %v2722_v20  ;;  %v2704_v9 = vpop.xlane.xlu1 %2703  ;;  %3155 = vmatprep.mubr.bf16.mxu1 %v6049_v3  ;;  %3268 = vmatprep.mubr.bf16.mxu0 %v6049_v3  ;;  %5534 = vrsqrt.f32 %v2737_v29 }
 0x843   : > { %v2723_v5 = vmul.f32 0.0078125, %v2704_v9  ;;  %v7262_v47 = vpack.c.bf16 %v2788_v33, %v2787_v42  ;;  %v5330_v9 = vld [vmem:[#allocation13 + $0x40] sm:$0xff]  }
 0x844   : > { %5536 = vrsqrt.f32 %v2738_v16  ;;  %v2706_v43 = vpop.xlane.xlu0 %2705  ;;  %v5331_v33 = vld [vmem:[#allocation13] sm:$0xff]   ;;  %4712 = vmatprep.subr.bf16.mxu0 %v5330_v9 }
 0x845   : > { %v2724_v56 = vmul.f32 0.0078125, %v2706_v43  ;;  %v2739_v12 = vadd.f32 1e-06, %v2723_v5  ;;  %4713 = vmatpush3.bf16.msra.mxu0 %v5331_v33  ;;  %v5340_v5 = vld [vmem:[#allocation13 + $0x80] sm:$0xff]   ;;  %v5336_v43 = vld [vmem:[#allocation13 + $0x58] sm:$0xff]  }
 0x846   : > { %v2708_v11 = vpop.xlane.xlu1 %2707  ;;  %4984 = vmatprep.subr.bf16.mxu1 %v5340_v5  ;;  %v5338_v42 = vld [vmem:[#allocation13 + $0x60] sm:$0xff]  }
 0x847   : > { %v2740_v63 = vadd.f32 1e-06, %v2724_v56  ;;  %v2725_v32 = vmul.f32 0.0078125, %v2708_v11  ;;  %v5337_v56 = vld [vmem:[#allocation13 + $0x18] sm:$0xff]   ;;  %v5344_v11 = vld [vmem:[#allocation13 + $0x70] sm:$0xff]  }
 0x848   : > { %v5531_v0 = vpop.eup %5530  ;;  %v2710_v40 = vpop.xlane.xlu0 %2709 }
 0x849   : > { %3156 = vmatmul.mubr.bf16.gmra.mrb[92].mxu1 %v7262_v47  ;;  %3269 = vmatmul.mubr.bf16.gmra.mrb[92].mxu0 %v7262_v47  ;;  %v2767_v51 = vmul.f32 %v5531_v0, %v7184_v22  ;;  %5538 = vrsqrt.f32 %v2740_v63  ;;  %v2726_v8 = vmul.f32 0.0078125, %v2710_v40  ;;  %v2741_v7 = vadd.f32 1e-06, %v2725_v32  ;;  %v5339_v63 = vld [vmem:[#allocation13 + $0x20] sm:$0xff]   ;;  %v5342_v0 = vld [vmem:[#allocation13 + $0x28] sm:$0xff]   ;;  %v5347_v40 = vld [vmem:[#allocation13 + $0x98] sm:$0xff]  }
 0x84a   : > { %v5533_v24 = vpop.eup %5532  ;;  %3165 = vmatprep.mubr.bf16.mxu1 %v6049_v3  ;;  %3278 = vmatprep.mubr.bf16.mxu0 %v6049_v3  ;;  %5540 = vrsqrt.f32 %v2739_v12  ;;  %v5346_v12 = vld [vmem:[#allocation13 + $0x90] sm:$0xff]  }
 0x84b   : > { %v2768_v31 = vmul.f32 %v5533_v24, %v7190_v55  ;;  %v2789_v23 = vmul.f32 %v7227_v37, %v2767_v51  ;;  %v2742_v27 = vadd.f32 1e-06, %v2726_v8  ;;  %v5350_v51 = vld [vmem:[#allocation13 + $0xa0] sm:$0xff]   ;;  %v5345_v24 = vld [vmem:[#allocation13 + $0x30] sm:$0xff]  }
 0x84c   : > { %v5535_v6 = vpop.eup %5534 }
 0x84d   : > { %v2790_v30 = vmul.f32 %v7227_v37, %v2768_v31  ;;  %v2769_v17 = vmul.f32 %v5535_v6, %v7187_v52  ;;  %5542 = vrsqrt.f32 %v2742_v27  ;;  %v5348_v27 = vld [vmem:[#allocation13 + $0x78] sm:$0xff]  }
 0x84e   : > { %v5537_v34 = vpop.eup %5536  ;;  %5544 = vrsqrt.f32 %v2741_v7 }
 0x84f   : > { %v2801_v61 = vpack.c.bf16 %v2790_v30, %v2789_v23  ;;  %v2770_v35 = vmul.f32 %v5537_v34, %v7195_v21  ;;  %v2791_v10 = vmul.f32 %v7227_v37, %v2769_v17 }
 0x851   : > { %3166 = vmatmul.mubr.bf16.gmra.mrb[96].mxu1 %v2801_v61  ;;  %3279 = vmatmul.mubr.bf16.gmra.mrb[96].mxu0 %v2801_v61  ;;  %v2792_v1 = vmul.f32 %v7227_v37, %v2770_v35 }
 0x852   : > { %3175 = vmatprep.mubr.bf16.mxu1 %v6049_v3  ;;  %3288 = vmatprep.mubr.bf16.mxu0 %v6049_v3 }
 0x853   : > { %v5539_v4 = vpop.eup %5538  ;;  %v2802_v53 = vpack.c.bf16 %v2792_v1, %v2791_v10  ;;  %v5351_v1 = vld [vmem:[#allocation13 + $0xa8] sm:$0xff]  }
 0x854   : > { %v5541_v57 = vpop.eup %5540  ;;  %v2772_v62 = vmul.f32 %v5539_v4, %v7210_v46  ;;  %v5352_v4 = vld [vmem:[#allocation13 + $0xb0] sm:$0xff]  }
 0x855   : > { %v2771_v60 = vmul.f32 %v5541_v57, %v7204_v41 }
 0x856   : > { %v2794_v19 = vmul.f32 %v7227_v37, %v2772_v62 }
 0x857   : > { %v5543_v58 = vpop.eup %5542  ;;  %v2793_v59 = vmul.f32 %v7227_v37, %v2771_v60 }
 0x858   : > { %v5545_v49 = vpop.eup %5544  ;;  %v2774_v38 = vmul.f32 %v5543_v58, %v7215_v18 }
 0x859   : > { %3176 = vmatmul.mubr.bf16.gmra.mrb[100].mxu1 %v2802_v53  ;;  %3289 = vmatmul.mubr.bf16.gmra.mrb[100].mxu0 %v2802_v53  ;;  %v2803_v45 = vpack.c.bf16 %v2794_v19, %v2793_v59  ;;  %v2773_v29 = vmul.f32 %v5545_v49, %v7207_v2  ;;  %v5353_v59 = vld [vmem:[#allocation13 + $0xb8] sm:$0xff]  }
 0x85a   : > { %3185 = vmatprep.mubr.bf16.mxu1 %v6049_v3  ;;  %3298 = vmatprep.mubr.bf16.mxu0 %v6049_v3  ;;  %v2796_v20 = vmul.f32 %v7227_v37, %v2774_v38 }
 0x85b   : > { %v2795_v14 = vmul.f32 %v7227_v37, %v2773_v29  ;;  %v5332_v37 = vld [vmem:[#allocation13 + $0x48] sm:$0xff]  }
 0x85c   : > { %4714 = vmatprep.subr.bf16.mxu0 %v5332_v37 }
 0x85d   : > { %v2804_v16 = vpack.c.bf16 %v2796_v20, %v2795_v14 }
 0x861   : > { %3186 = vmatmul.mubr.bf16.gmra.mrb[104].mxu1 %v2803_v45  ;;  %3299 = vmatmul.mubr.bf16.gmra.mrb[104].mxu0 %v2803_v45 }
 0x862   : > { %3195 = vmatprep.mubr.bf16.mxu1 %v6049_v3  ;;  %3308 = vmatprep.mubr.bf16.mxu0 %v6049_v3 }
 0x869   : > { %3196 = vmatmul.mubr.bf16.gmra.mrb[108].mxu1 %v2804_v16  ;;  %3309 = vmatmul.mubr.bf16.gmra.mrb[108].mxu0 %v2804_v16 }
 0x86a   : > { %3351 = vmatprep.mubr.bf16.mxu1 %v6049_v3 }
 0x871   : > { %3352 = vmatmul.mubr.bf16.vlgmr.msra.gmra.mrb[112].mxu1 %v7232_v54  ;;  %v5333_v54 = vld [vmem:[#allocation13 + $0x8] sm:$0xff]  }
 0x872   : > { %3361 = vmatprep.mubr.bf16.mxu1 %v6049_v3  ;;  %4715 = vmatpush3.bf16.msra.mxu0 %v5333_v54 }
 0x873   : > { %4985 = vmatpush3.bf16.msra.mxu1 %v5340_v5 }
 0x879   : > { %3362 = vmatmul.mubr.bf16.gmra.mrb[116].mxu1 %v7242_v25  ;;  %v5334_v25 = vld [vmem:[#allocation13 + $0x50] sm:$0xff]  }
 0x87a   : > { %3371 = vmatprep.mubr.bf16.mxu1 %v6049_v3  ;;  %4716 = vmatprep.subr.bf16.mxu0 %v5334_v25 }
 0x881   : > { %3372 = vmatmul.mubr.bf16.gmra.mrb[120].mxu1 %v7252_v48  ;;  %v5335_v48 = vld [vmem:[#allocation13 + $0x10] sm:$0xff]  }
 0x882   : > { %3381 = vmatprep.mubr.bf16.mxu1 %v6049_v3  ;;  %4717 = vmatpush3.bf16.msra.mxu0 %v5335_v48 }
 0x883   : > { %4718 = vmatprep.subr.bf16.mxu0 %v5336_v43 }
 0x886   : > { %4719 = vmatpush3.bf16.msra.mxu0 %v5337_v56 }
 0x887   : > { %4720 = vmatprep.subr.bf16.mxu0 %v5338_v42 }
 0x889   : > { %3382 = vmatmul.mubr.bf16.gmra.mrb[124].mxu1 %v7262_v47  ;;  %v5341_v47 = vld [vmem:[#allocation13 + $0x68] sm:$0xff]  }
 0x88a   : > { %3391 = vmatprep.mubr.bf16.mxu1 %v6049_v3  ;;  %4721 = vmatpush3.bf16.msra.mxu0 %v5339_v63 }
 0x88b   : > { %4722 = vmatprep.subr.bf16.mxu0 %v5341_v47 }
 0x88e   : > { %4723 = vmatpush3.bf16.msra.mxu0 %v5342_v0 }
 0x88f   : > { %4724 = vmatprep.subr.bf16.mxu0 %v5344_v11 }
 0x891   : > { %3392 = vmatmul.mubr.bf16.gmra.mrb[128].mxu1 %v2801_v61  ;;  %v5349_v61 = vld [vmem:[#allocation13 + $0x38] sm:$0xff]  }
 0x892   : > { %3401 = vmatprep.mubr.bf16.mxu1 %v6049_v3  ;;  %4725 = vmatpush3.bf16.msra.mxu0 %v5345_v24 }
 0x893   : > { %4726 = vmatprep.subr.bf16.mxu0 %v5348_v27 }
 0x896   : > { %4727 = vmatpush3.bf16.msra.mxu0 %v5349_v61 }
 0x899   : > { %3402 = vmatmul.mubr.bf16.gmra.mrb[132].mxu1 %v2802_v53 }
 0x89a   : > { %3411 = vmatprep.mubr.bf16.mxu1 %v6049_v3 }
 0x8a1   : > { %3412 = vmatmul.mubr.bf16.gmra.mrb[136].mxu1 %v2803_v45 }
 0x8a2   : > { %3421 = vmatprep.mubr.bf16.mxu1 %v6049_v3  ;;  %v5343_v3 = vld [vmem:[#allocation13 + $0x88] sm:$0xff]  }
 0x8a3   : > { %4986 = vmatprep.subr.bf16.mxu1 %v5343_v3 }
 0x8a4   : > { %4987 = vmatpush3.bf16.msra.mxu1 %v5343_v3 }
 0x8a5   : > { %4988 = vmatprep.subr.bf16.mxu1 %v5346_v12 }
 0x8a8   : > { %4989 = vmatpush3.bf16.msra.mxu1 %v5346_v12 }
 0x8a9   : > { %3422 = vmatmul.mubr.bf16.gmra.mrb[140].mxu1 %v2804_v16  ;;  %4990 = vmatprep.subr.bf16.mxu1 %v5347_v40 }
 0x8ac   : > { %4991 = vmatpush3.bf16.msra.mxu1 %v5347_v40 }
 0x8ad   : > { %4992 = vmatprep.subr.bf16.mxu1 %v5350_v51 }
 0x8b0   : > { %4993 = vmatpush3.bf16.msra.mxu1 %v5350_v51 }
 0x8b1   : > { %4994 = vmatprep.subr.bf16.mxu1 %v5351_v1 }
 0x8b4   : > { %4995 = vmatpush3.bf16.msra.mxu1 %v5351_v1 }
 0x8b5   : > { %4996 = vmatprep.subr.bf16.mxu1 %v5352_v4 }
 0x8b8   : > { %4997 = vmatpush3.bf16.msra.mxu1 %v5352_v4 }
 0x8b9   : > { %4998 = vmatprep.subr.bf16.mxu1 %v5353_v59 }
 0x8bc   : > { %4999 = vmatpush3.bf16.msra.mxu1 %v5353_v59 }
 0x8d9   : > { %v3127_v8 = vpop.f32.mrb[80].mxu1  ;;  %v7302_v31 = vpop.f32.mrb[80].mxu0 }
 0x8da   : > { %v4537_v32 = vmul.f32 -1.442695, %v3127_v8  ;;  %v7304_v6 = vpop.f32.mrb[81].mxu1  ;;  %v3242_v23 = vpop.f32.mrb[81].mxu0  ;;  %v4539_v24 = vmul.f32 -1.442695, %v7302_v31 }
 0x8db   : > { %v3131_v30 = vpop.f32.mrb[82].mxu1  ;;  %v7306_v34 = vpop.f32.mrb[82].mxu0 }
 0x8dc   : > { %5546 = vpow2.f32 %v4537_v32  ;;  %v4540_v35 = vmul.f32 -1.442695, %v3131_v30  ;;  %v7308_v7 = vpop.f32.mrb[83].mxu1  ;;  %v3246_v17 = vpop.f32.mrb[83].mxu0  ;;  %v4542_v32 = vmul.f32 -1.442695, %v7306_v34 }
 0x8de   : > { %5548 = vpow2.f32 %v4540_v35 }
 0x8e1   : > { %v3137_v10 = vpop.f32.mrb[84].mxu1  ;;  %v7310_v57 = vpop.f32.mrb[84].mxu0 }
 0x8e2   : > { %v4543_v53 = vmul.f32 -1.442695, %v3137_v10  ;;  %v7312_v62 = vpop.f32.mrb[85].mxu1  ;;  %v3252_v60 = vpop.f32.mrb[85].mxu0 }
 0x8e3   : > { %v3141_v19 = vpop.f32.mrb[86].mxu1  ;;  %v7314_v58 = vpop.f32.mrb[86].mxu0  ;;  %v4544_v61 = vmul.f32 -1.442695, %v7312_v62 }
 0x8e4   : > { %5550 = vpow2.f32 %v4543_v53  ;;  %v4546_v49 = vmul.f32 -1.442695, %v3141_v19  ;;  %v7316_v45 = vpop.f32.mrb[87].mxu1  ;;  %v3256_v38 = vpop.f32.mrb[87].mxu0  ;;  %v4548_v4 = vmul.f32 -1.442695, %v7314_v58 }
 0x8e6   : > { %v5547_v29 = vpop.eup %5546  ;;  %5552 = vpow2.f32 %v4546_v49 }
 0x8e7   : > { %v3576_v20 = vadd.f32 1.0, %v5547_v29 }
 0x8e8   : > { %v5549_v14 = vpop.eup %5548 }
 0x8e9   : > { %5554 = vrcp.f32 %v3576_v20  ;;  %v3579_v16 = vadd.f32 1.0, %v5549_v14 }
 0x8eb   : > { %5556 = vrcp.f32 %v3579_v16 }
 0x8ee   : > { %v5551_v9 = vpop.eup %5550 }
 0x8ef   : > { %v3582_v33 = vadd.f32 1.0, %v5551_v9  ;;  %v4547_v9 = vmul.f32 -1.442695, %v7316_v45 }
 0x8f0   : > { %v5553_v37 = vpop.eup %5552 }
 0x8f1   : > { %5558 = vrcp.f32 %v3582_v33  ;;  %v3585_v54 = vadd.f32 1.0, %v5553_v37 }
 0x8f3   : > { %v5555_v25 = vpop.eup %5554  ;;  %5560 = vrcp.f32 %v3585_v54 }
 0x8f4   : > { %v3720_v48 = vmul.f32 %v5555_v25, %v3127_v8  ;;  %v4538_v8 = vmul.f32 -1.442695, %v7304_v6  ;;  %5562 = vpow2.f32 %v4539_v24 }
 0x8f5   : > { %v5557_v5 = vpop.eup %5556 }
 0x8f6   : > { %v7318_v43 = vmul.f32 %v3720_v48, %v3242_v23  ;;  %v3723_v56 = vmul.f32 %v5557_v5, %v3131_v30  ;;  %5564 = vpow2.f32 %v4538_v8  ;;  %v4541_v23 = vmul.f32 -1.442695, %v7308_v7 }
 0x8f7   : > { %5566 = vpow2.f32 %v4542_v32  ;;  %v4545_v30 = vmul.f32 -1.442695, %v7310_v57 }
 0x8f8   : > { %v7320_v42 = vmul.f32 %v3723_v56, %v3246_v17  ;;  %5568 = vpow2.f32 %v4541_v23 }
 0x8f9   : > { %5570 = vpow2.f32 %v4545_v30 }
 0x8fb   : > { %v5559_v63 = vpop.eup %5558 }
 0x8fc   : > { %v3726_v3 = vmul.f32 %v5559_v63, %v3137_v10 }
 0x8fd   : > { %v5561_v0 = vpop.eup %5560 }
 0x8fe   : > { %v7324_v12 = vmul.f32 %v3726_v3, %v3252_v60  ;;  %v3729_v40 = vmul.f32 %v5561_v0, %v3141_v19  ;;  %v5563_v27 = vpop.eup %5562 }
 0x900   : > { %v7326_v11 = vmul.f32 %v3729_v40, %v3256_v38  ;;  %v5565_v1 = vpop.eup %5564  ;;  %v3578_v38 = vadd.f32 1.0, %v5563_v27 }
 0x901   : > { %v5567_v49 = vpop.eup %5566  ;;  %v3577_v16 = vadd.f32 1.0, %v5565_v1 }
 0x902   : > { %v3581_v33 = vadd.f32 1.0, %v5567_v49  ;;  %v5569_v3 = vpop.eup %5568 }
 0x903   : > { %v5571_v30 = vpop.eup %5570 }
 0x914   : > { %v7336_v35 = vpop.f32.mrb[88].mxu1  ;;  %v7338_v17 = vpop.f32.mrb[88].mxu0 }
 0x915   : > { %v4549_v10 = vmul.f32 -1.442695, %v7336_v35  ;;  %v7342_v53 = vpop.f32.mrb[89].mxu1  ;;  %v7344_v60 = vpop.f32.mrb[89].mxu0  ;;  %v4551_v37 = vmul.f32 -1.442695, %v7338_v17 }
 0x916   : > { %v7346_v19 = vpop.f32.mrb[90].mxu1  ;;  %v7348_v59 = vpop.f32.mrb[90].mxu0  ;;  %v4550_v48 = vmul.f32 -1.442695, %v7342_v53 }
 0x917   : > { %5572 = vpow2.f32 %v4549_v10  ;;  %v4552_v29 = vmul.f32 -1.442695, %v7346_v19  ;;  %v7351_v20 = vpop.f32.mrb[91].mxu1  ;;  %v7353_v14 = vpop.f32.mrb[91].mxu0  ;;  %v4554_v24 = vmul.f32 -1.442695, %v7348_v59 }
 0x918   : > { %5574 = vpow2.f32 %v4544_v61  ;;  %v3580_v61 = vadd.f32 1.0, %v5569_v3  ;;  %v4553_v10 = vmul.f32 -1.442695, %v7351_v20 }
 0x919   : > { %5576 = vpow2.f32 %v4548_v4 }
 0x91a   : > { %5578 = vpow2.f32 %v4552_v29  ;;  %v3584_v29 = vadd.f32 1.0, %v5571_v30 }
 0x91b   : > { %5580 = vrcp.f32 %v3578_v38 }
 0x91c   : > { %5582 = vrcp.f32 %v3577_v16  ;;  %v7357_v54 = vpop.f32.mrb[92].mxu1  ;;  %v7359_v25 = vpop.f32.mrb[92].mxu0 }
 0x91d   : > { %7805 = vst [vmem:[#allocation39_spill] sm:$0xff] %v7359_v25  ;;  %5584 = vpow2.f32 %v4547_v9  ;;  %v4555_v5 = vmul.f32 -1.442695, %v7357_v54  ;;  %v7363_v56 = vpop.f32.mrb[93].mxu1  ;;  %v7365_v63 = vpop.f32.mrb[93].mxu0 }
 0x91e   : > { %7806 = vst [vmem:[#allocation40_spill] sm:$0xff] %v7363_v56  ;;  %5586 = vrcp.f32 %v3581_v33  ;;  %v7367_v0 = vpop.f32.mrb[94].mxu1  ;;  %v7369_v40 = vpop.f32.mrb[94].mxu0  ;;  %v4556_v41 = vmul.f32 -1.442695, %v7363_v56 }
 0x91f   : > { %7807 = vst [vmem:[#allocation41_spill] sm:$0xff] %v7369_v40  ;;  %5588 = vpow2.f32 %v4555_v5  ;;  %v4558_v8 = vmul.f32 -1.442695, %v7367_v0  ;;  %v7373_v32 = vpop.f32.mrb[95].mxu1  ;;  %v7375_v23 = vpop.f32.mrb[95].mxu0 }
 0x920   : > { %7808 = vst [vmem:[#allocation42_spill] sm:$0xff] %v7373_v32  ;;  %5590 = vpow2.f32 %v4551_v37 }
 0x921   : > { %v5573_v27 = vpop.eup %5572  ;;  %5592 = vpow2.f32 %v4550_v48 }
 0x922   : > { %v5575_v1 = vpop.eup %5574  ;;  %v3588_v4 = vadd.f32 1.0, %v5573_v27  ;;  %5594 = vpow2.f32 %v4558_v8 }
 0x923   : > { %v5577_v49 = vpop.eup %5576  ;;  %5596 = vpow2.f32 %v4554_v24  ;;  %v3583_v37 = vadd.f32 1.0, %v5575_v1 }
 0x924   : > { %v5579_v38 = vpop.eup %5578  ;;  %5598 = vrcp.f32 %v3588_v4  ;;  %v7378_v16 = vpop.f32.mrb[96].mxu1  ;;  %v3587_v27 = vadd.f32 1.0, %v5577_v49 }
 0x925   : > { %v7380_v9 = vpop.f32.mrb[96].mxu0  ;;  %v7382_v33 = vpop.eup %5580  ;;  %5600 = vrcp.f32 %v3580_v61  ;;  %v3591_v5 = vadd.f32 1.0, %v5579_v38  ;;  %v4561_v4 = vmul.f32 -1.442695, %v7378_v16 }
 0x926   : > { %7809 = vst [vmem:[#allocation43_spill] sm:$0xff] %v7380_v9  ;;  %v7384_v48 = vpop.f32.mrb[97].mxu1  ;;  %v7386_v3 = vpop.eup %5582  ;;  %5602 = vpow2.f32 %v4553_v10  ;;  %v4557_v10 = vmul.f32 -1.442695, %v7359_v25 }
 0x927   : > { %7810 = vst [vmem:[#allocation44_spill] sm:$0xff] %v7384_v48  ;;  %v7388_v8 = vpop.f32.mrb[97].mxu0  ;;  %v7390_v24 = vpop.f32.mrb[98].mxu1  ;;  %5604 = vrcp.f32 %v3591_v5 }
 0x928   : > { %v5585_v30 = vpop.eup %5584  ;;  %v7393_v51 = vpop.f32.mrb[98].mxu0  ;;  %5606 = vrcp.f32 %v3584_v29  ;;  %v4564_v44 = vmul.f32 -1.442695, %v7390_v24 }
 0x929   : > { %7811 = vst [vmem:[#allocation45_spill] sm:$0xff] %v7393_v51  ;;  %v7395_v47 = vpop.f32.mrb[99].mxu1  ;;  %v7397_v61 = vpop.eup %5586  ;;  %5608 = vrcp.f32 %v3583_v37  ;;  %v3586_v18 = vadd.f32 1.0, %v5585_v30  ;;  %v4560_v37 = vmul.f32 -1.442695, %v7369_v40 }
 0x92a   : > { %7812 = vst [vmem:[#allocation46_spill] sm:$0xff] %v7395_v47  ;;  %v7399_v1 = vpop.f32.mrb[99].mxu0  ;;  %v5589_v38 = vpop.eup %5588  ;;  %5610 = vrcp.f32 %v3587_v27 }
 0x92b   : > { %v5591_v49 = vpop.eup %5590  ;;  %v3594_v46 = vadd.f32 1.0, %v5589_v38  ;;  %5612 = vpow2.f32 %v4561_v4 }
 0x92c   : > { %v5593_v5 = vpop.eup %5592  ;;  %v7403_v21 = vpop.f32.mrb[100].mxu1  ;;  %v3590_v30 = vadd.f32 1.0, %v5591_v49 }
 0x92d   : > { %v5595_v2 = vpop.eup %5594  ;;  %5614 = vrcp.f32 %v3594_v46  ;;  %v7405_v55 = vpop.f32.mrb[100].mxu0  ;;  %v3589_v28 = vadd.f32 1.0, %v5593_v5 }
 0x92e   : > { %7813 = vst [vmem:[#allocation47_spill] sm:$0xff] %v7405_v55  ;;  %v5597_v29 = vpop.eup %5596  ;;  %5616 = vpow2.f32 %v4557_v10  ;;  %v3597_v52 = vadd.f32 1.0, %v5595_v2  ;;  %v7408_v22 = vpop.f32.mrb[101].mxu1 }
 0x92f   : > { %7814 = vst [vmem:[#allocation48_spill] sm:$0xff] %v7408_v22  ;;  %v5599_v27 = vpop.eup %5598  ;;  %5618 = vrcp.f32 %v3586_v18  ;;  %v7410_v38 = vpop.f32.mrb[101].mxu0  ;;  %v3593_v15 = vadd.f32 1.0, %v5597_v29 }
 0x930   : > { %v7412_v4 = vpop.f32.mrb[102].mxu1  ;;  %v7414_v46 = vpop.eup %5600  ;;  %v3732_v39 = vmul.f32 %v5599_v27, %v7336_v35  ;;  %5620 = vrcp.f32 %v3597_v52  ;;  %v4567_v35 = vmul.f32 -1.442695, %v7403_v21 }
 0x931   : > { %v7418_v10 = vpop.f32.mrb[102].mxu0  ;;  %v7420_v2 = vpop.f32.mrb[103].mxu1  ;;  %5622 = vpow2.f32 %v4556_v41  ;;  %v4570_v40 = vmul.f32 -1.442695, %v7412_v4 }
 0x932   : > { %7815 = vst [vmem:[#allocation49_spill] sm:$0xff] %v7418_v10  ;;  %v5603_v36 = vpop.eup %5602  ;;  %v7422_v18 = vpop.f32.mrb[103].mxu0  ;;  %v7425_v50 = vmul.f32 %v3732_v39, %v7344_v60  ;;  %5624 = vpow2.f32 %v4560_v37 }
 0x933   : > { %v5605_v49 = vpop.eup %5604  ;;  %5626 = vrcp.f32 %v3590_v30  ;;  %v3592_v26 = vadd.f32 1.0, %v5603_v36 }
 0x934   : > { %7816 = vst [vmem:[#allocation50_spill] sm:$0xff] %v7425_v50  ;;  %v7427_v13 = vpop.eup %5606  ;;  %v3735_v52 = vmul.f32 %v5605_v49, %v7346_v19  ;;  %5628 = vpow2.f32 %v4564_v44  ;;  %v7438_v39 = vpop.f32.mrb[104].mxu1  ;;  %v4559_v19 = vmul.f32 -1.442695, %v7373_v32 }
 0x935   : > { %v7431_v27 = vpop.eup %5608  ;;  %5630 = vrcp.f32 %v3589_v28  ;;  %7818 = vst [vmem:[#allocation52_spill] sm:$0xff] %v7438_v39  ;;  %v7440_v60 = vpop.f32.mrb[104].mxu0  ;;  %v4563_v28 = vmul.f32 -1.442695, %v7380_v9 }
 0x936   : > { %v7433_v41 = vpop.eup %5610  ;;  %v7436_v5 = vmul.f32 %v3735_v52, %v7353_v14  ;;  %5632 = vrcp.f32 %v3593_v15  ;;  %v7443_v37 = vpop.f32.mrb[105].mxu1 }
 0x937   : > { %v5613_v29 = vpop.eup %5612  ;;  %5634 = vpow2.f32 %v4567_v35  ;;  %v7448_v14 = vpop.f32.mrb[105].mxu0 }
 0x938   : > { %7817 = vst [vmem:[#allocation51_spill] sm:$0xff] %v7436_v5  ;;  %v5615_v30 = vpop.eup %5614  ;;  %v3600_v44 = vadd.f32 1.0, %v5613_v29  ;;  %7819 = vst [vmem:[#allocation53_spill] sm:$0xff] %v7448_v14  ;;  %v7450_v49 = vpop.f32.mrb[106].mxu1  ;;  %5636 = vrcp.f32 %v3592_v26  ;;  %v4562_v29 = vmul.f32 -1.442695, %v7384_v48 }
 0x939   : > { %v5617_v52 = vpop.eup %5616  ;;  %v3738_v15 = vmul.f32 %v5615_v30, %v7357_v54  ;;  %v7454_v32 = vpop.f32.mrb[106].mxu0  ;;  %v4566_v26 = vmul.f32 -1.442695, %v7393_v51  ;;  %v4565_v5 = vmul.f32 -1.442695, %v7395_v47 }
 0x93a   : > { %v7456_v25 = vpop.f32.mrb[107].mxu1  ;;  %v7458_v56 = vpop.eup %5618  ;;  %5638 = vrcp.f32 %v3600_v44  ;;  %v3596_v30 = vadd.f32 1.0, %v5617_v52  ;;  %v4569_v52 = vmul.f32 -1.442695, %v7405_v55 }
 0x93b   : > { %v7461_v35 = vpop.f32.mrb[107].mxu0  ;;  %v5621_v36 = vpop.eup %5620  ;;  %v7464_v9 = vmul.f32 %v3738_v15, %v7365_v63  ;;  %5640 = vpow2.f32 %v4559_v19 }
 0x93c   : > { %7820 = vst [vmem:[#allocation54_spill] sm:$0xff] %v7461_v35  ;;  %v5623_v54 = vpop.eup %5622  ;;  %v3741_v14 = vmul.f32 %v5621_v36, %v7367_v0  ;;  %5642 = vpow2.f32 %v4563_v28  ;;  %v7474_v63 = vpop.f32.mrb[108].mxu1  ;;  %v4568_v28 = vmul.f32 -1.442695, %v7408_v22 }
 0x93d   : > { %7821 = vst [vmem:[#allocation55_spill] sm:$0xff] %v7464_v9  ;;  %v5625_v50 = vpop.eup %5624  ;;  %5644 = vpow2.f32 %v4570_v40  ;;  %v7476_v19 = vpop.f32.mrb[108].mxu0  ;;  %v3595_v40 = vadd.f32 1.0, %v5623_v54 }
 0x93e   : > { %v7469_v44 = vpop.eup %5626  ;;  %v7472_v35 = vmul.f32 %v3741_v14, %v7375_v23  ;;  %5646 = vpow2.f32 %v4562_v29  ;;  %v7479_v0 = vpop.f32.mrb[109].mxu1  ;;  %v3599_v9 = vadd.f32 1.0, %v5625_v50 }
 0x93f   : > { %v5629_v15 = vpop.eup %5628  ;;  %5648 = vpow2.f32 %v4566_v26  ;;  %v7485_v14 = vpop.f32.mrb[109].mxu0 }
 0x940   : > { %7822 = vst [vmem:[#allocation56_spill] sm:$0xff] %v7472_v35  ;;  %v7481_v36 = vpop.eup %5630  ;;  %5650 = vrcp.f32 %v3596_v30  ;;  %v3603_v23 = vadd.f32 1.0, %v5629_v15  ;;  %7823 = vst [vmem:[#allocation57_spill] sm:$0xff] %v7485_v14  ;;  %v7487_v29 = vpop.f32.mrb[110].mxu1  ;;  %v4573_v30 = vmul.f32 -1.442695, %v7438_v39  ;;  %v3721_v35 = vmul.f32 %v7386_v3, %v7304_v6 }
 0x941   : > { %v7489_v51 = vpop.eup %5632  ;;  %5652 = vpow2.f32 %v4565_v5  ;;  %v7491_v26 = vpop.f32.mrb[110].mxu0 }
 0x942   : > { %7824 = vst [vmem:[#allocation58_spill] sm:$0xff] %v7491_v26  ;;  %v7493_v55 = vpop.f32.mrb[111].mxu1  ;;  %v5635_v47 = vpop.eup %5634  ;;  %5654 = vrcp.f32 %v3603_v23  ;;  %v4572_v23 = vmul.f32 -1.442695, %v7418_v10 }
 0x943   : > { %v7496_v54 = vpop.f32.mrb[111].mxu0  ;;  %v7498_v48 = vpop.eup %5636  ;;  %v3606_v15 = vadd.f32 1.0, %v5635_v47  ;;  %5656 = vpow2.f32 %v4569_v52  ;;  %v3725_v47 = vmul.f32 %v7397_v61, %v7306_v34  ;;  %v3724_v52 = vmul.f32 %v7414_v46, %v7308_v7 }
 0x944   : > { %7825 = vst [vmem:[#allocation59_spill] sm:$0xff] %v7496_v54  ;;  %v5639_v14 = vpop.eup %5638  ;;  %5658 = vrcp.f32 %v3595_v40  ;;  %v3722_v54 = vmul.f32 %v7382_v33, %v7302_v31  ;;  %v3353_v50 = vpop.f32.mrb[112].mxu1 }
 0x945   : > { %v5641_v5 = vpop.eup %5640  ;;  %v3744_v26 = vmul.f32 %v5639_v14, %v7378_v16  ;;  %5660 = vrcp.f32 %v3606_v15  ;;  %v4571_v16 = vmul.f32 -1.442695, %v7420_v2  ;;  %v3769_v3 = vmul.f32 %v3721_v35, %v3353_v50  ;;  %v3355_v14 = vpop.f32.mrb[113].mxu1 }
 0x946   : > { %v5643_v39 = vpop.eup %5642  ;;  %5662 = vpow2.f32 %v4573_v30  ;;  %v3598_v31 = vadd.f32 1.0, %v5641_v5  ;;  %v3770_v10 = vmul.f32 %v3722_v54, %v3355_v14  ;;  %v3357_v34 = vpop.f32.mrb[114].mxu1  ;;  %v3728_v54 = vmul.f32 %v7427_v13, %v7310_v57 }
 0x947   : > { %v5645_v40 = vpop.eup %5644  ;;  %v7512_v6 = vmul.f32 %v3744_v26, %v7388_v8  ;;  %5664 = vpow2.f32 %v4568_v28  ;;  %v3602_v22 = vadd.f32 1.0, %v5643_v39  ;;  %v3772_v7 = vmul.f32 %v3724_v52, %v3357_v34  ;;  %v3359_v46 = vpop.f32.mrb[115].mxu1 }
 0x948   : > { %v5647_v15 = vpop.eup %5646  ;;  %5666 = vrcp.f32 %v3599_v9  ;;  %v3609_v33 = vadd.f32 1.0, %v5645_v40  ;;  %v4576_v8 = vmul.f32 -1.442695, %v7450_v49  ;;  %v3773_v28 = vmul.f32 %v3725_v47, %v3359_v46 }
 0x949   : > { %v5649_v61 = vpop.eup %5648  ;;  %5668 = vpow2.f32 %v4572_v23  ;;  %v3601_v35 = vadd.f32 1.0, %v5647_v15  ;;  %v3817_v50 = vpack.c.bf16 %v3772_v7, %v3769_v3  ;;  %v3727_v52 = vmul.f32 %v7431_v27, %v7312_v62 }
 0x94a   : > { %v7515_v30 = vpop.eup %5650  ;;  %5670 = vrcp.f32 %v3609_v33  ;;  %v3605_v5 = vadd.f32 1.0, %v5649_v61  ;;  %v3818_v39 = vpack.c.bf16 %v3773_v28, %v3770_v10  ;;  %v4579_v47 = vmul.f32 -1.442695, %v7474_v63 }
 0x94b   : > { %v5653_v26 = vpop.eup %5652  ;;  %5672 = vpow2.f32 %v4571_v16  ;;  %4064 = vmatprep.mubr.bf16.mxu0 %v3817_v50  ;;  %v3731_v16 = vmul.f32 %v7433_v41, %v7314_v58  ;;  %v3730_v13 = vmul.f32 %v7458_v56, %v7316_v45  ;;  %v7826_v62 = vpack.c.bf16 %v7320_v42, %v7318_v43 }
 0x94c   : > { %v5655_v9 = vpop.eup %5654  ;;  %5674 = vrcp.f32 %v3598_v31  ;;  %v3604_v57 = vadd.f32 1.0, %v5653_v26  ;;  %v3363_v10 = vpop.f32.mrb[116].mxu1  ;;  %5000 = vmatprep.mubr.bf16.mxu1 %v3818_v39  ;;  %v4575_v27 = vmul.f32 -1.442695, %v7440_v60  ;;  %v4582_v46 = vmul.f32 -1.442695, %v7487_v29 }
 0x94d   : > { %v5657_v23 = vpop.eup %5656  ;;  %5676 = vrcp.f32 %v3602_v22  ;;  %v3747_v40 = vmul.f32 %v5655_v9, %v7390_v24  ;;  %4065 = vmatmul.mubr.bf16.vlgmr.msra.gmra.mrb[112].mxu0 %v7826_v62  ;;  %v3775_v3 = vmul.f32 %v3727_v52, %v3363_v10  ;;  %v3365_v58 = vpop.f32.mrb[117].mxu1  ;;  %v4574_v28 = vmul.f32 -1.442695, %v7443_v37 }
 0x94e   : > { %v7524_v14 = vpop.eup %5658  ;;  %5678 = vpow2.f32 %v4576_v8  ;;  %v3608_v56 = vadd.f32 1.0, %v5657_v23  ;;  %v3776_v15 = vmul.f32 %v3728_v54, %v3365_v58  ;;  %v3367_v31 = vpop.f32.mrb[118].mxu1  ;;  %v4577_v39 = vmul.f32 -1.442695, %v7456_v25 }
 0x94f   : > { %v5661_v22 = vpop.eup %5660  ;;  %5680 = vrcp.f32 %v3601_v35  ;;  %v7534_v24 = vmul.f32 %v3747_v40, %v7399_v1  ;;  %v3778_v34 = vmul.f32 %v3730_v13, %v3367_v31  ;;  %v3369_v1 = vpop.f32.mrb[119].mxu1  ;;  %v3734_v52 = vmul.f32 %v7469_v44, %v7338_v17 }
 0x950   : > { %v5663_v41 = vpop.eup %5662  ;;  %5682 = vrcp.f32 %v3605_v5  ;;  %v3750_v45 = vmul.f32 %v5661_v22, %v7403_v21  ;;  %v3779_v21 = vmul.f32 %v3731_v16, %v3369_v1  ;;  %v3733_v5 = vmul.f32 %v7481_v36, %v7342_v53 }
 0x951   : > { %v5665_v33 = vpop.eup %5664  ;;  %v3828_v43 = vpack.c.bf16 %v7534_v24, %v7512_v6  ;;  %v3612_v42 = vadd.f32 1.0, %v5663_v41  ;;  %5684 = vpow2.f32 %v4579_v47  ;;  %v3820_v26 = vpack.c.bf16 %v3778_v34, %v3775_v3 }
 0x952   : > { %v7540_v61 = vpop.eup %5666  ;;  %5686 = vrcp.f32 %v3604_v57  ;;  %v7543_v7 = vmul.f32 %v3750_v45, %v7410_v38  ;;  %v3607_v50 = vadd.f32 1.0, %v5665_v33  ;;  %v3821_v9 = vpack.c.bf16 %v3779_v21, %v3776_v15  ;;  %v7829_v21 = vld [vmem:[#allocation39_spill] sm:$0xff] }
 0x953   : > { %v5669_v8 = vpop.eup %5668  ;;  %5688 = vrcp.f32 %v3612_v42  ;;  %4072 = vmatprep.mubr.bf16.mxu0 %v3820_v26  ;;  %v3737_v40 = vmul.f32 %v7489_v51, %v7348_v59  ;;  %v4578_v47 = vmul.f32 -1.442695, %v7454_v32  ;;  %v7827_v53 = vpack.c.bf16 %v7326_v11, %v7324_v12  ;;  %v7828_v42 = vld [vmem:[#allocation40_spill] sm:$0xff] }
 0x954   : > { %v5671_v35 = vpop.eup %5670  ;;  %5690 = vpow2.f32 %v4575_v27  ;;  %v3373_v16 = vpop.f32.mrb[120].mxu1  ;;  %5001 = vmatmul.mubr.bf16.vlgmr.msra.gmra.mrb[144].mxu1 %v3821_v9  ;;  %v3736_v36 = vmul.f32 %v7498_v48, %v7351_v20  ;;  %v3611_v44 = vadd.f32 1.0, %v5669_v8  ;;  %v4580_v58 = vmul.f32 -1.442695, %v7479_v0 }
 0x955   : > { %v5673_v54 = vpop.eup %5672  ;;  %5692 = vrcp.f32 %v3608_v56  ;;  %v3753_v38 = vmul.f32 %v5671_v35, %v7412_v4  ;;  %4073 = vmatmul.mubr.bf16.gmra.mrb[116].mxu0 %v7827_v53  ;;  %v3781_v17 = vmul.f32 %v3733_v5, %v3373_v16  ;;  %v3375_v51 = vpop.f32.mrb[121].mxu1  ;;  %v4581_v15 = vmul.f32 -1.442695, %v7476_v19  ;;  %v7831_v35 = vld [vmem:[#allocation58_spill] sm:$0xff] }
 0x956   : > { %v5675_v23 = vpop.eup %5674  ;;  %5694 = vpow2.f32 %v4582_v46  ;;  %v3610_v57 = vadd.f32 1.0, %v5673_v54  ;;  %v3782_v10 = vmul.f32 %v3734_v52, %v3375_v51  ;;  %v3377_v62 = vpop.f32.mrb[122].mxu1  ;;  %v3739_v34 = vmul.f32 %v7524_v14, %v7828_v42  ;;  %v7832_v54 = vld [vmem:[#allocation51_spill] sm:$0xff]  ;;  %v7833_v5 = vld [vmem:[#allocation50_spill] sm:$0xff] }
 0x957   : > { %v7559_v4 = vpop.eup %5676  ;;  %v7564_v13 = vmul.f32 %v3753_v38, %v7422_v18  ;;  %5696 = vpow2.f32 %v4574_v28  ;;  %v3784_v27 = vmul.f32 %v3736_v36, %v3377_v62  ;;  %v3379_v20 = vpop.f32.mrb[123].mxu1  ;;  %v4583_v1 = vmul.f32 -1.442695, %v7493_v55  ;;  %v7830_v28 = vld [vmem:[#allocation52_spill] sm:$0xff]  ;;  %v7837_v36 = vld [vmem:[#allocation53_spill] sm:$0xff] }
 0x958   : > { %v5679_v59 = vpop.eup %5678  ;;  %5698 = vrcp.f32 %v3607_v50  ;;  %v3785_v18 = vmul.f32 %v3737_v40, %v3379_v20  ;;  %v3740_v8 = vmul.f32 %v7515_v30, %v7829_v21  ;;  %v4584_v50 = vmul.f32 -1.442695, %v7831_v35  ;;  %v7836_v30 = vld [vmem:[#allocation41_spill] sm:$0xff] }
 0x959   : > { %v5681_v12 = vpop.eup %5680  ;;  %v3831_v11 = vpack.c.bf16 %v7564_v13, %v7543_v7  ;;  %v3615_v22 = vadd.f32 1.0, %v5679_v59  ;;  %5700 = vpow2.f32 %v4577_v39  ;;  %v3823_v41 = vpack.c.bf16 %v3784_v27, %v3781_v17  ;;  %v7835_v39 = vld [vmem:[#allocation42_spill] sm:$0xff] }
 0x95a   : > { %v7568_v48 = vpop.eup %5682  ;;  %5702 = vpow2.f32 %v4578_v47  ;;  %v3824_v31 = vpack.c.bf16 %v3785_v18, %v3782_v10  ;;  %v7834_v38 = vpack.c.bf16 %v7832_v54, %v7833_v5  ;;  %v3742_v52 = vmul.f32 %v5675_v23, %v7835_v39  ;;  %v7844_v39 = vld [vmem:[#allocation45_spill] sm:$0xff] }
 0x95b   : > { %v5685_v3 = vpop.eup %5684  ;;  %5704 = vrcp.f32 %v3615_v22  ;;  %4080 = vmatprep.mubr.bf16.mxu0 %v3823_v41  ;;  %v3743_v53 = vmul.f32 %v7540_v61, %v7836_v30  ;;  %v7838_v41 = vld [vmem:[#allocation44_spill] sm:$0xff] }
 0x95c   : > { %v5687_v45 = vpop.eup %5686  ;;  %5706 = vrcp.f32 %v3611_v44  ;;  %v3618_v56 = vadd.f32 1.0, %v5685_v3  ;;  %v3383_v9 = vpop.f32.mrb[124].mxu1  ;;  %5004 = vmatprep.mubr.bf16.mxu1 %v3824_v31 }
 0x95d   : > { %v5689_v33 = vpop.eup %5688  ;;  %5708 = vrcp.f32 %v3610_v57  ;;  %4081 = vmatmul.mubr.bf16.gmra.mrb[120].mxu0 %v7834_v38  ;;  %v3787_v40 = vmul.f32 %v3739_v34, %v3383_v9  ;;  %v3385_v47 = vpop.f32.mrb[125].mxu1  ;;  %v7843_v9 = vld [vmem:[#allocation46_spill] sm:$0xff] }
 0x95e   : > { %v5691_v46 = vpop.eup %5690  ;;  %v3756_v26 = vmul.f32 %v5689_v33, %v7830_v28  ;;  %5710 = vrcp.f32 %v3618_v56  ;;  %v3788_v51 = vmul.f32 %v3740_v8, %v3385_v47  ;;  %v3387_v59 = vpop.f32.mrb[126].mxu1  ;;  %v3745_v56 = vmul.f32 %v5681_v12, %v7838_v41  ;;  %v7839_v33 = vld [vmem:[#allocation43_spill] sm:$0xff]  ;;  %v7840_v8 = vld [vmem:[#allocation56_spill] sm:$0xff] }
 0x95f   : > { %v7582_v14 = vpop.eup %5692  ;;  %5712 = vpow2.f32 %v4580_v58  ;;  %v3790_v10 = vmul.f32 %v3742_v52, %v3387_v59  ;;  %v3389_v62 = vpop.f32.mrb[127].mxu1  ;;  %v3746_v42 = vmul.f32 %v7559_v4, %v7839_v33  ;;  %v7841_v28 = vld [vmem:[#allocation55_spill] sm:$0xff]  ;;  %v3748_v54 = vmul.f32 %v5687_v45, %v7843_v9  ;;  %v7845_v4 = vld [vmem:[#allocation54_spill] sm:$0xff] }
 0x960   : > { %v5695_v16 = vpop.eup %5694  ;;  %v7588_v17 = vmul.f32 %v3756_v26, %v7837_v36  ;;  %5714 = vpow2.f32 %v4581_v15  ;;  %v3791_v23 = vmul.f32 %v3743_v53, %v3389_v62  ;;  %v3614_v15 = vadd.f32 1.0, %v5691_v46 }
 0x961   : > { %v5697_v44 = vpop.eup %5696  ;;  %v3621_v57 = vadd.f32 1.0, %v5695_v16  ;;  %5716 = vpow2.f32 %v4583_v1  ;;  %v3826_v20 = vpack.c.bf16 %v3790_v10, %v3787_v40  ;;  %v7842_v26 = vpack.c.bf16 %v7840_v8, %v7841_v28  ;;  %v7850_v8 = vld [vmem:[#allocation59_spill] sm:$0xff] }
 0x962   : > { %v5699_v22 = vpop.eup %5698  ;;  %5718 = vpow2.f32 %v4584_v50  ;;  %v3613_v3 = vadd.f32 1.0, %v5697_v44  ;;  %v3827_v61 = vpack.c.bf16 %v3791_v23, %v3788_v51  ;;  %v3749_v52 = vmul.f32 %v7568_v48, %v7844_v39  ;;  %v7846_v48 = vld [vmem:[#allocation57_spill] sm:$0xff] }
 0x963   : > { %v5701_v27 = vpop.eup %5700  ;;  %5720 = vrcp.f32 %v3621_v57  ;;  %4088 = vmatprep.mubr.bf16.mxu0 %v3826_v20 }
 0x964   : > { %v5703_v18 = vpop.eup %5702  ;;  %v3616_v1 = vadd.f32 1.0, %v5701_v27  ;;  %v3393_v21 = vpop.f32.mrb[128].mxu1  ;;  %5005 = vmatmul.mubr.bf16.gmra.mrb[148].mxu1 %v3827_v61  ;;  %5722 = vrcp.f32 %v3613_v3  ;;  %v7848_v61 = vld [vmem:[#allocation47_spill] sm:$0xff] }
 0x965   : > { %v5705_v58 = vpop.eup %5704  ;;  %4089 = vmatmul.mubr.bf16.gmra.mrb[124].mxu0 %v7842_v26  ;;  %v3617_v5 = vadd.f32 1.0, %v5703_v18  ;;  %v3793_v12 = vmul.f32 %v3745_v56, %v3393_v21  ;;  %v3395_v46 = vpop.f32.mrb[129].mxu1  ;;  %5724 = vrcp.f32 %v3614_v15  ;;  %v7847_v18 = vld [vmem:[#allocation48_spill] sm:$0xff] }
 0x966   : > { %v5707_v31 = vpop.eup %5706  ;;  %v3759_v34 = vmul.f32 %v5705_v58, %v7450_v49  ;;  %v3794_v40 = vmul.f32 %v3746_v42, %v3395_v46  ;;  %v3397_v47 = vpop.f32.mrb[130].mxu1  ;;  %5726 = vrcp.f32 %v3616_v1  ;;  %v3752_v58 = vmul.f32 %v7582_v14, %v7848_v61 }
 0x967   : > { %v5709_v50 = vpop.eup %5708  ;;  %v3796_v53 = vmul.f32 %v3748_v54, %v3397_v47  ;;  %v3399_v36 = vpop.f32.mrb[131].mxu1  ;;  %5728 = vrcp.f32 %v3617_v5 }
 0x968   : > { %v5711_v38 = vpop.eup %5710  ;;  %v7601_v49 = vmul.f32 %v3759_v34, %v7845_v4  ;;  %v3797_v59 = vmul.f32 %v3749_v52, %v3399_v36  ;;  %v3754_v33 = vmul.f32 %v5709_v50, %v7420_v2 }
 0x969   : > { %v5713_v16 = vpop.eup %5712  ;;  %v3762_v30 = vmul.f32 %v5711_v38, %v7474_v63  ;;  %v3829_v10 = vpack.c.bf16 %v3796_v53, %v3793_v12  ;;  %v3751_v63 = vmul.f32 %v5699_v22, %v7847_v18  ;;  %v7849_v22 = vld [vmem:[#allocation49_spill] sm:$0xff] }
 0x96a   : > { %v5715_v45 = vpop.eup %5714  ;;  %v3834_v51 = vpack.c.bf16 %v7601_v49, %v7588_v17  ;;  %v3619_v23 = vadd.f32 1.0, %v5713_v16  ;;  %v3830_v27 = vpack.c.bf16 %v3797_v59, %v3794_v40  ;;  %v3755_v21 = vmul.f32 %v5707_v31, %v7849_v22 }
 0x96b   : > { %v5717_v44 = vpop.eup %5716  ;;  %v7607_v57 = vmul.f32 %v3762_v30, %v7846_v48  ;;  %v3620_v3 = vadd.f32 1.0, %v5715_v45  ;;  %4096 = vmatprep.mubr.bf16.mxu0 %v3829_v10 }
 0x96c   : > { %v5719_v62 = vpop.eup %5718  ;;  %v3622_v56 = vadd.f32 1.0, %v5717_v44  ;;  %v3403_v15 = vpop.f32.mrb[132].mxu1  ;;  %5008 = vmatprep.mubr.bf16.mxu1 %v3830_v27  ;;  %5730 = vrcp.f32 %v3619_v23 }
 0x96d   : > { %v5721_v20 = vpop.eup %5720  ;;  %4097 = vmatmul.mubr.bf16.gmra.mrb[128].mxu0 %v3828_v43  ;;  %v3623_v42 = vadd.f32 1.0, %v5719_v62  ;;  %v3799_v34 = vmul.f32 %v3751_v63, %v3403_v15  ;;  %v3405_v1 = vpop.f32.mrb[133].mxu1  ;;  %5732 = vrcp.f32 %v3620_v3 }
 0x96e   : > { %v3765_v41 = vmul.f32 %v5721_v20, %v7487_v29  ;;  %v3800_v14 = vmul.f32 %v3752_v58, %v3405_v1  ;;  %v3407_v26 = vpop.f32.mrb[134].mxu1  ;;  %v5723_v54 = vpop.eup %5722  ;;  %5734 = vrcp.f32 %v3622_v56 }
 0x96f   : > { %v3802_v29 = vmul.f32 %v3754_v33, %v3407_v26  ;;  %v3409_v9 = vpop.f32.mrb[135].mxu1  ;;  %v5725_v43 = vpop.eup %5724  ;;  %5736 = vrcp.f32 %v3623_v42  ;;  %v3757_v31 = vmul.f32 %v5723_v54, %v7443_v37  ;;  %v7852_v26 = vld [vmem:[#allocation24_spill] sm:$0xff]  ;;  %v7853_v54 = vld [vmem:[#allocation25_spill] sm:$0xff] }
 0x970   : > { %v3813_v28 = vmul.f32 %v3765_v41, %v7850_v8  ;;  %v3803_v24 = vmul.f32 %v3755_v21, %v3409_v9  ;;  %v5727_v50 = vpop.eup %5726  ;;  %v3758_v46 = vmul.f32 %v5725_v43, %v7440_v60  ;;  %v7851_v21 = vld [vmem:[#allocation23_spill] sm:$0xff] }
 0x971   : > { %v3832_v2 = vpack.c.bf16 %v3802_v29, %v3799_v34  ;;  %v5729_v12 = vpop.eup %5728  ;;  %v3760_v39 = vmul.f32 %v5727_v50, %v7456_v25 }
 0x972   : > { %v3837_v6 = vpack.c.bf16 %v3813_v28, %v7607_v57  ;;  %v3833_v5 = vpack.c.bf16 %v3803_v24, %v3800_v14  ;;  %v3761_v40 = vmul.f32 %v5729_v12, %v7454_v32  ;;  %v7854_v24 = vld [vmem:[#allocation26_spill] sm:$0xff] }
 0x973   : > { %4104 = vmatprep.mubr.bf16.mxu0 %v3832_v2 }
 0x974   : > { %v3413_v38 = vpop.f32.mrb[136].mxu1  ;;  %5009 = vmatmul.mubr.bf16.gmra.mrb[152].mxu1 %v3833_v5 }
 0x975   : > { %4105 = vmatmul.mubr.bf16.gmra.mrb[132].mxu0 %v3831_v11  ;;  %v3805_v52 = vmul.f32 %v3757_v31, %v3413_v38  ;;  %v3415_v4 = vpop.f32.mrb[137].mxu1 }
 0x976   : > { %v3806_v47 = vmul.f32 %v3758_v46, %v3415_v4  ;;  %v3417_v16 = vpop.f32.mrb[138].mxu1  ;;  %v5731_v37 = vpop.eup %5730 }
 0x977   : > { %v3808_v30 = vmul.f32 %v3760_v39, %v3417_v16  ;;  %v3419_v53 = vpop.f32.mrb[139].mxu1  ;;  %v5733_v45 = vpop.eup %5732  ;;  %v3763_v7 = vmul.f32 %v5731_v37, %v7479_v0 }
 0x978   : > { %v3809_v36 = vmul.f32 %v3761_v40, %v3419_v53  ;;  %v5735_v59 = vpop.eup %5734  ;;  %v3764_v25 = vmul.f32 %v5733_v45, %v7476_v19  ;;  %v7855_v45 = vld [vmem:[#allocation27_spill] sm:$0xff] }
 0x979   : > { %v3835_v60 = vpack.c.bf16 %v3808_v30, %v3805_v52  ;;  %v5737_v48 = vpop.eup %5736  ;;  %v3766_v32 = vmul.f32 %v5735_v59, %v7493_v55 }
 0x97a   : > { %v3836_v44 = vpack.c.bf16 %v3809_v36, %v3806_v47  ;;  %v3767_v10 = vmul.f32 %v5737_v48, %v7831_v35  ;;  %v7856_v48 = vld [vmem:[#allocation28_spill] sm:$0xff] }
 0x97b   : > { %4112 = vmatprep.mubr.bf16.mxu0 %v3835_v60 }
 0x97c   : > { %v3423_v13 = vpop.f32.mrb[140].mxu1  ;;  %5012 = vmatprep.mubr.bf16.mxu1 %v3836_v44 }
 0x97d   : > { %4113 = vmatmul.mubr.bf16.gmra.mrb[136].mxu0 %v3834_v51  ;;  %v3811_v11 = vmul.f32 %v3763_v7, %v3423_v13  ;;  %v3425_v57 = vpop.f32.mrb[141].mxu1  ;;  %v7857_v13 = vld [vmem:[#allocation29_spill] sm:$0xff] }
 0x97e   : > { %v3812_v62 = vmul.f32 %v3764_v25, %v3425_v57  ;;  %v3427_v23 = vpop.f32.mrb[142].mxu1 }
 0x97f   : > { %v3814_v27 = vmul.f32 %v3766_v32, %v3427_v23  ;;  %v3429_v20 = vpop.f32.mrb[143].mxu1 }
 0x980   : > { %v3815_v0 = vmul.f32 %v3767_v10, %v3429_v20 }
 0x981   : > { %v3838_v18 = vpack.c.bf16 %v3814_v27, %v3811_v11  ;;  %v7858_v11 = vld [vmem:[#allocation30_spill] sm:$0xff] }
 0x982   : > { %v3839_v63 = vpack.c.bf16 %v3815_v0, %v3812_v62 }
 0x983   : > { %4120 = vmatprep.mubr.bf16.mxu0 %v3838_v18 }
 0x984   : > { %5013 = vmatmul.mubr.bf16.gmra.mrb[156].mxu1 %v3839_v63 }
 0x985   : > { %4121 = vmatmul.mubr.bf16.gmra.mrb[140].mxu0 %v3837_v6 }
 0xa20   : > { %v4728_v19 = vpop.f32.mrb[112].mxu0 }
 0xa21   : > { %v4729_v17 = vpop.f32.mrb[113].mxu0 }
 0xa22   : > { %v4730_v49 = vadd.f32 %v4729_v17, %v4728_v19  ;;  %v4731_v51 = vpop.f32.mrb[114].mxu0 }
 0xa23   : > { %v4732_v3 = vpop.f32.mrb[115].mxu0 }
 0xa24   : > { %v4733_v55 = vadd.f32 %v4732_v3, %v4731_v51 }
 0xa27   : > { %v5002_v58 = vpop.f32.mrb[144].mxu1 }
 0xa28   : > { %v4734_v61 = vpop.f32.mrb[116].mxu0  ;;  %v4163_v41 = vpop.f32.mrb[145].mxu1 }
 0xa29   : > { %v4735_v35 = vpop.f32.mrb[117].mxu0  ;;  %v4164_v15 = vadd.f32 %v4730_v49, %v4163_v41  ;;  %v5003_v42 = vpop.f32.mrb[146].mxu1  ;;  %v7859_v41 = vld [vmem:[#allocation31_spill] sm:$0xff] }
 0xa2a   : > { %v4736_v56 = vadd.f32 %v4735_v35, %v4734_v61  ;;  %v4737_v33 = vpop.f32.mrb[118].mxu0  ;;  %v4166_v1 = vpop.f32.mrb[147].mxu1 }
 0xa2b   : > { %v4738_v34 = vpop.f32.mrb[119].mxu0  ;;  %v4226_v8 = vadd.f32 %v4164_v15, %v7851_v21  ;;  %v4167_v14 = vadd.f32 %v4733_v55, %v4166_v1 }
 0xa2c   : > { %v4172_v22 = vadd.f32 %v5002_v58, %v4736_v56  ;;  %v4739_v28 = vadd.f32 %v4738_v34, %v4737_v33 }
 0xa2d   : > { %4242 = vst [vmem:[%s7638_s25] sm:$0xff] %v4226_v8  ;;  %v4227_v6 = vadd.f32 %v4167_v14, %v7853_v54  ;;  %v7862_v8 = vld [vmem:[#allocation34_spill] sm:$0xff] }
 0xa2e   : > { %v4228_v29 = vadd.f32 %v4172_v22, %v7852_v26  ;;  %v4175_v9 = vadd.f32 %v5003_v42, %v4739_v28  ;;  %v7860_v42 = vld [vmem:[#allocation32_spill] sm:$0xff]  ;;  %v7861_v22 = vld [vmem:[#allocation33_spill] sm:$0xff] }
 0xa2f   : > { %4243 = vst [vmem:[%s7638_s25 + $0x8] sm:$0xff] %v4227_v6 }
 0xa30   : > { %4244 = vst [vmem:[%s7638_s25 + $0x10] sm:$0xff] %v4228_v29  ;;  %v4229_v43 = vadd.f32 %v4175_v9, %v7854_v24  ;;  %v4740_v2 = vpop.f32.mrb[120].mxu0 }
 0xa31   : > { %v4741_v50 = vpop.f32.mrb[121].mxu0 }
 0xa32   : > { %4245 = vst [vmem:[%s7638_s25 + $0x18] sm:$0xff] %v4229_v43  ;;  %v4742_v5 = vadd.f32 %v4741_v50, %v4740_v2  ;;  %v4743_v12 = vpop.f32.mrb[122].mxu0 }
 0xa33   : > { %v4744_v31 = vpop.f32.mrb[123].mxu0 }
 0xa34   : > { %v4745_v46 = vadd.f32 %v4744_v31, %v4743_v12 }
 0xa37   : > { %v5006_v39 = vpop.f32.mrb[148].mxu1 }
 0xa38   : > { %v4746_v38 = vpop.f32.mrb[124].mxu0  ;;  %v4179_v4 = vpop.f32.mrb[149].mxu1 }
 0xa39   : > { %v4747_v52 = vpop.f32.mrb[125].mxu0  ;;  %v4180_v47 = vadd.f32 %v4742_v5, %v4179_v4  ;;  %v5007_v30 = vpop.f32.mrb[150].mxu1  ;;  %v7863_v4 = vld [vmem:[#allocation35_spill] sm:$0xff] }
 0xa3a   : > { %v4748_v40 = vadd.f32 %v4747_v52, %v4746_v38  ;;  %v4749_v16 = vpop.f32.mrb[126].mxu0  ;;  %v4182_v37 = vpop.f32.mrb[151].mxu1 }
 0xa3b   : > { %v4750_v53 = vpop.f32.mrb[127].mxu0  ;;  %v4230_v60 = vadd.f32 %v4180_v47, %v7855_v45  ;;  %v4183_v44 = vadd.f32 %v4745_v46, %v4182_v37 }
 0xa3c   : > { %v4188_v36 = vadd.f32 %v5006_v39, %v4748_v40  ;;  %v4751_v59 = vadd.f32 %v4750_v53, %v4749_v16 }
 0xa3d   : > { %4246 = vst [vmem:[%s7638_s25 + $0x20] sm:$0xff] %v4230_v60  ;;  %v4231_v32 = vadd.f32 %v4183_v44, %v7857_v13  ;;  %v7867_v60 = vld [vmem:[#allocation38_spill] sm:$0xff] }
 0xa3e   : > { %v4232_v7 = vadd.f32 %v4188_v36, %v7856_v48  ;;  %v4191_v25 = vadd.f32 %v5007_v30, %v4751_v59  ;;  %v7864_v30 = vld [vmem:[#allocation36_spill] sm:$0xff]  ;;  %v7865_v36 = vld [vmem:[#allocation37_spill] sm:$0xff] }
 0xa3f   : > { %4247 = vst [vmem:[%s7638_s25 + $0x28] sm:$0xff] %v4231_v32 }
 0xa40   : > { %4248 = vst [vmem:[%s7638_s25 + $0x30] sm:$0xff] %v4232_v7  ;;  %v4233_v57 = vadd.f32 %v4191_v25, %v7858_v11  ;;  %v4752_v10 = vpop.f32.mrb[128].mxu0 }
 0xa41   : > { %v4753_v62 = vpop.f32.mrb[129].mxu0 }
 0xa42   : > { %4249 = vst [vmem:[%s7638_s25 + $0x38] sm:$0xff] %v4233_v57  ;;  %v4754_v23 = vadd.f32 %v4753_v62, %v4752_v10  ;;  %v4755_v27 = vpop.f32.mrb[130].mxu0 }
 0xa43   : > { %v4756_v20 = vpop.f32.mrb[131].mxu0 }
 0xa44   : > { %v4757_v0 = vadd.f32 %v4756_v20, %v4755_v27 }
 0xa47   : > { %v5010_v63 = vpop.f32.mrb[152].mxu1 }
 0xa48   : > { %v4758_v18 = vpop.f32.mrb[132].mxu0  ;;  %v4195_v17 = vpop.f32.mrb[153].mxu1 }
 0xa49   : > { %v4759_v19 = vpop.f32.mrb[133].mxu0  ;;  %v4196_v51 = vadd.f32 %v4754_v23, %v4195_v17  ;;  %v5011_v55 = vpop.f32.mrb[154].mxu1 }
 0xa4a   : > { %v4760_v49 = vadd.f32 %v4759_v19, %v4758_v18  ;;  %v4761_v3 = vpop.f32.mrb[134].mxu0  ;;  %v4198_v58 = vpop.f32.mrb[155].mxu1 }
 0xa4b   : > { %v4762_v61 = vpop.f32.mrb[135].mxu0  ;;  %v4234_v56 = vadd.f32 %v4196_v51, %v7859_v41  ;;  %v4199_v33 = vadd.f32 %v4757_v0, %v4198_v58 }
 0xa4c   : > { %v4204_v35 = vadd.f32 %v5010_v63, %v4760_v49  ;;  %v4763_v15 = vadd.f32 %v4762_v61, %v4761_v3 }
 0xa4d   : > { %4250 = vst [vmem:[%s7638_s25 + $0x40] sm:$0xff] %v4234_v56  ;;  %v4235_v21 = vadd.f32 %v4199_v33, %v7861_v22 }
 0xa4e   : > { %v4236_v34 = vadd.f32 %v4204_v35, %v7860_v42  ;;  %v4207_v1 = vadd.f32 %v5011_v55, %v4763_v15 }
 0xa4f   : > { %4251 = vst [vmem:[%s7638_s25 + $0x48] sm:$0xff] %v4235_v21 }
 0xa50   : > { %4252 = vst [vmem:[%s7638_s25 + $0x50] sm:$0xff] %v4236_v34  ;;  %v4237_v28 = vadd.f32 %v4207_v1, %v7862_v8  ;;  %v4764_v14 = vpop.f32.mrb[136].mxu0 }
 0xa51   : > { %v4765_v26 = vpop.f32.mrb[137].mxu0 }
 0xa52   : > { %4253 = vst [vmem:[%s7638_s25 + $0x58] sm:$0xff] %v4237_v28  ;;  %v4766_v29 = vadd.f32 %v4765_v26, %v4764_v14  ;;  %v4767_v9 = vpop.f32.mrb[138].mxu0 }
 0xa53   : > { %v4768_v54 = vpop.f32.mrb[139].mxu0 }
 0xa54   : > { %v4769_v6 = vadd.f32 %v4768_v54, %v4767_v9 }
 0xa57   : > { %v5014_v43 = vpop.f32.mrb[156].mxu1 }
 0xa58   : > { %v4770_v24 = vpop.f32.mrb[140].mxu0  ;;  %v4211_v50 = vpop.f32.mrb[157].mxu1 }
 0xa59   : > { %v4771_v2 = vpop.f32.mrb[141].mxu0  ;;  %v4212_v12 = vadd.f32 %v4766_v29, %v4211_v50  ;;  %v5015_v46 = vpop.f32.mrb[158].mxu1 }
 0xa5a   : > { %v4772_v5 = vadd.f32 %v4771_v2, %v4770_v24  ;;  %v4773_v31 = vpop.f32.mrb[142].mxu0  ;;  %v4214_v39 = vpop.f32.mrb[159].mxu1 }
 0xa5b   : > { %v4774_v38 = vpop.f32.mrb[143].mxu0  ;;  %v4238_v40 = vadd.f32 %v4212_v12, %v7863_v4  ;;  %v4215_v16 = vadd.f32 %v4769_v6, %v4214_v39 }
 0xa5c   : > { %v4220_v52 = vadd.f32 %v5014_v43, %v4772_v5  ;;  %v4775_v47 = vadd.f32 %v4774_v38, %v4773_v31 }
 0xa5d   : > { %4254 = vst [vmem:[%s7638_s25 + $0x60] sm:$0xff] %v4238_v40  ;;  %v4239_v45 = vadd.f32 %v4215_v16, %v7865_v36 }
 0xa5e   : > { %v4240_v53 = vadd.f32 %v4220_v52, %v7864_v30  ;;  %v4223_v37 = vadd.f32 %v5015_v46, %v4775_v47 }
 0xa5f   : > { %4255 = vst [vmem:[%s7638_s25 + $0x68] sm:$0xff] %v4239_v45 }
 0xa60   : > { %4256 = vst [vmem:[%s7638_s25 + $0x70] sm:$0xff] %v4240_v53  ;;  %v4241_v59 = vadd.f32 %v4223_v37, %v7867_v60 }
 0xa62   : > { %4257 = vst [vmem:[%s7638_s25 + $0x78] sm:$0xff] %v4241_v59 }
 0xa63   : > { %5965 = shalt.err (!%p5962_p8)
}
 0xa64   : > { %s5966_s17 = scalar_lea.hbm %s7671_s9, 2048  ;;  %s5970_s13 = scalar_lea.hbm %s7866_s23, 4096 }
 0xa65   : > { %p5967_p7 = scmp.ne.s32.totalorder %s7671_s9, %s5966_s17  ;;  %p5971_p3 = scmp.lt.u32.totalorder %s7671_s9, %s7866_s23 }
 0xa66   : > { %p5972_p0 = scmp.lt.u32.totalorder %s5970_s13, %s5966_s17  ;;  %p5974_p6 = scmp.lt.u32.totalorder %s5966_s17, %s7671_s9 }
 0xa67   : > { %p5968_p9 = pnand %p5967_p7, %p7868_p5 }
 0xa68   : > { %p5973_p2 = por %p5972_p0, %p5971_p3 }
 0xa69   : > { %p5969_p4 = pneg %p5968_p9 }
 0xa6a   : > { %p5975_p10 = por %p5974_p6, %p5973_p2 }
 0xa6c   : > { %p5976_p1 = pnand %p5975_p10, %p5969_p4 }
 0xa6e   : > { %5979 = shalt.err (!%p5976_p1)
}
 0xa6f   : > { %s6053_s16 = smov 128   ;;  %s6054_s24 = smov 8  }
 0xa70   : > { %5058 = dma.vmem_to_hbm [thread:$0]  (%p7868_p5), %s7673_s20, 2048, %s7671_s9, %s4259_s15, %s6053_s16, %s6053_s16, %s6054_s24  }
 0xa71 PF: > { %s4287_s19 = sand.u32 1, %s6018_s30   ;;  %p7869_p11 = scmp.ne.s32.totalorder %s7780_s22, 0 }
 0xa72   : > { %p7870_p12 = scmp.ge.s32.totalorder %s6030_s12, 2  ;;  %s4288_s17 = scalar_lea.sflag [#allocation7], %s4287_s19 }
 0xa74   : > { %p5084_p13 = pnand %p7870_p12, %p7869_p11 }
 0xa76   : > { %6013 = dma.done.wait (!%p5084_p13), %s4288_s17, 2048  }
 0xa77   : > { %6015 = vsyncadd (!%p5084_p13), %s4288_s17, 4294965248  ;;  %p25_p8 = scmp.ge.s32.totalorder %s6290_s27, 4   ;;  %s7871_s30 = smov %s6022_s10 }
 0xa78   : > { %s7872_s10 = smov %s6026_s11  ;;  %s7873_s11 = smov %s6301_s28 }
 0xa79   : > { %s7874_s12 = smov %s6290_s27  ;;  %27 = sbr.rel (!%p25_p8) target bundleno = 10 (0xa), region = 128 }
 0xa80   :  { %4293 = vsyncpa [#allocation6], 1 }
 0xa81   :  { %4295 = vsyncpa [#allocation6 + $0x1], 1 }
 0xa82   :  { %4296 = vsyncpa [#allocation9], 1 }
 0xa83   :  { %4297 = vsyncpa [#allocation12], 1 }
 0xa84   :  { %4298 = vsyncpa [#allocation15], 1 }
 0xa85   :  { %4299 = vsyncpa [#allocation7], 1 }
 0xa86   :  { %4301 = vsyncpa [#allocation7 + $0x1], 1 }

</bundles_post_ra>
